<compile_context>
chip_gen: v5e
topology: v5e:2x2
jax: 0.10.0
libtpu: 0.0.40
codegen_flags: <defaults>
</compile_context>

<pallas_src>
import functools

import jax
import jax.numpy as jnp
from jax.experimental import pallas as pl
from jax.experimental.pallas import tpu as pltpu


def _round_up(x, m):
    return ((x + m - 1) // m) * m


def _vmem_budget_and_limit():
    """Tile budget / Mosaic VMEM limit derived from the actual chip."""
    cap = 64 * 1024 * 1024                       # v7x per-core VMEM (worst case)
    try:
        cap = int(getattr(pltpu.get_tpu_info(), "vmem_capacity_bytes", cap))
    except Exception:
        pass
    budget = int(cap * 0.55)                     # headroom for Mosaic internal scratch
    limit = min(int(cap * 0.90), 112 * 1024 * 1024)
    return budget, limit


# ----------------------------------------------------------------------------
# Pallas kernel: implicit-im2col conv + folded-BN shift [+ residual] [+ ReLU]
# ----------------------------------------------------------------------------
def _conv_bn_kernel(*refs, taps, apply_relu, has_residual):
    """One grid step computes the (1, Ho, Wo, tn) output tile of one image.

    refs:
      x_ref     (P, Hph, Wph, Ci)  bf16 phase-split padded input (whole image)
      w_ref     (T, Ci, tn)        bf16 weights, BN scale folded in
      shift_ref (1, tn)            f32  folded BN shift
      [res_ref  (1, Ho, Wo, tn)]   bf16 residual (optional)
      o_ref     (1, Ho, Wo, tn)
    taps: tuple of (phase_index, row_off, col_off), one per kernel tap,
          matching w_ref[t].
    """
    if has_residual:
        x_ref, w_ref, shift_ref, res_ref, o_ref = refs
    else:
        x_ref, w_ref, shift_ref, o_ref = refs
        res_ref = None

    _, Ho, Wo, tn = o_ref.shape
    Ci = x_ref.shape[-1]

    # kh*kw partial matmuls accumulated in f32 (implicit im2col: no patch
    # matrix, the activation is read from HBM exactly once).
    acc = jnp.zeros((Ho * Wo, tn), jnp.float32)
    for t, (p, oi, oj) in enumerate(taps):
        xs = x_ref[p, oi:oi + Ho, oj:oj + Wo, :].reshape(Ho * Wo, Ci)
        acc += jnp.dot(xs, w_ref[t], preferred_element_type=jnp.float32)

    y = acc + shift_ref[...]                          # folded BN shift (scale is in w)
    if has_residual:
        y = y + res_ref[...].reshape(Ho * Wo, tn).astype(jnp.float32)
    if apply_relu:
        y = jnp.maximum(y, 0.0)
    o_ref[...] = y.reshape(1, Ho, Wo, tn).astype(o_ref.dtype)


# ----------------------------------------------------------------------------
# Host-side glue
# ----------------------------------------------------------------------------
def fused_conv_bn(x_nhwc, w_packed, shift, *, kh, kw, stride, pad,
                  residual=None, apply_relu=True, out_dtype=jnp.bfloat16):
    """conv(kh x kw, stride, pad, no bias) + BN(eval, folded) [+ residual] [+ ReLU].

    x_nhwc:   (N, H, W, C) with C <= Ci (zero-padded to Ci here).
    w_packed: (kh*kw, Ci, Cp) bf16, BN scale folded, channel-padded.
    shift:    (1, Cp) f32.
    residual: (N, Ho, Wo, <=Cp), added before the final ReLU.
    Returns (N, Ho, Wo, Cp): output channels stay padded so the next conv can
    consume the result without an extra slice/pad pass.
    """
    N, H, W, C = x_nhwc.shape
    T, Ci, Cp = w_packed.shape
    assert T == kh * kw and C <= Ci
    s = stride
    Ho = (H + 2 * pad - kh) // s + 1
    Wo = (W + 2 * pad - kw) // s + 1

    # -- implicit-im2col prep: pad once, split into stride phases (single pass) --
    x = jnp.pad(x_nhwc.astype(jnp.bfloat16),
                ((0, 0), (pad, pad), (pad, pad), (0, Ci - C)))
    Hph = Ho + (kh - 1) // s
    Wph = Wo + (kw - 1) // s
    phases = sorted({(di % s, dj % s) for di in range(kh) for dj in range(kw)})
    views = []
    for (pi, pj) in phases:
        v = x[:, pi::s, pj::s, :]
        v = jnp.pad(v, ((0, 0),
                        (0, max(0, Hph - v.shape[1])),
                        (0, max(0, Wph - v.shape[2])),
                        (0, 0)))[:, :Hph, :Wph, :]
        views.append(v)
    P = len(phases)
    xs = jnp.stack(views, axis=1).reshape(N * P, Hph, Wph, Ci)   # (N*P, Hph, Wph, Ci)
    taps = tuple((phases.index((di % s, dj % s)), di // s, dj // s)
                 for di in range(kh) for dj in range(kw))

    has_res = residual is not None
    if has_res:
        res = residual.astype(jnp.bfloat16)
        res = jnp.pad(res, ((0, 0), (0, 0), (0, 0), (0, Cp - res.shape[-1])))

    # -- output-channel tile tn: weights grid-resident whenever footprint fits --
    out_bytes = jnp.dtype(out_dtype).itemsize
    budget, vmem_limit = _vmem_budget_and_limit()

    def footprint(tn_):
        b = 2 * (P * Hph * Wph * Ci * 2)           # input phases (bf16, dbl-buffered)
        b += 2 * (T * Ci * tn_ * 2)                # weights      (bf16, dbl-buffered)
        b += 2 * (tn_ * 4)                         # BN shift
        b += 2 * (Ho * Wo * tn_ * out_bytes)       # output tile
        b += Ho * Wo * tn_ * 4                     # f32 accumulator / epilogue staging
        if has_res:
            b += 2 * (Ho * Wo * tn_ * 2)           # residual tile
        return b

    tn_cands = [c for c in range(Cp, 0, -128) if Cp % c == 0]    # 128-multiples dividing Cp
    tn = next((c for c in tn_cands if footprint(c) <= budget), 128)
    # v7x: keep >= 2 grid programs so both TensorCores get work.
    if N * (Cp // tn) < 2:
        smaller = [c for c in tn_cands if c < tn]
        if smaller:
            tn = smaller[0]

    in_specs = [
        pl.BlockSpec((P, Hph, Wph, Ci), lambda j, n: (n, 0, 0, 0)),   # whole-image phases
        pl.BlockSpec((T, Ci, tn), lambda j, n: (0, 0, j)),            # weights (slow axis only)
        pl.BlockSpec((1, tn), lambda j, n: (0, j)),                   # BN shift
    ]
    operands = [xs, w_packed, shift]
    if has_res:
        in_specs.append(pl.BlockSpec((1, Ho, Wo, tn), lambda j, n: (n, 0, 0, j)))
        operands.append(res)

    out = pl.pallas_call(
        functools.partial(_conv_bn_kernel, taps=taps,
                          apply_relu=apply_relu, has_residual=has_res),
        out_shape=jax.ShapeDtypeStruct((N, Ho, Wo, Cp), out_dtype),
        grid_spec=pltpu.PrefetchScalarGridSpec(
            num_scalar_prefetch=0,
            grid=(Cp // tn, N),               # j (weights) outer, n (image) inner
            in_specs=in_specs,
            out_specs=pl.BlockSpec((1, Ho, Wo, tn), lambda j, n: (n, 0, 0, j)),
        ),
        compiler_params=pltpu.CompilerParams(
            dimension_semantics=("parallel", "parallel"),
            vmem_limit_bytes=vmem_limit),
    )(*operands)
    return out


# ----------------------------------------------------------------------------
# One-time parameter preparation (hoisted out of the per-forward path)
# ----------------------------------------------------------------------------
def prepare_conv_bn(w_oihw, gamma, beta, mean, var, eps=1e-5):
    """Fold BN scale into the conv weights, pad channels, cast to bf16."""
    Cout, Cin, kh, kw = w_oihw.shape
    Ci = _round_up(Cin, 128)     # lane padding only (per-tap K = Cin, no kh*kw*Cin round-up)
    Cp = _round_up(Cout, 128)
    inv_std = jax.lax.rsqrt(var.astype(jnp.float32) + eps)
    scale = gamma.astype(jnp.float32) * inv_std
    shift = beta.astype(jnp.float32) - mean.astype(jnp.float32) * scale
    w = jnp.transpose(w_oihw.astype(jnp.float32), (2, 3, 1, 0)).reshape(kh * kw, Cin, Cout)
    w = w * scale[None, None, :]                              # BN scale folded (f32)
    w = jnp.pad(w, ((0, 0), (0, Ci - Cin), (0, Cp - Cout))).astype(jnp.bfloat16)
    shift = jnp.pad(shift, (0, Cp - Cout)).reshape(1, Cp)
    return {"w": w, "shift": shift}


def prepare_basic_block_params(params, in_planes, planes, stride):
    prep = {
        "conv1": prepare_conv_bn(params["conv1_w"], *params["bn1"]),
        "conv2": prepare_conv_bn(params["conv2_w"], *params["bn2"]),
    }
    if stride != 1 or in_planes != planes:
        prep["sc"] = prepare_conv_bn(params["sc_w"], *params["bn_sc"])
    return prep


def basic_block_forward(x_nchw, prep, *, in_planes, planes, stride):
    """Pallas implementation of BasicBlock.forward (input/output in NCHW)."""
    x = jnp.transpose(x_nchw, (0, 2, 3, 1))        # -> NHWC (kernels work in NHWC)

    # conv1 -> BN -> ReLU  (bf16 intermediate, channels stay padded)
    out1 = fused_conv_bn(x, prep["conv1"]["w"], prep["conv1"]["shift"],
                         kh=3, kw=3, stride=stride, pad=1,
                         apply_relu=True, out_dtype=jnp.bfloat16)

    cp2 = prep["conv2"]["w"].shape[-1]
    if "sc" in prep:
        sc = fused_conv_bn(x, prep["sc"]["w"], prep["sc"]["shift"],
                           kh=1, kw=1, stride=stride, pad=0,
                           apply_relu=False, out_dtype=jnp.bfloat16)
    else:
        # Identity shortcut, kept in bf16 (halves residual HBM bytes; within
        # bf16 tolerance of PyTorch's f32 add), padded to conv2's channel count.
        sc = jnp.pad(x.astype(jnp.bfloat16),
                     ((0, 0), (0, 0), (0, 0), (0, cp2 - x.shape[-1])))

    # conv2 -> BN -> (+shortcut) -> ReLU, fully fused; block output in f32.
    out2 = fused_conv_bn(out1, prep["conv2"]["w"], prep["conv2"]["shift"],
                         kh=3, kw=3, stride=1, pad=1, residual=sc,
                         apply_relu=True, out_dtype=jnp.float32)

    # Only the block boundary pays the unpad + NCHW transpose (no-op slice when
    # planes is already a 128-multiple); NHWC consumers could skip both.
    out2 = out2[..., :planes]
    return jnp.transpose(out2, (0, 3, 1, 2))       # -> NCHW


# ----------------------------------------------------------------------------
# Pure-JAX reference (sanity check)
# ----------------------------------------------------------------------------
def _ref_conv(x, w, stride, pad):
    return jax.lax.conv_general_dilated(
        x, w, (stride, stride), [(pad, pad), (pad, pad)],
        dimension_numbers=("NCHW", "OIHW", "NCHW"))


def _ref_bn(x, gamma, beta, mean, var, eps=1e-5):
    g = gamma[None, :, None, None]
    b = beta[None, :, None, None]
    m = mean[None, :, None, None]
    v = var[None, :, None, None]
    return (x - m) * g / jnp.sqrt(v + eps) + b


def _ref_block(x, params, in_planes, planes, stride):
    out = jax.nn.relu(_ref_bn(_ref_conv(x, params["conv1_w"], stride, 1),
                              *params["bn1"]))
    out = _ref_bn(_ref_conv(out, params["conv2_w"], 1, 1), *params["bn2"])
    if stride != 1 or in_planes != planes:
        sc = _ref_bn(_ref_conv(x, params["sc_w"], stride, 0), *params["bn_sc"])
    else:
        sc = x
    return jax.nn.relu(out + sc)


# ----------------------------------------------------------------------------
if __name__ == "__main__":
    in_planes, planes, stride = 4, 8, 2
    N, H, W = 2, 16, 16

    key = jax.random.PRNGKey(0)
    ks = jax.random.split(key, 8)

    def bn_params(k):
        k1, k2, k3, k4 = jax.random.split(k, 4)
        gamma = 1.0 + 0.1 * jax.random.normal(k1, (planes,), jnp.float32)
        beta = 0.1 * jax.random.normal(k2, (planes,), jnp.float32)
        mean = 0.1 * jax.random.normal(k3, (planes,), jnp.float32)
        var = jnp.abs(1.0 + 0.1 * jax.random.normal(k4, (planes,), jnp.float32))
        return (gamma, beta, mean, var)

    params = {
        "conv1_w": 0.2 * jax.random.normal(ks[0], (planes, in_planes, 3, 3), jnp.float32),
        "bn1": bn_params(ks[1]),
        "conv2_w": 0.2 * jax.random.normal(ks[2], (planes, planes, 3, 3), jnp.float32),
        "bn2": bn_params(ks[3]),
        "sc_w": 0.2 * jax.random.normal(ks[4], (planes, in_planes, 1, 1), jnp.float32),
        "bn_sc": bn_params(ks[5]),
    }

    x = jax.random.normal(ks[6], (N, in_planes, H, W), jnp.float32)  # NCHW, PyTorch-style

    # One-time parameter prep (fold BN scale, pad, bf16) — outside the hot path.
    prep = prepare_basic_block_params(params, in_planes, planes, stride)

    fwd = jax.jit(functools.partial(basic_block_forward,
                                    in_planes=in_planes, planes=planes, stride=stride))
    out = jax.block_until_ready(fwd(x, prep))

    # sanity check vs pure-JAX f32 reference (bf16 MXU operands / intermediates)
    ref = jax.block_until_ready(_ref_block(x, params, in_planes, planes, stride))
    assert out.shape == (N, planes, H // stride, W // stride), out.shape
    rel = float(jnp.linalg.norm(out - ref) / jnp.linalg.norm(ref))
    max_abs = float(jnp.max(jnp.abs(out - ref)))
    assert rel < 3e-2 and max_abs < 0.5, (rel, max_abs)

    print("KERNEL_OK")
</pallas_src>

<mosaic_0001>
module attributes {stable_mosaic.version = 11 : i64} {
  func.func @_conv_bn_kernel(%arg0: i32, %arg1: i32, %arg2: memref<1x8x8x128xbf16, #tpu.memory_space<vmem>>, %arg3: memref<1x128x128xbf16, #tpu.memory_space<vmem>>, %arg4: memref<1x128xf32, #tpu.memory_space<vmem>>, %arg5: memref<1x8x8x128xbf16, #tpu.memory_space<vmem>>) attributes {dimension_semantics = [#tpu.dimension_semantics<parallel>, #tpu.dimension_semantics<parallel>], iteration_bounds = array<i64: 1, 2>, scalar_prefetch = 0 : i64, scratch_operands = 0 : i64, tpu.core_type = #tpu.core_type<tc>, window_params = [{transform_indices = @transform_0, window_bounds = array<i64: 1, 8, 8, 128>}, {transform_indices = @transform_1, window_bounds = array<i64: 1, 128, 128>}, {transform_indices = @transform_2, window_bounds = array<i64: 1, 128>}, {transform_indices = @transform_3, window_bounds = array<i64: 1, 8, 8, 128>}]} {
    %cst = arith.constant 0.000000e+00 : f32
    %0 = vector.broadcast %cst : f32 to vector<64x128xf32>
    %c0 = arith.constant 0 : index
    %c0_0 = arith.constant 0 : index
    %c0_1 = arith.constant 0 : index
    %c0_2 = arith.constant 0 : index
    %1 = vector.load %arg2[%c0, %c0_0, %c0_1, %c0_2] : memref<1x8x8x128xbf16, #tpu.memory_space<vmem>>, vector<1x8x8x128xbf16>
    %2 = vector.shape_cast %1 : vector<1x8x8x128xbf16> to vector<8x8x128xbf16>
    %3 = vector.shape_cast %2 : vector<8x8x128xbf16> to vector<64x128xbf16>
    %c0_3 = arith.constant 0 : index
    %c0_4 = arith.constant 0 : index
    %c0_5 = arith.constant 0 : index
    %4 = vector.load %arg3[%c0_3, %c0_4, %c0_5] : memref<1x128x128xbf16, #tpu.memory_space<vmem>>, vector<1x128x128xbf16>
    %5 = vector.shape_cast %4 : vector<1x128x128xbf16> to vector<128x128xbf16>
    %cst_6 = arith.constant dense<0.000000e+00> : vector<64x128xf32>
    %6 = tpu.matmul %3, %5, %cst_6 {dimension_numbers = #tpu.dot_dimension_numbers<[1], [0], [0], [1], [0, 0, 1, 1], [], []>} : vector<64x128xbf16>, vector<128x128xbf16>, vector<64x128xf32> -> vector<64x128xf32>
    %7 = arith.addf %0, %6 : vector<64x128xf32>
    %c0_7 = arith.constant 0 : index
    %c0_8 = arith.constant 0 : index
    %8 = vector.load %arg4[%c0_7, %c0_8] : memref<1x128xf32, #tpu.memory_space<vmem>>, vector<1x128xf32>
    %9 = vector.broadcast %8 : vector<1x128xf32> to vector<64x128xf32>
    %10 = arith.addf %7, %9 : vector<64x128xf32>
    %11 = vector.shape_cast %10 : vector<64x128xf32> to vector<1x8x8x128xf32>
    %12 = arith.truncf %11 : vector<1x8x8x128xf32> to vector<1x8x8x128xbf16>
    %c0_9 = arith.constant 0 : index
    %c0_10 = arith.constant 0 : index
    %c0_11 = arith.constant 0 : index
    %c0_12 = arith.constant 0 : index
    %13 = vector.load %arg5[%c0_9, %c0_10, %c0_11, %c0_12] : memref<1x8x8x128xbf16, #tpu.memory_space<vmem>>, vector<1x8x8x128xbf16>
    tpu.vector_store %arg5[%c0_9, %c0_10, %c0_11, %c0_12], %12 {strides = array<i32>} : memref<1x8x8x128xbf16, #tpu.memory_space<vmem>>, vector<1x8x8x128xbf16>,
    return
  }
  func.func @transform_0(%arg0: i32, %arg1: i32) -> (i32, i32, i32, i32) {
    %c0_i32 = arith.constant 0 : i32
    %c0_i32_0 = arith.constant 0 : i32
    %c0_i32_1 = arith.constant 0 : i32
    %c0_i32_2 = arith.constant 0 : i32
    return %arg1, %c0_i32, %c0_i32_0, %c0_i32_1 : i32, i32, i32, i32
  }
  func.func @transform_1(%arg0: i32, %arg1: i32) -> (i32, i32, i32) {
    %c0_i32 = arith.constant 0 : i32
    %c0_i32_0 = arith.constant 0 : i32
    %c0_i32_1 = arith.constant 0 : i32
    return %c0_i32, %c0_i32_0, %arg0 : i32, i32, i32
  }
  func.func @transform_2(%arg0: i32, %arg1: i32) -> (i32, i32) {
    %c0_i32 = arith.constant 0 : i32
    %c0_i32_0 = arith.constant 0 : i32
    return %c0_i32, %arg0 : i32, i32
  }
  func.func @transform_3(%arg0: i32, %arg1: i32) -> (i32, i32, i32, i32) {
    %c0_i32 = arith.constant 0 : i32
    %c0_i32_0 = arith.constant 0 : i32
    %c0_i32_1 = arith.constant 0 : i32
    return %arg1, %c0_i32, %c0_i32_0, %arg0 : i32, i32, i32, i32
  }
}

module attributes {stable_mosaic.version = 11 : i64} {
  func.func @_conv_bn_kernel(%arg0: i32, %arg1: i32, %arg2: memref<4x9x9x128xbf16, #tpu.memory_space<vmem>>, %arg3: memref<9x128x128xbf16, #tpu.memory_space<vmem>>, %arg4: memref<1x128xf32, #tpu.memory_space<vmem>>, %arg5: memref<1x8x8x128xbf16, #tpu.memory_space<vmem>>) attributes {dimension_semantics = [#tpu.dimension_semantics<parallel>, #tpu.dimension_semantics<parallel>], iteration_bounds = array<i64: 1, 2>, scalar_prefetch = 0 : i64, scratch_operands = 0 : i64, tpu.core_type = #tpu.core_type<tc>, window_params = [{transform_indices = @transform_0, window_bounds = array<i64: 4, 9, 9, 128>}, {transform_indices = @transform_1, window_bounds = array<i64: 9, 128, 128>}, {transform_indices = @transform_2, window_bounds = array<i64: 1, 128>}, {transform_indices = @transform_3, window_bounds = array<i64: 1, 8, 8, 128>}]} {
    %cst = arith.constant 0.000000e+00 : f32
    %0 = vector.broadcast %cst : f32 to vector<64x128xf32>
    %c0 = arith.constant 0 : index
    %c0_0 = arith.constant 0 : index
    %c0_1 = arith.constant 0 : index
    %c0_2 = arith.constant 0 : index
    %1 = vector.load %arg2[%c0, %c0_0, %c0_1, %c0_2] : memref<4x9x9x128xbf16, #tpu.memory_space<vmem>>, vector<1x8x8x128xbf16>
    %2 = vector.shape_cast %1 : vector<1x8x8x128xbf16> to vector<8x8x128xbf16>
    %3 = vector.shape_cast %2 : vector<8x8x128xbf16> to vector<64x128xbf16>
    %c0_3 = arith.constant 0 : index
    %c0_4 = arith.constant 0 : index
    %c0_5 = arith.constant 0 : index
    %4 = vector.load %arg3[%c0_3, %c0_4, %c0_5] : memref<9x128x128xbf16, #tpu.memory_space<vmem>>, vector<1x128x128xbf16>
    %5 = vector.shape_cast %4 : vector<1x128x128xbf16> to vector<128x128xbf16>
    %cst_6 = arith.constant dense<0.000000e+00> : vector<64x128xf32>
    %6 = tpu.matmul %3, %5, %cst_6 {dimension_numbers = #tpu.dot_dimension_numbers<[1], [0], [0], [1], [0, 0, 1, 1], [], []>} : vector<64x128xbf16>, vector<128x128xbf16>, vector<64x128xf32> -> vector<64x128xf32>
    %7 = arith.addf %0, %6 : vector<64x128xf32>
    %c1 = arith.constant 1 : index
    %c0_7 = arith.constant 0 : index
    %c0_8 = arith.constant 0 : index
    %c0_9 = arith.constant 0 : index
    %8 = vector.load %arg2[%c1, %c0_7, %c0_8, %c0_9] : memref<4x9x9x128xbf16, #tpu.memory_space<vmem>>, vector<1x8x8x128xbf16>
    %9 = vector.shape_cast %8 : vector<1x8x8x128xbf16> to vector<8x8x128xbf16>
    %10 = vector.shape_cast %9 : vector<8x8x128xbf16> to vector<64x128xbf16>
    %c1_10 = arith.constant 1 : index
    %c0_11 = arith.constant 0 : index
    %c0_12 = arith.constant 0 : index
    %11 = vector.load %arg3[%c1_10, %c0_11, %c0_12] : memref<9x128x128xbf16, #tpu.memory_space<vmem>>, vector<1x128x128xbf16>
    %12 = vector.shape_cast %11 : vector<1x128x128xbf16> to vector<128x128xbf16>
    %cst_13 = arith.constant dense<0.000000e+00> : vector<64x128xf32>
    %13 = tpu.matmul %10, %12, %cst_13 {dimension_numbers = #tpu.dot_dimension_numbers<[1], [0], [0], [1], [0, 0, 1, 1], [], []>} : vector<64x128xbf16>, vector<128x128xbf16>, vector<64x128xf32> -> vector<64x128xf32>
    %14 = arith.addf %7, %13 : vector<64x128xf32>
    %c0_14 = arith.constant 0 : index
    %c0_15 = arith.constant 0 : index
    %c1_16 = arith.constant 1 : index
    %c0_17 = arith.constant 0 : index
    %15 = vector.load %arg2[%c0_14, %c0_15, %c1_16, %c0_17] : memref<4x9x9x128xbf16, #tpu.memory_space<vmem>>, vector<1x8x8x128xbf16>
    %16 = vector.shape_cast %15 : vector<1x8x8x128xbf16> to vector<8x8x128xbf16>
    %17 = vector.shape_cast %16 : vector<8x8x128xbf16> to vector<64x128xbf16>
    %c2 = arith.constant 2 : index
    %c0_18 = arith.constant 0 : index
    %c0_19 = arith.constant 0 : index
    %18 = vector.load %arg3[%c2, %c0_18, %c0_19] : memref<9x128x128xbf16, #tpu.memory_space<vmem>>, vector<1x128x128xbf16>
    %19 = vector.shape_cast %18 : vector<1x128x128xbf16> to vector<128x128xbf16>
    %cst_20 = arith.constant dense<0.000000e+00> : vector<64x128xf32>
    %20 = tpu.matmul %17, %19, %cst_20 {dimension_numbers = #tpu.dot_dimension_numbers<[1], [0], [0], [1], [0, 0, 1, 1], [], []>} : vector<64x128xbf16>, vector<128x128xbf16>, vector<64x128xf32> -> vector<64x128xf32>
    %21 = arith.addf %14, %20 : vector<64x128xf32>
    %c2_21 = arith.constant 2 : index
    %c0_22 = arith.constant 0 : index
    %c0_23 = arith.constant 0 : index
    %c0_24 = arith.constant 0 : index
    %22 = vector.load %arg2[%c2_21, %c0_22, %c0_23, %c0_24] : memref<4x9x9x128xbf16, #tpu.memory_space<vmem>>, vector<1x8x8x128xbf16>
    %23 = vector.shape_cast %22 : vector<1x8x8x128xbf16> to vector<8x8x128xbf16>
    %24 = vector.shape_cast %23 : vector<8x8x128xbf16> to vector<64x128xbf16>
    %c3 = arith.constant 3 : index
    %c0_25 = arith.constant 0 : index
    %c0_26 = arith.constant 0 : index
    %25 = vector.load %arg3[%c3, %c0_25, %c0_26] : memref<9x128x128xbf16, #tpu.memory_space<vmem>>, vector<1x128x128xbf16>
    %26 = vector.shape_cast %25 : vector<1x128x128xbf16> to vector<128x128xbf16>
    %cst_27 = arith.constant dense<0.000000e+00> : vector<64x128xf32>
    %27 = tpu.matmul %24, %26, %cst_27 {dimension_numbers = #tpu.dot_dimension_numbers<[1], [0], [0], [1], [0, 0, 1, 1], [], []>} : vector<64x128xbf16>, vector<128x128xbf16>, vector<64x128xf32> -> vector<64x128xf32>
    %28 = arith.addf %21, %27 : vector<64x128xf32>
    %c3_28 = arith.constant 3 : index
    %c0_29 = arith.constant 0 : index
    %c0_30 = arith.constant 0 : index
    %c0_31 = arith.constant 0 : index
    %29 = vector.load %arg2[%c3_28, %c0_29, %c0_30, %c0_31] : memref<4x9x9x128xbf16, #tpu.memory_space<vmem>>, vector<1x8x8x128xbf16>
    %30 = vector.shape_cast %29 : vector<1x8x8x128xbf16> to vector<8x8x128xbf16>
    %31 = vector.shape_cast %30 : vector<8x8x128xbf16> to vector<64x128xbf16>
    %c4 = arith.constant 4 : index
    %c0_32 = arith.constant 0 : index
    %c0_33 = arith.constant 0 : index
    %32 = vector.load %arg3[%c4, %c0_32, %c0_33] : memref<9x128x128xbf16, #tpu.memory_space<vmem>>, vector<1x128x128xbf16>
    %33 = vector.shape_cast %32 : vector<1x128x128xbf16> to vector<128x128xbf16>
    %cst_34 = arith.constant dense<0.000000e+00> : vector<64x128xf32>
    %34 = tpu.matmul %31, %33, %cst_34 {dimension_numbers = #tpu.dot_dimension_numbers<[1], [0], [0], [1], [0, 0, 1, 1], [], []>} : vector<64x128xbf16>, vector<128x128xbf16>, vector<64x128xf32> -> vector<64x128xf32>
    %35 = arith.addf %28, %34 : vector<64x128xf32>
    %c2_35 = arith.constant 2 : index
    %c0_36 = arith.constant 0 : index
    %c1_37 = arith.constant 1 : index
    %c0_38 = arith.constant 0 : index
    %36 = vector.load %arg2[%c2_35, %c0_36, %c1_37, %c0_38] : memref<4x9x9x128xbf16, #tpu.memory_space<vmem>>, vector<1x8x8x128xbf16>
    %37 = vector.shape_cast %36 : vector<1x8x8x128xbf16> to vector<8x8x128xbf16>
    %38 = vector.shape_cast %37 : vector<8x8x128xbf16> to vector<64x128xbf16>
    %c5 = arith.constant 5 : index
    %c0_39 = arith.constant 0 : index
    %c0_40 = arith.constant 0 : index
    %39 = vector.load %arg3[%c5, %c0_39, %c0_40] : memref<9x128x128xbf16, #tpu.memory_space<vmem>>, vector<1x128x128xbf16>
    %40 = vector.shape_cast %39 : vector<1x128x128xbf16> to vector<128x128xbf16>
    %cst_41 = arith.constant dense<0.000000e+00> : vector<64x128xf32>
    %41 = tpu.matmul %38, %40, %cst_41 {dimension_numbers = #tpu.dot_dimension_numbers<[1], [0], [0], [1], [0, 0, 1, 1], [], []>} : vector<64x128xbf16>, vector<128x128xbf16>, vector<64x128xf32> -> vector<64x128xf32>
    %42 = arith.addf %35, %41 : vector<64x128xf32>
    %c0_42 = arith.constant 0 : index
    %c1_43 = arith.constant 1 : index
    %c0_44 = arith.constant 0 : index
    %c0_45 = arith.constant 0 : index
    %43 = vector.load %arg2[%c0_42, %c1_43, %c0_44, %c0_45] : memref<4x9x9x128xbf16, #tpu.memory_space<vmem>>, vector<1x8x8x128xbf16>
    %44 = vector.shape_cast %43 : vector<1x8x8x128xbf16> to vector<8x8x128xbf16>
    %45 = vector.shape_cast %44 : vector<8x8x128xbf16> to vector<64x128xbf16>
    %c6 = arith.constant 6 : index
    %c0_46 = arith.constant 0 : index
    %c0_47 = arith.constant 0 : index
    %46 = vector.load %arg3[%c6, %c0_46, %c0_47] : memref<9x128x128xbf16, #tpu.memory_space<vmem>>, vector<1x128x128xbf16>
    %47 = vector.shape_cast %46 : vector<1x128x128xbf16> to vector<128x128xbf16>
    %cst_48 = arith.constant dense<0.000000e+00> : vector<64x128xf32>
    %48 = tpu.matmul %45, %47, %cst_48 {dimension_numbers = #tpu.dot_dimension_numbers<[1], [0], [0], [1], [0, 0, 1, 1], [], []>} : vector<64x128xbf16>, vector<128x128xbf16>, vector<64x128xf32> -> vector<64x128xf32>
    %49 = arith.addf %42, %48 : vector<64x128xf32>
    %c1_49 = arith.constant 1 : index
    %c1_50 = arith.constant 1 : index
    %c0_51 = arith.constant 0 : index
    %c0_52 = arith.constant 0 : index
    %50 = vector.load %arg2[%c1_49, %c1_50, %c0_51, %c0_52] : memref<4x9x9x128xbf16, #tpu.memory_space<vmem>>, vector<1x8x8x128xbf16>
    %51 = vector.shape_cast %50 : vector<1x8x8x128xbf16> to vector<8x8x128xbf16>
    %52 = vector.shape_cast %51 : vector<8x8x128xbf16> to vector<64x128xbf16>
    %c7 = arith.constant 7 : index
    %c0_53 = arith.constant 0 : index
    %c0_54 = arith.constant 0 : index
    %53 = vector.load %arg3[%c7, %c0_53, %c0_54] : memref<9x128x128xbf16, #tpu.memory_space<vmem>>, vector<1x128x128xbf16>
    %54 = vector.shape_cast %53 : vector<1x128x128xbf16> to vector<128x128xbf16>
    %cst_55 = arith.constant dense<0.000000e+00> : vector<64x128xf32>
    %55 = tpu.matmul %52, %54, %cst_55 {dimension_numbers = #tpu.dot_dimension_numbers<[1], [0], [0], [1], [0, 0, 1, 1], [], []>} : vector<64x128xbf16>, vector<128x128xbf16>, vector<64x128xf32> -> vector<64x128xf32>
    %56 = arith.addf %49, %55 : vector<64x128xf32>
    %c0_56 = arith.constant 0 : index
    %c1_57 = arith.constant 1 : index
    %c1_58 = arith.constant 1 : index
    %c0_59 = arith.constant 0 : index
    %57 = vector.load %arg2[%c0_56, %c1_57, %c1_58, %c0_59] : memref<4x9x9x128xbf16, #tpu.memory_space<vmem>>, vector<1x8x8x128xbf16>
    %58 = vector.shape_cast %57 : vector<1x8x8x128xbf16> to vector<8x8x128xbf16>
    %59 = vector.shape_cast %58 : vector<8x8x128xbf16> to vector<64x128xbf16>
    %c8 = arith.constant 8 : index
    %c0_60 = arith.constant 0 : index
    %c0_61 = arith.constant 0 : index
    %60 = vector.load %arg3[%c8, %c0_60, %c0_61] : memref<9x128x128xbf16, #tpu.memory_space<vmem>>, vector<1x128x128xbf16>
    %61 = vector.shape_cast %60 : vector<1x128x128xbf16> to vector<128x128xbf16>
    %cst_62 = arith.constant dense<0.000000e+00> : vector<64x128xf32>
    %62 = tpu.matmul %59, %61, %cst_62 {dimension_numbers = #tpu.dot_dimension_numbers<[1], [0], [0], [1], [0, 0, 1, 1], [], []>} : vector<64x128xbf16>, vector<128x128xbf16>, vector<64x128xf32> -> vector<64x128xf32>
    %63 = arith.addf %56, %62 : vector<64x128xf32>
    %c0_63 = arith.constant 0 : index
    %c0_64 = arith.constant 0 : index
    %64 = vector.load %arg4[%c0_63, %c0_64] : memref<1x128xf32, #tpu.memory_space<vmem>>, vector<1x128xf32>
    %65 = vector.broadcast %64 : vector<1x128xf32> to vector<64x128xf32>
    %66 = arith.addf %63, %65 : vector<64x128xf32>
    %cst_65 = arith.constant 0.000000e+00 : f32
    %67 = vector.broadcast %cst_65 : f32 to vector<64x128xf32>
    %68 = arith.maximumf %66, %67 : vector<64x128xf32>
    %69 = vector.shape_cast %68 : vector<64x128xf32> to vector<1x8x8x128xf32>
    %70 = arith.truncf %69 : vector<1x8x8x128xf32> to vector<1x8x8x128xbf16>
    %c0_66 = arith.constant 0 : index
    %c0_67 = arith.constant 0 : index
    %c0_68 = arith.constant 0 : index
    %c0_69 = arith.constant 0 : index
    %71 = vector.load %arg5[%c0_66, %c0_67, %c0_68, %c0_69] : memref<1x8x8x128xbf16, #tpu.memory_space<vmem>>, vector<1x8x8x128xbf16>
    tpu.vector_store %arg5[%c0_66, %c0_67, %c0_68, %c0_69], %70 {strides = array<i32>} : memref<1x8x8x128xbf16, #tpu.memory_space<vmem>>, vector<1x8x8x128xbf16>,
    return
  }
  func.func @transform_0(%arg0: i32, %arg1: i32) -> (i32, i32, i32, i32) {
    %c0_i32 = arith.constant 0 : i32
    %c0_i32_0 = arith.constant 0 : i32
    %c0_i32_1 = arith.constant 0 : i32
    %c0_i32_2 = arith.constant 0 : i32
    return %arg1, %c0_i32, %c0_i32_0, %c0_i32_1 : i32, i32, i32, i32
  }
  func.func @transform_1(%arg0: i32, %arg1: i32) -> (i32, i32, i32) {
    %c0_i32 = arith.constant 0 : i32
    %c0_i32_0 = arith.constant 0 : i32
    %c0_i32_1 = arith.constant 0 : i32
    return %c0_i32, %c0_i32_0, %arg0 : i32, i32, i32
  }
  func.func @transform_2(%arg0: i32, %arg1: i32) -> (i32, i32) {
    %c0_i32 = arith.constant 0 : i32
    %c0_i32_0 = arith.constant 0 : i32
    return %c0_i32, %arg0 : i32, i32
  }
  func.func @transform_3(%arg0: i32, %arg1: i32) -> (i32, i32, i32, i32) {
    %c0_i32 = arith.constant 0 : i32
    %c0_i32_0 = arith.constant 0 : i32
    %c0_i32_1 = arith.constant 0 : i32
    return %arg1, %c0_i32, %c0_i32_0, %arg0 : i32, i32, i32, i32
  }
}

module attributes {stable_mosaic.version = 11 : i64} {
  func.func @_conv_bn_kernel(%arg0: i32, %arg1: i32, %arg2: memref<1x10x10x128xbf16, #tpu.memory_space<vmem>>, %arg3: memref<9x128x128xbf16, #tpu.memory_space<vmem>>, %arg4: memref<1x128xf32, #tpu.memory_space<vmem>>, %arg5: memref<1x8x8x128xbf16, #tpu.memory_space<vmem>>, %arg6: memref<1x8x8x128xf32, #tpu.memory_space<vmem>>) attributes {dimension_semantics = [#tpu.dimension_semantics<parallel>, #tpu.dimension_semantics<parallel>], iteration_bounds = array<i64: 1, 2>, scalar_prefetch = 0 : i64, scratch_operands = 0 : i64, tpu.core_type = #tpu.core_type<tc>, window_params = [{transform_indices = @transform_0, window_bounds = array<i64: 1, 10, 10, 128>}, {transform_indices = @transform_1, window_bounds = array<i64: 9, 128, 128>}, {transform_indices = @transform_2, window_bounds = array<i64: 1, 128>}, {transform_indices = @transform_3, window_bounds = array<i64: 1, 8, 8, 128>}, {transform_indices = @transform_4, window_bounds = array<i64: 1, 8, 8, 128>}]} {
    %cst = arith.constant 0.000000e+00 : f32
    %0 = vector.broadcast %cst : f32 to vector<64x128xf32>
    %c0 = arith.constant 0 : index
    %c0_0 = arith.constant 0 : index
    %c0_1 = arith.constant 0 : index
    %c0_2 = arith.constant 0 : index
    %1 = vector.load %arg2[%c0, %c0_0, %c0_1, %c0_2] : memref<1x10x10x128xbf16, #tpu.memory_space<vmem>>, vector<1x8x8x128xbf16>
    %2 = vector.shape_cast %1 : vector<1x8x8x128xbf16> to vector<8x8x128xbf16>
    %3 = vector.shape_cast %2 : vector<8x8x128xbf16> to vector<64x128xbf16>
    %c0_3 = arith.constant 0 : index
    %c0_4 = arith.constant 0 : index
    %c0_5 = arith.constant 0 : index
    %4 = vector.load %arg3[%c0_3, %c0_4, %c0_5] : memref<9x128x128xbf16, #tpu.memory_space<vmem>>, vector<1x128x128xbf16>
    %5 = vector.shape_cast %4 : vector<1x128x128xbf16> to vector<128x128xbf16>
    %cst_6 = arith.constant dense<0.000000e+00> : vector<64x128xf32>
    %6 = tpu.matmul %3, %5, %cst_6 {dimension_numbers = #tpu.dot_dimension_numbers<[1], [0], [0], [1], [0, 0, 1, 1], [], []>} : vector<64x128xbf16>, vector<128x128xbf16>, vector<64x128xf32> -> vector<64x128xf32>
    %7 = arith.addf %0, %6 : vector<64x128xf32>
    %c0_7 = arith.constant 0 : index
    %c0_8 = arith.constant 0 : index
    %c1 = arith.constant 1 : index
    %c0_9 = arith.constant 0 : index
    %8 = vector.load %arg2[%c0_7, %c0_8, %c1, %c0_9] : memref<1x10x10x128xbf16, #tpu.memory_space<vmem>>, vector<1x8x8x128xbf16>
    %9 = vector.shape_cast %8 : vector<1x8x8x128xbf16> to vector<8x8x128xbf16>
    %10 = vector.shape_cast %9 : vector<8x8x128xbf16> to vector<64x128xbf16>
    %c1_10 = arith.constant 1 : index
    %c0_11 = arith.constant 0 : index
    %c0_12 = arith.constant 0 : index
    %11 = vector.load %arg3[%c1_10, %c0_11, %c0_12] : memref<9x128x128xbf16, #tpu.memory_space<vmem>>, vector<1x128x128xbf16>
    %12 = vector.shape_cast %11 : vector<1x128x128xbf16> to vector<128x128xbf16>
    %cst_13 = arith.constant dense<0.000000e+00> : vector<64x128xf32>
    %13 = tpu.matmul %10, %12, %cst_13 {dimension_numbers = #tpu.dot_dimension_numbers<[1], [0], [0], [1], [0, 0, 1, 1], [], []>} : vector<64x128xbf16>, vector<128x128xbf16>, vector<64x128xf32> -> vector<64x128xf32>
    %14 = arith.addf %7, %13 : vector<64x128xf32>
    %c0_14 = arith.constant 0 : index
    %c0_15 = arith.constant 0 : index
    %c2 = arith.constant 2 : index
    %c0_16 = arith.constant 0 : index
    %15 = vector.load %arg2[%c0_14, %c0_15, %c2, %c0_16] : memref<1x10x10x128xbf16, #tpu.memory_space<vmem>>, vector<1x8x8x128xbf16>
    %16 = vector.shape_cast %15 : vector<1x8x8x128xbf16> to vector<8x8x128xbf16>
    %17 = vector.shape_cast %16 : vector<8x8x128xbf16> to vector<64x128xbf16>
    %c2_17 = arith.constant 2 : index
    %c0_18 = arith.constant 0 : index
    %c0_19 = arith.constant 0 : index
    %18 = vector.load %arg3[%c2_17, %c0_18, %c0_19] : memref<9x128x128xbf16, #tpu.memory_space<vmem>>, vector<1x128x128xbf16>
    %19 = vector.shape_cast %18 : vector<1x128x128xbf16> to vector<128x128xbf16>
    %cst_20 = arith.constant dense<0.000000e+00> : vector<64x128xf32>
    %20 = tpu.matmul %17, %19, %cst_20 {dimension_numbers = #tpu.dot_dimension_numbers<[1], [0], [0], [1], [0, 0, 1, 1], [], []>} : vector<64x128xbf16>, vector<128x128xbf16>, vector<64x128xf32> -> vector<64x128xf32>
    %21 = arith.addf %14, %20 : vector<64x128xf32>
    %c0_21 = arith.constant 0 : index
    %c1_22 = arith.constant 1 : index
    %c0_23 = arith.constant 0 : index
    %c0_24 = arith.constant 0 : index
    %22 = vector.load %arg2[%c0_21, %c1_22, %c0_23, %c0_24] : memref<1x10x10x128xbf16, #tpu.memory_space<vmem>>, vector<1x8x8x128xbf16>
    %23 = vector.shape_cast %22 : vector<1x8x8x128xbf16> to vector<8x8x128xbf16>
    %24 = vector.shape_cast %23 : vector<8x8x128xbf16> to vector<64x128xbf16>
    %c3 = arith.constant 3 : index
    %c0_25 = arith.constant 0 : index
    %c0_26 = arith.constant 0 : index
    %25 = vector.load %arg3[%c3, %c0_25, %c0_26] : memref<9x128x128xbf16, #tpu.memory_space<vmem>>, vector<1x128x128xbf16>
    %26 = vector.shape_cast %25 : vector<1x128x128xbf16> to vector<128x128xbf16>
    %cst_27 = arith.constant dense<0.000000e+00> : vector<64x128xf32>
    %27 = tpu.matmul %24, %26, %cst_27 {dimension_numbers = #tpu.dot_dimension_numbers<[1], [0], [0], [1], [0, 0, 1, 1], [], []>} : vector<64x128xbf16>, vector<128x128xbf16>, vector<64x128xf32> -> vector<64x128xf32>
    %28 = arith.addf %21, %27 : vector<64x128xf32>
    %c0_28 = arith.constant 0 : index
    %c1_29 = arith.constant 1 : index
    %c1_30 = arith.constant 1 : index
    %c0_31 = arith.constant 0 : index
    %29 = vector.load %arg2[%c0_28, %c1_29, %c1_30, %c0_31] : memref<1x10x10x128xbf16, #tpu.memory_space<vmem>>, vector<1x8x8x128xbf16>
    %30 = vector.shape_cast %29 : vector<1x8x8x128xbf16> to vector<8x8x128xbf16>
    %31 = vector.shape_cast %30 : vector<8x8x128xbf16> to vector<64x128xbf16>
    %c4 = arith.constant 4 : index
    %c0_32 = arith.constant 0 : index
    %c0_33 = arith.constant 0 : index
    %32 = vector.load %arg3[%c4, %c0_32, %c0_33] : memref<9x128x128xbf16, #tpu.memory_space<vmem>>, vector<1x128x128xbf16>
    %33 = vector.shape_cast %32 : vector<1x128x128xbf16> to vector<128x128xbf16>
    %cst_34 = arith.constant dense<0.000000e+00> : vector<64x128xf32>
    %34 = tpu.matmul %31, %33, %cst_34 {dimension_numbers = #tpu.dot_dimension_numbers<[1], [0], [0], [1], [0, 0, 1, 1], [], []>} : vector<64x128xbf16>, vector<128x128xbf16>, vector<64x128xf32> -> vector<64x128xf32>
    %35 = arith.addf %28, %34 : vector<64x128xf32>
    %c0_35 = arith.constant 0 : index
    %c1_36 = arith.constant 1 : index
    %c2_37 = arith.constant 2 : index
    %c0_38 = arith.constant 0 : index
    %36 = vector.load %arg2[%c0_35, %c1_36, %c2_37, %c0_38] : memref<1x10x10x128xbf16, #tpu.memory_space<vmem>>, vector<1x8x8x128xbf16>
    %37 = vector.shape_cast %36 : vector<1x8x8x128xbf16> to vector<8x8x128xbf16>
    %38 = vector.shape_cast %37 : vector<8x8x128xbf16> to vector<64x128xbf16>
    %c5 = arith.constant 5 : index
    %c0_39 = arith.constant 0 : index
    %c0_40 = arith.constant 0 : index
    %39 = vector.load %arg3[%c5, %c0_39, %c0_40] : memref<9x128x128xbf16, #tpu.memory_space<vmem>>, vector<1x128x128xbf16>
    %40 = vector.shape_cast %39 : vector<1x128x128xbf16> to vector<128x128xbf16>
    %cst_41 = arith.constant dense<0.000000e+00> : vector<64x128xf32>
    %41 = tpu.matmul %38, %40, %cst_41 {dimension_numbers = #tpu.dot_dimension_numbers<[1], [0], [0], [1], [0, 0, 1, 1], [], []>} : vector<64x128xbf16>, vector<128x128xbf16>, vector<64x128xf32> -> vector<64x128xf32>
    %42 = arith.addf %35, %41 : vector<64x128xf32>
    %c0_42 = arith.constant 0 : index
    %c2_43 = arith.constant 2 : index
    %c0_44 = arith.constant 0 : index
    %c0_45 = arith.constant 0 : index
    %43 = vector.load %arg2[%c0_42, %c2_43, %c0_44, %c0_45] : memref<1x10x10x128xbf16, #tpu.memory_space<vmem>>, vector<1x8x8x128xbf16>
    %44 = vector.shape_cast %43 : vector<1x8x8x128xbf16> to vector<8x8x128xbf16>
    %45 = vector.shape_cast %44 : vector<8x8x128xbf16> to vector<64x128xbf16>
    %c6 = arith.constant 6 : index
    %c0_46 = arith.constant 0 : index
    %c0_47 = arith.constant 0 : index
    %46 = vector.load %arg3[%c6, %c0_46, %c0_47] : memref<9x128x128xbf16, #tpu.memory_space<vmem>>, vector<1x128x128xbf16>
    %47 = vector.shape_cast %46 : vector<1x128x128xbf16> to vector<128x128xbf16>
    %cst_48 = arith.constant dense<0.000000e+00> : vector<64x128xf32>
    %48 = tpu.matmul %45, %47, %cst_48 {dimension_numbers = #tpu.dot_dimension_numbers<[1], [0], [0], [1], [0, 0, 1, 1], [], []>} : vector<64x128xbf16>, vector<128x128xbf16>, vector<64x128xf32> -> vector<64x128xf32>
    %49 = arith.addf %42, %48 : vector<64x128xf32>
    %c0_49 = arith.constant 0 : index
    %c2_50 = arith.constant 2 : index
    %c1_51 = arith.constant 1 : index
    %c0_52 = arith.constant 0 : index
    %50 = vector.load %arg2[%c0_49, %c2_50, %c1_51, %c0_52] : memref<1x10x10x128xbf16, #tpu.memory_space<vmem>>, vector<1x8x8x128xbf16>
    %51 = vector.shape_cast %50 : vector<1x8x8x128xbf16> to vector<8x8x128xbf16>
    %52 = vector.shape_cast %51 : vector<8x8x128xbf16> to vector<64x128xbf16>
    %c7 = arith.constant 7 : index
    %c0_53 = arith.constant 0 : index
    %c0_54 = arith.constant 0 : index
    %53 = vector.load %arg3[%c7, %c0_53, %c0_54] : memref<9x128x128xbf16, #tpu.memory_space<vmem>>, vector<1x128x128xbf16>
    %54 = vector.shape_cast %53 : vector<1x128x128xbf16> to vector<128x128xbf16>
    %cst_55 = arith.constant dense<0.000000e+00> : vector<64x128xf32>
    %55 = tpu.matmul %52, %54, %cst_55 {dimension_numbers = #tpu.dot_dimension_numbers<[1], [0], [0], [1], [0, 0, 1, 1], [], []>} : vector<64x128xbf16>, vector<128x128xbf16>, vector<64x128xf32> -> vector<64x128xf32>
    %56 = arith.addf %49, %55 : vector<64x128xf32>
    %c0_56 = arith.constant 0 : index
    %c2_57 = arith.constant 2 : index
    %c2_58 = arith.constant 2 : index
    %c0_59 = arith.constant 0 : index
    %57 = vector.load %arg2[%c0_56, %c2_57, %c2_58, %c0_59] : memref<1x10x10x128xbf16, #tpu.memory_space<vmem>>, vector<1x8x8x128xbf16>
    %58 = vector.shape_cast %57 : vector<1x8x8x128xbf16> to vector<8x8x128xbf16>
    %59 = vector.shape_cast %58 : vector<8x8x128xbf16> to vector<64x128xbf16>
    %c8 = arith.constant 8 : index
    %c0_60 = arith.constant 0 : index
    %c0_61 = arith.constant 0 : index
    %60 = vector.load %arg3[%c8, %c0_60, %c0_61] : memref<9x128x128xbf16, #tpu.memory_space<vmem>>, vector<1x128x128xbf16>
    %61 = vector.shape_cast %60 : vector<1x128x128xbf16> to vector<128x128xbf16>
    %cst_62 = arith.constant dense<0.000000e+00> : vector<64x128xf32>
    %62 = tpu.matmul %59, %61, %cst_62 {dimension_numbers = #tpu.dot_dimension_numbers<[1], [0], [0], [1], [0, 0, 1, 1], [], []>} : vector<64x128xbf16>, vector<128x128xbf16>, vector<64x128xf32> -> vector<64x128xf32>
    %63 = arith.addf %56, %62 : vector<64x128xf32>
    %c0_63 = arith.constant 0 : index
    %c0_64 = arith.constant 0 : index
    %64 = vector.load %arg4[%c0_63, %c0_64] : memref<1x128xf32, #tpu.memory_space<vmem>>, vector<1x128xf32>
    %65 = vector.broadcast %64 : vector<1x128xf32> to vector<64x128xf32>
    %66 = arith.addf %63, %65 : vector<64x128xf32>
    %c0_65 = arith.constant 0 : index
    %c0_66 = arith.constant 0 : index
    %c0_67 = arith.constant 0 : index
    %c0_68 = arith.constant 0 : index
    %67 = vector.load %arg5[%c0_65, %c0_66, %c0_67, %c0_68] : memref<1x8x8x128xbf16, #tpu.memory_space<vmem>>, vector<1x8x8x128xbf16>
    %68 = vector.shape_cast %67 : vector<1x8x8x128xbf16> to vector<64x128xbf16>
    %69 = arith.extf %68 : vector<64x128xbf16> to vector<64x128xf32>
    %70 = arith.addf %66, %69 : vector<64x128xf32>
    %cst_69 = arith.constant 0.000000e+00 : f32
    %71 = vector.broadcast %cst_69 : f32 to vector<64x128xf32>
    %72 = arith.maximumf %70, %71 : vector<64x128xf32>
    %73 = vector.shape_cast %72 : vector<64x128xf32> to vector<1x8x8x128xf32>
    %c0_70 = arith.constant 0 : index
    %c0_71 = arith.constant 0 : index
    %c0_72 = arith.constant 0 : index
    %c0_73 = arith.constant 0 : index
    %74 = vector.load %arg6[%c0_70, %c0_71, %c0_72, %c0_73] : memref<1x8x8x128xf32, #tpu.memory_space<vmem>>, vector<1x8x8x128xf32>
    tpu.vector_store %arg6[%c0_70, %c0_71, %c0_72, %c0_73], %73 {strides = array<i32>} : memref<1x8x8x128xf32, #tpu.memory_space<vmem>>, vector<1x8x8x128xf32>,
    return
  }
  func.func @transform_0(%arg0: i32, %arg1: i32) -> (i32, i32, i32, i32) {
    %c0_i32 = arith.constant 0 : i32
    %c0_i32_0 = arith.constant 0 : i32
    %c0_i32_1 = arith.constant 0 : i32
    %c0_i32_2 = arith.constant 0 : i32
    return %arg1, %c0_i32, %c0_i32_0, %c0_i32_1 : i32, i32, i32, i32
  }
  func.func @transform_1(%arg0: i32, %arg1: i32) -> (i32, i32, i32) {
    %c0_i32 = arith.constant 0 : i32
    %c0_i32_0 = arith.constant 0 : i32
    %c0_i32_1 = arith.constant 0 : i32
    return %c0_i32, %c0_i32_0, %arg0 : i32, i32, i32
  }
  func.func @transform_2(%arg0: i32, %arg1: i32) -> (i32, i32) {
    %c0_i32 = arith.constant 0 : i32
    %c0_i32_0 = arith.constant 0 : i32
    return %c0_i32, %arg0 : i32, i32
  }
  func.func @transform_3(%arg0: i32, %arg1: i32) -> (i32, i32, i32, i32) {
    %c0_i32 = arith.constant 0 : i32
    %c0_i32_0 = arith.constant 0 : i32
    %c0_i32_1 = arith.constant 0 : i32
    return %arg1, %c0_i32, %c0_i32_0, %arg0 : i32, i32, i32, i32
  }
  func.func @transform_4(%arg0: i32, %arg1: i32) -> (i32, i32, i32, i32) {
    %c0_i32 = arith.constant 0 : i32
    %c0_i32_0 = arith.constant 0 : i32
    %c0_i32_1 = arith.constant 0 : i32
    return %arg1, %c0_i32, %c0_i32_0, %arg0 : i32, i32, i32, i32
  }
}

</mosaic_0001>

<bundles_post_ra>
// kernel: basic_block_forward.4
= control target key start
LH: loop header
LB: loop body
LE: loop exit
PB: predicated region body
PF: predicated region fallthrough
CT: control target
= control target key end

     0   :  { %s663_s12 = smov 0   ;;  %s665_s13 = smov 0   ;;  %s734_s0 = inlined_call_operand.vmem [shape: bf16[2,8,8,128], index: 0, kind: input, shape index: {}]   ;;  %s735_s1 = inlined_call_operand.vmem [shape: bf16[1,128,128], index: 1, kind: input, shape index: {}]   ;;  %s736_s2 = inlined_call_operand.vmem [shape: f32[1,128], index: 2, kind: input, shape index: {}]   ;;  %s737_s3 = inlined_call_operand.vmem [shape: bf16[2,8,8,128], index: 3, kind: output, shape index: {}]  }
   0x1   :  { %s667_s14 = smov 0  }
   0x2 LB: > { %s22_s15 = sadd.s32 1, %s637_s13  ;;  %p478_p0 = scmp.ge.s32.totalorder %s641_s14, 1  ;;  %s641_s14 = sphi %s667_s14, %s13_s14   ;;  %s637_s13 = sphi %s665_s13, %s739_s13   ;;  %s633_s12 = sphi %s663_s12, %s738_s12  }
   0x3   : > { %p23_p1 = scmp.ge.s32.totalorder %s22_s15, 2  ;;  %p168_p2 = scmp.lt.s32.totalorder %s641_s14, 3 }
   0x5   : > { %s741_s15 = smov (%p23_p1, %s22_s15), 0  ;;  %p169_p3 = pnand %p478_p0, %p168_p2 }
   0x6   : > { %p202_p4 = scmp.lt.s32.totalorder (!%p169_p3), %s633_s12, 1 }
   0x7   : > { %172 = sbr.rel (%p169_p3) target bundleno = 191 (0xbf), region = 32 }
   0xc   : > { %v546_v0 = vld [vmem:[%s735_s1 + $0x38] sm:$0xff]  ;;  %v545_v1 = vld [vmem:[%s735_s1 + $0x30] sm:$0xff]  ;;  %v544_v2 = vld [vmem:[%s735_s1 + $0x28] sm:$0xff]  ;;  %s743_s12 = smov (!%p202_p4, %s633_s12), 1 }
   0xd   : > { %322 = vmatpush.bf16.msra.mxu0 %v546_v0  ;;  %570 = vmatpush.bf16.msra.mxu1 %v546_v0  ;;  %v543_v3 = vld [vmem:[%s735_s1 + $0x20] sm:$0xff]  ;;  %v542_v4 = vld [vmem:[%s735_s1 + $0x18] sm:$0xff]  ;;  %v541_v5 = vld [vmem:[%s735_s1 + $0x10] sm:$0xff]  ;;  %s533_s30 = sshll.u32 %s743_s12, 5 }
   0xe   : > { %571 = vmatpush.bf16.msra.mxu2 %v546_v0  ;;  %572 = vmatpush.bf16.msra.mxu3 %v546_v0  ;;  %v540_v6 = vld [vmem:[%s735_s1 + $0x8] sm:$0xff]  ;;  %v539_v7 = vld [vmem:[%s735_s1] sm:$0xff]  ;;  %s206_s8 = scalar_lea.vmem %s734_s0, %s533_s30  ;;  %s221_s17 = scalar_lea.vmem %s737_s3, %s533_s30 }
   0xf   : > { %v535_v8 = vld [vmem:[%s206_s8] sm:$0xff]  ;;  %v536_v9 = vld [vmem:[%s206_s8 + $0x8] sm:$0xff]  ;;  %v537_v10 = vld [vmem:[%s206_s8 + $0x10] sm:$0xff] }
  0x10   : > { %v538_v11 = vld [vmem:[%s206_s8 + $0x18] sm:$0xff]  ;;  %v618_v14 = vld [vmem:[%s736_s2] ss:$0 sm:$0xff] }
  0x11   : > { %323 = vmatpush.bf16.msra.mxu0 %v545_v1  ;;  %573 = vmatpush.bf16.msra.mxu1 %v545_v1 }
  0x12   : > { %574 = vmatpush.bf16.msra.mxu2 %v545_v1  ;;  %575 = vmatpush.bf16.msra.mxu3 %v545_v1 }
  0x15   : > { %324 = vmatpush.bf16.msra.mxu0 %v544_v2  ;;  %576 = vmatpush.bf16.msra.mxu1 %v544_v2 }
  0x16   : > { %577 = vmatpush.bf16.msra.mxu2 %v544_v2  ;;  %578 = vmatpush.bf16.msra.mxu3 %v544_v2 }
  0x19   : > { %325 = vmatpush.bf16.msra.mxu0 %v543_v3  ;;  %579 = vmatpush.bf16.msra.mxu1 %v543_v3 }
  0x1a   : > { %580 = vmatpush.bf16.msra.mxu2 %v543_v3  ;;  %581 = vmatpush.bf16.msra.mxu3 %v543_v3 }
  0x1d   : > { %326 = vmatpush.bf16.msra.mxu0 %v542_v4  ;;  %582 = vmatpush.bf16.msra.mxu1 %v542_v4 }
  0x1e   : > { %583 = vmatpush.bf16.msra.mxu2 %v542_v4  ;;  %584 = vmatpush.bf16.msra.mxu3 %v542_v4 }
  0x21   : > { %327 = vmatpush.bf16.msra.mxu0 %v541_v5  ;;  %585 = vmatpush.bf16.msra.mxu1 %v541_v5 }
  0x22   : > { %586 = vmatpush.bf16.msra.mxu2 %v541_v5  ;;  %587 = vmatpush.bf16.msra.mxu3 %v541_v5 }
  0x25   : > { %328 = vmatpush.bf16.msra.mxu0 %v540_v6  ;;  %588 = vmatpush.bf16.msra.mxu1 %v540_v6 }
  0x26   : > { %589 = vmatpush.bf16.msra.mxu2 %v540_v6  ;;  %590 = vmatpush.bf16.msra.mxu3 %v540_v6 }
  0x29   : > { %329 = vmatpush.bf16.msra.mxu0 %v539_v7  ;;  %591 = vmatpush.bf16.msra.mxu1 %v539_v7 }
  0x2a   : > { %592 = vmatpush.bf16.msra.mxu2 %v539_v7  ;;  %593 = vmatpush.bf16.msra.mxu3 %v539_v7 }
  0x2c   : > { %330 = vmatmul.bf16.vlgmr.msra.gmra.mxu0 %v535_v8  ;;  %335 = vmatmul.bf16.vlgmr.msra.gmra.mxu1 %v536_v9 }
  0x2d   : > { %340 = vmatmul.bf16.vlgmr.msra.gmra.mxu2 %v537_v10  ;;  %345 = vmatmul.bf16.vlgmr.msra.gmra.mxu3 %v538_v11 }
  0xa9   : > { %v331_v12 = vpop.f32.mrf.mxu0  ;;  %v336_v13 = vpop.f32.mrf.mxu1 }
  0xaa   : > { %v332_v19 = vadd.f32 %v618_v14, %v331_v12  ;;  %v337_v20 = vadd.f32 %v618_v14, %v336_v13 }
  0xb0   : > { %v341_v15 = vpop.f32.mrf.mxu2  ;;  %v346_v16 = vpop.f32.mrf.mxu3 }
  0xb1   : > { %v333_v17 = vpop.f32.mrf.mxu0  ;;  %v338_v18 = vpop.f32.mrf.mxu1  ;;  %v342_v27 = vadd.f32 %v618_v14, %v341_v15  ;;  %v347_v28 = vadd.f32 %v618_v14, %v346_v16 }
  0xb2   : > { %v334_v21 = vadd.f32 %v618_v14, %v333_v17  ;;  %v339_v22 = vadd.f32 %v618_v14, %v338_v18 }
  0xb4   : > { %v550_v23 = vpack.c.bf16 %v334_v21, %v332_v19  ;;  %v555_v24 = vpack.c.bf16 %v339_v22, %v337_v20 }
  0xb6   : > { %551 = vst [vmem:[%s221_s17] sm:$0xff] %v550_v23  }
  0xb7   : > { %567 = vst [vmem:[%s221_s17 + $0x8] sm:$0xff] %v555_v24  }
  0xb8   : > { %v343_v25 = vpop.f32.mrf.mxu2  ;;  %v348_v26 = vpop.f32.mrf.mxu3 }
  0xb9   : > { %v344_v29 = vadd.f32 %v618_v14, %v343_v25  ;;  %v349_v30 = vadd.f32 %v618_v14, %v348_v26 }
  0xbb   : > { %v560_v31 = vpack.c.bf16 %v344_v29, %v342_v27  ;;  %v565_v32 = vpack.c.bf16 %v349_v30, %v347_v28 }
  0xbd   : > { %568 = vst [vmem:[%s221_s17 + $0x10] sm:$0xff] %v560_v31  }
  0xbe   : > { %569 = vst [vmem:[%s221_s17 + $0x18] sm:$0xff] %v565_v32  }
  0xbf PF: > { %s13_s14 = sadd.s32 1, %s641_s14   ;;  %s738_s12 = smov %s637_s13 }
  0xc0   : > { %p10_p5 = scmp.ge.s32.totalorder %s13_s14, 4   ;;  %s739_s13 = smov %s741_s15 }
  0xc2   :  { %12 = sbr.rel (!%p10_p5) target bundleno = 2 (0x2), region = 68 }

// kernel: basic_block_forward.3
= control target key start
LH: loop header
LB: loop body
LE: loop exit
PB: predicated region body
PF: predicated region fallthrough
CT: control target
= control target key end

     0   :  { %s2704_s12 = smov 0   ;;  %s2706_s13 = smov 0   ;;  %s3160_s0 = inlined_call_operand.vmem [shape: bf16[8,9,9,128], index: 0, kind: input, shape index: {}]   ;;  %s3161_s1 = inlined_call_operand.vmem [shape: bf16[9,128,128], index: 1, kind: input, shape index: {}]   ;;  %s3162_s2 = inlined_call_operand.vmem [shape: f32[1,128], index: 2, kind: input, shape index: {}]   ;;  %s3163_s3 = inlined_call_operand.vmem [shape: bf16[2,8,8,128], index: 3, kind: output, shape index: {}]  }
   0x1   :  { %s2708_s14 = smov 0  }
   0x2 LB: > { %s22_s15 = sadd.s32 1, %s2678_s13  ;;  %p1907_p0 = scmp.ge.s32.totalorder %s2682_s14, 1  ;;  %s2682_s14 = sphi %s2708_s14, %s13_s14   ;;  %s2678_s13 = sphi %s2706_s13, %s3167_s13   ;;  %s2674_s12 = sphi %s2704_s12, %s3166_s12  }
   0x3   : > { %p23_p1 = scmp.ge.s32.totalorder %s22_s15, 2  ;;  %p170_p2 = scmp.lt.s32.totalorder %s2682_s14, 3 }
   0x5   : > { %s3169_s15 = smov (%p23_p1, %s22_s15), 0  ;;  %p171_p3 = pnand %p1907_p0, %p170_p2 }
   0x6   : > { %s1908_s18 = sshll.u32 (!%p171_p3), %s2674_s12, 2  ;;  %p219_p5 = scmp.lt.s32.totalorder (!%p171_p3), %s2674_s12, 1 }
   0x7   : > { %174 = sbr.rel (%p171_p3) target bundleno = 337 (0x151), region = 32  ;;  %p206_p4 = scmp.lt.s32.totalorder (!%p171_p3), %s1908_s18, 7 }
   0xc   : > { %v2522_v0 = vld [vmem:[%s3161_s1 + $0x78] sm:$0xff]  ;;  %v2521_v2 = vld [vmem:[%s3161_s1 + $0x70] sm:$0xff]  ;;  %s3171_s18 = smov (!%p206_p4, %s1908_s18), 7  ;;  %v2520_v6 = vld [vmem:[%s3161_s1 + $0x68] sm:$0xff]  ;;  %vm495_vm0 = vsmask.f32 3328 }
   0xd   : > { %v2530_v1 = vld [vmem:[%s3161_s1 + $0xb8] sm:$0xff]  ;;  %2618 = vmatpush.bf16.msra.mxu1 %v2522_v0  ;;  %349 = vmatpush.bf16.msra.mxu0 %v2522_v0  ;;  %v2529_v3 = vld [vmem:[%s3161_s1 + $0xb0] sm:$0xff]  ;;  %s2634_s29 = smul.u32 72, %s3171_s18  ;;  %v2528_v7 = vld [vmem:[%s3161_s1 + $0xa8] sm:$0xff]  ;;  %vm496_vm1 = vsmask.f32 7440 }
   0xe   : > { %691 = vmatpush.bf16.msra.mxu2 %v2530_v1  ;;  %v2542_v4 = vld [vmem:[%s3161_s1 + $0xf8] sm:$0xff]  ;;  %v2541_v5 = vld [vmem:[%s3161_s1 + $0xf0] sm:$0xff]  ;;  %v2540_v8 = vld [vmem:[%s3161_s1 + $0xe8] sm:$0xff]  ;;  %s3173_s12 = smov (!%p219_p5, %s2674_s12), 1 }
   0xf   : > { %826 = vmatpush.bf16.msra.mxu3 %v2542_v4  ;;  %s2752_s9 = scalar_lea.vmem %s3160_s0, %s2634_s29  ;;  %v2519_v10 = vld [vmem:[%s3161_s1 + $0x60] sm:$0xff]  ;;  %v2518_v23 = vld [vmem:[%s3161_s1 + $0x58] sm:$0xff]  ;;  %v2517_v31 = vld [vmem:[%s3161_s1 + $0x50] sm:$0xff]  ;;  %s2498_s6 = sshll.u32 %s3173_s12, 5 }
  0x10   : > { %v479_v9 = vld [vmem:[%s2752_s9] sm:$0xf]  ;;  %v481_v11 = vld [vmem:[%s2752_s9 + $0x8] sm:$0xf]  ;;  %v480_v16 = vld [vmem:[%s2752_s9 + $0x4] sm:$0x1]  ;;  %s3130_s10 = scalar_lea.vmem %s3163_s3, %s2498_s6 }
  0x11   : > { %2619 = vmatpush.bf16.msra.mxu1 %v2521_v2  ;;  %350 = vmatpush.bf16.msra.mxu0 %v2521_v2  ;;  %v2527_v12 = vld [vmem:[%s3161_s1 + $0xa0] sm:$0xff]  ;;  %v499_v13 = vshrl.u32 %v479_v9, 16  ;;  %v502_v14 = vshll.u32 %v479_v9, 16  ;;  %v513_v15 = vshrl.u32 %v481_v11, 16  ;;  %v482_v17 = vld [vmem:[%s2752_s9 + $0xc] sm:$0x1]  ;;  %vm2786_vm2 = vmor %vm495_vm0, %vm496_vm1 }
  0x12   : > { %692 = vmatpush.bf16.msra.mxu2 %v2529_v3  ;;  %v516_v18 = vshll.u32 %v481_v11, 16  ;;  %v2539_v19 = vld [vmem:[%s3161_s1 + $0xe0] sm:$0xff]  ;;  %v2526_v25 = vld [vmem:[%s3161_s1 + $0x98] sm:$0xff]  ;;  %v508_v27 = vshll.u32 %v480_v16, 16  ;;  %v522_v28 = vshll.u32 %v482_v17, 16  ;;  %v2525_v32 = vld [vmem:[%s3161_s1 + $0x90] sm:$0xff] }
  0x13   : > { %827 = vmatpush.bf16.msra.mxu3 %v2541_v5  ;;  %v501_v20 = vrot.slane %v499_v13, 4  ;;  %v504_v21 = vrot.slane %v502_v14, 5  ;;  %v515_v22 = vrot.slane %v513_v15, 4  ;;  %v2538_v30 = vld [vmem:[%s3161_s1 + $0xd8] sm:$0xff]  ;;  %v483_v37 = vld [vmem:[%s2752_s9 + $0x10] sm:$0xf] }
  0x14   : > { %v518_v24 = vrot.slane %v516_v18, 5  ;;  %v510_v34 = vrot.slane %v508_v27, 5  ;;  %v524_v36 = vrot.slane %v522_v28, 5  ;;  %v485_v39 = vld [vmem:[%s2752_s9 + $0x18] sm:$0xf]  ;;  %v2537_v40 = vld [vmem:[%s3161_s1 + $0xd0] sm:$0xff] }
  0x15   : > { %2620 = vmatpush.bf16.msra.mxu1 %v2520_v6  ;;  %351 = vmatpush.bf16.msra.mxu0 %v2520_v6  ;;  %v505_v26 = vor.u32 %v504_v21, %v501_v20  ;;  %v2516_v41 = vld [vmem:[%s3161_s1 + $0x48] sm:$0xff]  ;;  %v527_v42 = vshrl.u32 %v483_v37, 16  ;;  %v530_v43 = vshll.u32 %v483_v37, 16  ;;  %v541_v47 = vshrl.u32 %v485_v39, 16  ;;  %v2515_v49 = vld [vmem:[%s3161_s1 + $0x40] sm:$0xff]  ;;  %v2510_v51 = vld [vmem:[%s3161_s1 + $0x38] sm:$0xff] }
  0x16   : > { %693 = vmatpush.bf16.msra.mxu2 %v2528_v7  ;;  %v519_v29 = vor.u32 %v518_v24, %v515_v22  ;;  %v2524_v44 = vld [vmem:[%s3161_s1 + $0x88] sm:$0xff]  ;;  %v544_v48 = vshll.u32 %v485_v39, 16  ;;  %v2523_v52 = vld [vmem:[%s3161_s1 + $0x80] sm:$0xff]  ;;  %v2513_v54 = vld [vmem:[%s2752_s9 + $0x6c] sm:$0xf0] }
  0x17   : > { %828 = vmatpush.bf16.msra.mxu3 %v2540_v8  ;;  %v506_v33 = vrot.slane %v505_v26, 4  ;;  %v1946_v50 = vld [vmem:[%s2752_s9 + $0x68] sm:$0xf]  ;;  %v2511_v56 = vld [vmem:[%s2752_s9 + $0x4c] sm:$0xf0]  ;;  %v529_v60 = vrot.slane %v527_v42, 4 }
  0x18   : > { %v520_v35 = vrot.slane %v519_v29, 4  ;;  %v2536_v53 = vld [vmem:[%s3161_s1 + $0xc8] sm:$0xff]  ;;  %v484_v59 = vld [vmem:[%s2752_s9 + $0x14] sm:$0x1]  ;;  %v532_v61 = vrot.slane %v530_v43, 5  ;;  %v543_v62 = vrot.slane %v541_v47, 4  ;;  %v1947_v3 = vor.u32 %v2513_v54, %v1946_v50 }
  0x19   : > { %2621 = vmatpush.bf16.msra.mxu1 %v2519_v10  ;;  %352 = vmatpush.bf16.msra.mxu0 %v2519_v10  ;;  %v511_v45 = vsel %vm2786_vm2, %v506_v33, %v510_v34  ;;  %v1938_v55 = vld [vmem:[%s2752_s9 + $0x48] sm:$0xf]  ;;  %v546_v63 = vrot.slane %v544_v48, 5  ;;  %v2554_v0 = vld [vmem:[%s3161_s1 + $0x138] sm:$0xff]  ;;  %v2535_v6 = vld [vmem:[%s3161_s1 + $0xc0] sm:$0xff]  ;;  %v536_v9 = vshll.u32 %v484_v59, 16 }
  0x1a   : > { %694 = vmatpush.bf16.msra.mxu2 %v2527_v12  ;;  %v525_v46 = vsel %vm2786_vm2, %v520_v35, %v524_v36  ;;  %v627_v57 = vunpack.c.l.b16 %v511_v45  ;;  %v2574_v1 = vld [vmem:[%s3161_s1 + $0x1b8] sm:$0xff]  ;;  %v1939_v4 = vor.u32 %v2511_v56, %v1938_v55  ;;  %v2106_v7 = vld [vmem:[%s2752_s9 + $0x90] sm:$0xf]  ;;  %v533_v11 = vor.u32 %v532_v61, %v529_v60  ;;  %v2508_v18 = vld [vmem:[%s3161_s1 + $0x28] sm:$0xff] }
  0x1b   : > { %829 = vmatpush.bf16.msra.mxu3 %v2539_v19  ;;  %v628_v58 = vunpack.c.l.b16 %v525_v46  ;;  %v486_v2 = vld [vmem:[%s2752_s9 + $0x1c] sm:$0x1]  ;;  %v2531_v8 = vld [vmem:[%s2752_s9 + $0x94] sm:$0xf0]  ;;  %v2509_v10 = vld [vmem:[%s3161_s1 + $0x30] sm:$0xff]  ;;  %v547_v12 = vor.u32 %v546_v63, %v543_v62  ;;  %v538_v19 = vrot.slane %v536_v9, 5 }
  0x1c   : > { %v550_v13 = vshll.u32 %v486_v2, 16  ;;  %v2586_v14 = vld [vmem:[%s3161_s1 + $0x1f8] sm:$0xff]  ;;  %v2553_v15 = vld [vmem:[%s3161_s1 + $0x130] sm:$0xff]  ;;  %v2107_v17 = vor.u32 %v2531_v8, %v2106_v7  ;;  %v534_v20 = vrot.slane %v533_v11, 4  ;;  %v487_v24 = vld [vmem:[%s2752_s9 + $0x20] sm:$0xf] }
  0x1d   : > { %2622 = vmatpush.bf16.msra.mxu1 %v2518_v23  ;;  %353 = vmatpush.bf16.msra.mxu0 %v2518_v23  ;;  %v635_v5 = vpack.c.b16 %v628_v58, %v627_v57  ;;  %v2573_v16 = vld [vmem:[%s3161_s1 + $0x1b0] sm:$0xff]  ;;  %v548_v21 = vrot.slane %v547_v12, 4  ;;  %v2572_v26 = vld [vmem:[%s3161_s1 + $0x1a8] sm:$0xff]  ;;  %v555_v28 = vshrl.u32 %v487_v24, 16  ;;  %v558_v29 = vshll.u32 %v487_v24, 16  ;;  %v2551_v36 = vld [vmem:[%s3161_s1 + $0x120] sm:$0xff] }
  0x1e   : > { %695 = vmatpush.bf16.msra.mxu2 %v2526_v25  ;;  %v552_v22 = vrot.slane %v550_v13, 5  ;;  %v2585_v23 = vld [vmem:[%s3161_s1 + $0x1f0] sm:$0xff]  ;;  %v2552_v25 = vld [vmem:[%s3161_s1 + $0x128] sm:$0xff]  ;;  %v2571_v37 = vld [vmem:[%s3161_s1 + $0x1a0] sm:$0xff] }
  0x1f   : > { %830 = vmatpush.bf16.msra.mxu3 %v2538_v30  ;;  %v489_v27 = vld [vmem:[%s2752_s9 + $0x28] sm:$0xf]  ;;  %v2507_v30 = vld [vmem:[%s3161_s1 + $0x20] sm:$0xff]  ;;  %v1950_v39 = vld [vmem:[%s2752_s9 + $0x78] sm:$0xf]  ;;  %v557_v45 = vrot.slane %v555_v28, 4 }
  0x20   : > { %v569_v33 = vshrl.u32 %v489_v27, 16  ;;  %v572_v34 = vshll.u32 %v489_v27, 16  ;;  %v2584_v35 = vld [vmem:[%s3161_s1 + $0x1e8] sm:$0xff]  ;;  %v2512_v42 = vld [vmem:[%s2752_s9 + $0x5c] sm:$0xf0]  ;;  %v560_v46 = vrot.slane %v558_v29, 5 }
  0x21   : > { %2623 = vmatpush.bf16.msra.mxu1 %v2517_v31  ;;  %354 = vmatpush.bf16.msra.mxu0 %v2517_v31  ;;  %v539_v31 = vsel %vm2786_vm2, %v534_v20, %v538_v19  ;;  %v2506_v47 = vld [vmem:[%s3161_s1 + $0x18] sm:$0xff]  ;;  %v2110_v56 = vld [vmem:[%s2752_s9 + $0xa0] sm:$0xf]  ;;  %v2532_v57 = vld [vmem:[%s2752_s9 + $0xa4] sm:$0xf0] }
  0x22   : > { %696 = vmatpush.bf16.msra.mxu2 %v2525_v32  ;;  %v553_v32 = vsel %vm2786_vm2, %v548_v21, %v552_v22  ;;  %v629_v43 = vunpack.c.l.b16 %v539_v31  ;;  %v571_v48 = vrot.slane %v569_v33, 4  ;;  %v2550_v50 = vld [vmem:[%s3161_s1 + $0x118] sm:$0xff]  ;;  %v561_v58 = vor.u32 %v560_v46, %v557_v45  ;;  %v2505_v59 = vld [vmem:[%s3161_s1 + $0x10] sm:$0xff]  ;;  %v2504_v2 = vld [vmem:[%s3161_s1 + $0x8] sm:$0xff] }
  0x23   : > { %831 = vmatpush.bf16.msra.mxu3 %v2537_v40  ;;  %v2514_v40 = vld [vmem:[%s2752_s9 + $0x7c] sm:$0xf0]  ;;  %v2549_v63 = vld [vmem:[%s3161_s1 + $0x110] sm:$0xff]  ;;  %v2548_v9 = vld [vmem:[%s3161_s1 + $0x108] sm:$0xff] }
  0x24   : > { %v2583_v7 = vld [vmem:[%s3161_s1 + $0x1e0] sm:$0xff]  ;;  %v491_v8 = vld [vmem:[%s2752_s9 + $0x30] sm:$0xf]  ;;  %v2562_v20 = vld [vmem:[%s3161_s1 + $0x178] sm:$0xff] }
  0x25   : > { %2624 = vmatpush.bf16.msra.mxu1 %v2516_v41  ;;  %355 = vmatpush.bf16.msra.mxu0 %v2516_v41  ;;  %v1942_v41 = vld [vmem:[%s2752_s9 + $0x58] sm:$0xf]  ;;  %v2569_v11 = vld [vmem:[%s3161_s1 + $0x190] sm:$0xff]  ;;  %v583_v12 = vshrl.u32 %v491_v8, 16  ;;  %v586_v13 = vshll.u32 %v491_v8, 16  ;;  %v2547_v21 = vld [vmem:[%s3161_s1 + $0x100] sm:$0xff] }
  0x26   : > { %697 = vmatpush.bf16.msra.mxu2 %v2524_v44  ;;  %v630_v44 = vunpack.c.l.b16 %v553_v32  ;;  %v1943_v54 = vor.u32 %v2512_v42, %v1942_v41  ;;  %v1986_v22 = vld [vmem:[%s2752_s9] sm:$0xf]  ;;  %v2594_v24 = vld [vmem:[%s3161_s1 + $0x238] sm:$0xff]  ;;  %v2561_v33 = vld [vmem:[%s3161_s1 + $0x170] sm:$0xff] }
  0x27   : > { %832 = vmatpush.bf16.msra.mxu3 %v2536_v53  ;;  %v1951_v53 = vor.u32 %v2514_v40, %v1950_v39  ;;  %v585_v29 = vrot.slane %v583_v12, 4  ;;  %v2114_v40 = vld [vmem:[%s2752_s9 + $0xb0] sm:$0xf]  ;;  %v2533_v41 = vld [vmem:[%s2752_s9 + $0xb4] sm:$0xf0]  ;;  %v2556_v12 = vld [vmem:[%s3161_s1 + $0x148] sm:$0xff] }
  0x28   : > { %v636_v55 = vpack.c.b16 %v630_v44, %v629_v43  ;;  %v2593_v43 = vld [vmem:[%s3161_s1 + $0x230] sm:$0xff] }
  0x29   : > { %2625 = vmatpush.bf16.msra.mxu1 %v2515_v49  ;;  %356 = vmatpush.bf16.msra.mxu0 %v2515_v49  ;;  %v574_v49 = vrot.slane %v572_v34, 5  ;;  %v492_v34 = vld [vmem:[%s2752_s9 + $0x34] sm:$0x1] }
  0x2a   : > { %698 = vmatpush.bf16.msra.mxu2 %v2523_v52  ;;  %v490_v52 = vld [vmem:[%s2752_s9 + $0x2c] sm:$0x1]  ;;  %v592_v44 = vshll.u32 %v492_v34, 16  ;;  %v2434_v34 = vld [vmem:[%s2752_s9 + $0x10] sm:$0xf] }
  0x2b   : > { %833 = vmatpush.bf16.msra.mxu3 %v2535_v6  ;;  %v575_v61 = vor.u32 %v574_v49, %v571_v48  ;;  %v578_v62 = vshll.u32 %v490_v52, 16  ;;  %v2568_v48 = vld [vmem:[%s3161_s1 + $0x188] sm:$0xff]  ;;  %v2115_v49 = vor.u32 %v2533_v41, %v2114_v40 }
  0x2c   : > { %367 = vmatmul.bf16.vlgmr.msra.gmra.mxu1 %v1947_v3  ;;  %357 = vmatmul.bf16.vlgmr.msra.gmra.mxu0 %v1939_v4  ;;  %v562_v3 = vrot.slane %v561_v58, 4  ;;  %v2580_v58 = vld [vmem:[%s3161_s1 + $0x1c8] sm:$0xff] }
  0x2d   : > { %450 = vmatpush.bf16.msrb.mxu1 %v2510_v51  ;;  %961 = vmatpush.bf16.msrb.mxu0 %v2554_v0  ;;  %v488_v51 = vld [vmem:[%s2752_s9 + $0x24] sm:$0x1]  ;;  %v2111_v0 = vor.u32 %v2532_v57, %v2110_v56  ;;  %v580_v6 = vrot.slane %v578_v62, 5  ;;  %v2592_v56 = vld [vmem:[%s3161_s1 + $0x228] sm:$0xff]  ;;  %v2558_v62 = vld [vmem:[%s3161_s1 + $0x158] sm:$0xff] }
  0x2e   : > { %1342 = vmatpush.bf16.msrb.mxu2 %v2574_v1  ;;  %834 = vmatmul.bf16.vlgmr.msra.gmra.mxu3 %v2107_v17  ;;  %v564_v60 = vshll.u32 %v488_v51, 16  ;;  %v2570_v1 = vld [vmem:[%s3161_s1 + $0x198] sm:$0xff]  ;;  %v594_v51 = vrot.slane %v592_v44, 5  ;;  %v2559_v57 = vld [vmem:[%s3161_s1 + $0x160] sm:$0xff]  ;;  %v1998_v44 = vld [vmem:[%s2752_s9 + $0x30] sm:$0xf] }
  0x2f   : > { %699 = vmatmul.bf16.vlgmr.msra.gmra.mxu2 %v635_v5  ;;  %1477 = vmatpush.bf16.msrb.mxu3 %v2586_v14  ;;  %v576_v5 = vrot.slane %v575_v61, 4  ;;  %v2582_v14 = vld [vmem:[%s3161_s1 + $0x1d8] sm:$0xff] }
  0x30   : > { %v566_v4 = vrot.slane %v564_v60, 5 }
  0x31   : > { %451 = vmatpush.bf16.msrb.mxu1 %v2509_v10  ;;  %962 = vmatpush.bf16.msrb.mxu0 %v2553_v15  ;;  %v493_v10 = vld [vmem:[%s2752_s9 + $0x38] sm:$0xf]  ;;  %v2503_v15 = vld [vmem:[%s3161_s1] sm:$0xff]  ;;  %v581_v17 = vsel %vm2786_vm2, %v576_v5, %v580_v6  ;;  %v2557_v5 = vld [vmem:[%s3161_s1 + $0x150] sm:$0xff] }
  0x32   : > { %1343 = vmatpush.bf16.msrb.mxu2 %v2573_v16  ;;  %v567_v16 = vsel %vm2786_vm2, %v562_v3, %v566_v4  ;;  %v600_v19 = vshll.u32 %v493_v10, 16  ;;  %v632_v28 = vunpack.c.l.b16 %v581_v17  ;;  %v1994_v17 = vld [vmem:[%s2752_s9 + $0x20] sm:$0xf] }
  0x33   : > { %1478 = vmatpush.bf16.msrb.mxu3 %v2585_v23  ;;  %v2499_v23 = vld [vmem:[%s2752_s9 + $0x4] sm:$0xf0]  ;;  %v631_v27 = vunpack.c.l.b16 %v567_v16  ;;  %v2589_v16 = vld [vmem:[%s3161_s1 + $0x210] sm:$0xff] }
  0x34   : > { %v602_v32 = vrot.slane %v600_v19, 5  ;;  %v2501_v19 = vld [vmem:[%s2752_s9 + $0x24] sm:$0xf0] }
  0x35   : > { %452 = vmatpush.bf16.msrb.mxu1 %v2508_v18  ;;  %963 = vmatpush.bf16.msrb.mxu0 %v2552_v25  ;;  %v597_v18 = vshrl.u32 %v493_v10, 16  ;;  %v2178_v25 = vld [vmem:[%s2752_s9 + $0xd8] sm:$0xf]  ;;  %v637_v39 = vpack.c.b16 %v632_v28, %v631_v27  ;;  %v2534_v10 = vld [vmem:[%s2752_s9 + $0xc4] sm:$0xf0] }
  0x36   : > { %1344 = vmatpush.bf16.msrb.mxu2 %v2572_v26  ;;  %v2543_v26 = vld [vmem:[%s2752_s9 + $0xdc] sm:$0xf0]  ;;  %v2386_v27 = vld [vmem:[%s2752_s9 + $0x50] sm:$0xf]  ;;  %v2575_v28 = vld [vmem:[%s2752_s9 + $0x54] sm:$0xf0] }
  0x37   : > { %1479 = vmatpush.bf16.msrb.mxu3 %v2584_v35  ;;  %v599_v31 = vrot.slane %v597_v18, 4  ;;  %v494_v35 = vld [vmem:[%s2752_s9 + $0x3c] sm:$0x1]  ;;  %v2588_v18 = vld [vmem:[%s3161_s1 + $0x208] sm:$0xff] }
  0x38   : > { %v606_v46 = vshll.u32 %v494_v35, 16 }
  0x39   : > { %453 = vmatpush.bf16.msrb.mxu1 %v2507_v30  ;;  %964 = vmatpush.bf16.msrb.mxu0 %v2551_v36  ;;  %v588_v30 = vrot.slane %v586_v13, 5  ;;  %v1987_v36 = vor.u32 %v2499_v23, %v1986_v22  ;;  %v603_v45 = vor.u32 %v602_v32, %v599_v31  ;;  %v2579_v13 = vld [vmem:[%s3161_s1 + $0x1c0] sm:$0xff]  ;;  %v2314_v22 = vld [vmem:[%s2752_s9 + $0x8] sm:$0xf]  ;;  %v2563_v23 = vld [vmem:[%s2752_s9 + $0xc] sm:$0xf0] }
  0x3a   : > { %1345 = vmatpush.bf16.msrb.mxu2 %v2571_v37  ;;  %v2179_v37 = vor.u32 %v2543_v26, %v2178_v25  ;;  %v2315_v26 = vor.u32 %v2563_v23, %v2314_v22  ;;  %v2224_v31 = vld [vmem:[%s2752_s9 + $0x90] sm:$0xf]  ;;  %v2226_v32 = vld [vmem:[%s2752_s9 + $0x98] sm:$0xf] }
  0x3b   : > { %1480 = vmatpush.bf16.msrb.mxu3 %v2583_v7  ;;  %v589_v42 = vor.u32 %v588_v30, %v585_v29  ;;  %v604_v52 = vrot.slane %v603_v45, 4  ;;  %v2387_v29 = vor.u32 %v2575_v28, %v2386_v27  ;;  %v2587_v30 = vld [vmem:[%s3161_s1 + $0x200] sm:$0xff]  ;;  %v1015_v35 = vshrl.u32 %v2224_v31, 16  ;;  %v2502_v45 = vld [vmem:[%s2752_s9 + $0x34] sm:$0xf0] }
  0x3c   : > { %372 = vmatmul.bf16.gmra.mxu1 %v1951_v53  ;;  %362 = vmatmul.bf16.gmra.mxu0 %v1943_v54  ;;  %v608_v53 = vrot.slane %v606_v46, 5  ;;  %v2567_v54 = vld [vmem:[%s3161_s1 + $0x180] sm:$0xff]  ;;  %v2190_v46 = vld [vmem:[%s2752_s9 + $0x108] sm:$0xf] }
  0x3d   : > { %454 = vmatpush.bf16.msrb.mxu1 %v2506_v47  ;;  %965 = vmatpush.bf16.msrb.mxu0 %v2550_v50  ;;  %v2560_v47 = vld [vmem:[%s3161_s1 + $0x168] sm:$0xff]  ;;  %v590_v50 = vrot.slane %v589_v42, 4  ;;  %v1545_v42 = vshrl.u32 %v2434_v34, 16 }
  0x3e   : > { %1346 = vmatpush.bf16.msrb.mxu2 %v2570_v1  ;;  %839 = vmatmul.bf16.gmra.mxu3 %v2111_v0  ;;  %v609_v61 = vsel %vm2786_vm2, %v604_v52, %v608_v53  ;;  %v2500_v0 = vld [vmem:[%s2752_s9 + $0x14] sm:$0xf0]  ;;  %v2182_v1 = vld [vmem:[%s2752_s9 + $0xe8] sm:$0xf] }
  0x3f   : > { %704 = vmatmul.bf16.gmra.mxu2 %v636_v55  ;;  %1481 = vmatpush.bf16.msrb.mxu3 %v2582_v14  ;;  %v2581_v55 = vld [vmem:[%s3161_s1 + $0x1d0] sm:$0xff]  ;;  %v595_v60 = vsel %vm2786_vm2, %v590_v50, %v594_v51  ;;  %v634_v4 = vunpack.c.l.b16 %v609_v61  ;;  %v2590_v14 = vld [vmem:[%s3161_s1 + $0x218] sm:$0xff]  ;;  %v1017_v51 = vrot.slane %v1015_v35, 4 }
  0x40   : > { %v633_v3 = vunpack.c.l.b16 %v595_v60  ;;  %v2227_v50 = vld [vmem:[%s2752_s9 + $0x9c] sm:$0x1]  ;;  %v2433_v60 = vld [vmem:[%s2752_s9 + $0xc] sm:$0x1]  ;;  %v2435_v61 = vld [vmem:[%s2752_s9 + $0x14] sm:$0x1] }
  0x41   : > { %455 = vmatpush.bf16.msrb.mxu1 %v2505_v59  ;;  %966 = vmatpush.bf16.msrb.mxu0 %v2549_v63  ;;  %v2591_v59 = vld [vmem:[%s3161_s1 + $0x220] sm:$0xff]  ;;  %v1990_v63 = vld [vmem:[%s2752_s9 + $0x10] sm:$0xf] }
  0x42   : > { %1347 = vmatpush.bf16.msrb.mxu2 %v2569_v11  ;;  %v1991_v6 = vor.u32 %v2500_v0, %v1990_v63  ;;  %v638_v8 = vpack.c.b16 %v634_v4, %v633_v3  ;;  %v1038_v0 = vshll.u32 %v2227_v50, 16 }
  0x43   : > { %1482 = vmatpush.bf16.msrb.mxu3 %v2581_v55  ;;  %v2564_v55 = vld [vmem:[%s2752_s9 + $0x1c] sm:$0xf0] }
  0x45   : > { %456 = vmatpush.bf16.msrb.mxu1 %v2504_v2  ;;  %967 = vmatpush.bf16.msrb.mxu0 %v2548_v9  ;;  %v2544_v2 = vld [vmem:[%s2752_s9 + $0xec] sm:$0xf0]  ;;  %v2118_v9 = vld [vmem:[%s2752_s9 + $0xc0] sm:$0xf] }
  0x46   : > { %1348 = vmatpush.bf16.msrb.mxu2 %v2568_v48  ;;  %v2183_v7 = vor.u32 %v2544_v2, %v2182_v1  ;;  %v2119_v11 = vor.u32 %v2534_v10, %v2118_v9  ;;  %v2318_v48 = vld [vmem:[%s2752_s9 + $0x18] sm:$0xf]  ;;  %v1554_v10 = vshll.u32 %v2435_v61, 16 }
  0x47   : > { %1483 = vmatpush.bf16.msrb.mxu3 %v2580_v58  ;;  %v1547_v58 = vrot.slane %v1545_v42, 4  ;;  %v2319_v2 = vor.u32 %v2564_v55, %v2318_v48  ;;  %v2231_v42 = vld [vmem:[%s2752_s9 + $0xac] sm:$0x1] }
  0x48   : > { %v1556_v23 = vrot.slane %v1554_v10, 5 }
  0x49   : > { %457 = vmatpush.bf16.msrb.mxu1 %v2503_v15  ;;  %968 = vmatpush.bf16.msrb.mxu0 %v2547_v21  ;;  %v2555_v15 = vld [vmem:[%s3161_s1 + $0x140] sm:$0xff] }
  0x4a   : > { %1349 = vmatpush.bf16.msrb.mxu2 %v2567_v54  ;;  %v2545_v21 = vld [vmem:[%s2752_s9 + $0xfc] sm:$0xf0] }
  0x4b   : > { %1484 = vmatpush.bf16.msrb.mxu3 %v2579_v13  ;;  %v2228_v13 = vld [vmem:[%s2752_s9 + $0xa0] sm:$0xf] }
  0x4c   : > { %458 = vmatmul.bf16.vlgmr.msrb.gmra.mxu1 %v1987_v36  ;;  %969 = vmatmul.bf16.vlgmr.msrb.gmra.mxu0 %v2179_v37  ;;  %v1018_v36 = vshll.u32 %v2224_v31, 16  ;;  %v1029_v37 = vshrl.u32 %v2226_v32, 16 }
  0x4d   : > { %1207 = vmatpush.bf16.msra.mxu1 %v2562_v20  ;;  %1723 = vmatpush.bf16.msra.mxu0 %v2594_v24  ;;  %v2186_v20 = vld [vmem:[%s2752_s9 + $0xf8] sm:$0xf] }
  0x4e   : > { %844 = vmatmul.bf16.gmra.mxu3 %v2115_v49  ;;  %2626 = vmatpush.bf16.msra.mxu2 %v2594_v24  ;;  %v1995_v24 = vor.u32 %v2501_v19, %v1994_v17  ;;  %v2187_v25 = vor.u32 %v2545_v21, %v2186_v20  ;;  %v2225_v49 = vld [vmem:[%s2752_s9 + $0x94] sm:$0x1]  ;;  %v1020_v52 = vrot.slane %v1018_v36, 5  ;;  %v1031_v53 = vrot.slane %v1029_v37, 4  ;;  %v2438_v19 = vld [vmem:[%s2752_s9 + $0x20] sm:$0xf] }
  0x4f   : > { %709 = vmatmul.bf16.gmra.mxu2 %v637_v39  ;;  %v1032_v39 = vshll.u32 %v2226_v32, 16  ;;  %v1024_v63 = vshll.u32 %v2225_v49, 16  ;;  %v1576_v31 = vshll.u32 %v2438_v19, 16  ;;  %v2229_v36 = vld [vmem:[%s2752_s9 + $0xa4] sm:$0x1] }
  0x50   : > { %v1021_v3 = vor.u32 %v1020_v52, %v1017_v51  ;;  %v2437_v51 = vld [vmem:[%s2752_s9 + $0x1c] sm:$0x1]  ;;  %v2439_v52 = vld [vmem:[%s2752_s9 + $0x24] sm:$0x1] }
  0x51   : > { %1208 = vmatpush.bf16.msra.mxu1 %v2561_v33  ;;  %1724 = vmatpush.bf16.msra.mxu0 %v2593_v43  ;;  %v2432_v33 = vld [vmem:[%s2752_s9 + $0x8] sm:$0xf]  ;;  %v1034_v54 = vrot.slane %v1032_v39, 5 }
  0x52   : > { %2627 = vmatpush.bf16.msra.mxu2 %v2593_v43  ;;  %v1531_v40 = vshrl.u32 %v2432_v33, 16  ;;  %v1534_v41 = vshll.u32 %v2432_v33, 16  ;;  %v1548_v43 = vshll.u32 %v2434_v34, 16 }
  0x53   : > { %v1035_v4 = vor.u32 %v1034_v54, %v1031_v53  ;;  %v2322_v53 = vld [vmem:[%s2752_s9 + $0x28] sm:$0xf]  ;;  %v2565_v54 = vld [vmem:[%s2752_s9 + $0x2c] sm:$0xf0] }
  0x55   : > { %1209 = vmatpush.bf16.msra.mxu1 %v2560_v47  ;;  %1725 = vmatpush.bf16.msra.mxu0 %v2592_v56  ;;  %v2546_v47 = vld [vmem:[%s2752_s9 + $0x10c] sm:$0xf0] }
  0x56   : > { %2628 = vmatpush.bf16.msra.mxu2 %v2592_v56  ;;  %v1533_v56 = vrot.slane %v1531_v40, 4  ;;  %v2191_v1 = vor.u32 %v2546_v47, %v2190_v46  ;;  %v1578_v46 = vrot.slane %v1576_v31, 5 }
  0x59   : > { %1210 = vmatpush.bf16.msra.mxu1 %v2559_v57  ;;  %1726 = vmatpush.bf16.msra.mxu0 %v2591_v59  ;;  %v1536_v57 = vrot.slane %v1534_v41, 5 }
  0x5a   : > { %2629 = vmatpush.bf16.msra.mxu2 %v2591_v59  ;;  %v1550_v59 = vrot.slane %v1548_v43, 5 }
  0x5c   : > { %463 = vmatmul.bf16.gmra.mxu1 %v1991_v6  ;;  %974 = vmatmul.bf16.gmra.mxu0 %v2183_v7  ;;  %v2576_v6 = vld [vmem:[%s2752_s9 + $0x64] sm:$0xf0]  ;;  %v1537_v7 = vor.u32 %v1536_v57, %v1533_v56  ;;  %v1551_v9 = vor.u32 %v1550_v59, %v1547_v58  ;;  %v1052_v56 = vshll.u32 %v2229_v36, 16  ;;  %v1066_v58 = vshll.u32 %v2231_v42, 16  ;;  %v2233_v42 = vld [vmem:[%s2752_s9 + $0xb4] sm:$0x1] }
  0x5d   : > { %1211 = vmatpush.bf16.msra.mxu1 %v2558_v62  ;;  %1727 = vmatpush.bf16.msra.mxu0 %v2590_v14  ;;  %v1999_v62 = vor.u32 %v2502_v45, %v1998_v44 }
  0x5e   : > { %849 = vmatmul.bf16.gmra.mxu3 %v2119_v11  ;;  %2630 = vmatpush.bf16.msra.mxu2 %v2590_v14  ;;  %v1026_v11 = vrot.slane %v1024_v63, 5  ;;  %v2230_v14 = vld [vmem:[%s2752_s9 + $0xa8] sm:$0xf]  ;;  %v1538_v20 = vrot.slane %v1537_v7, 4  ;;  %v1552_v22 = vrot.slane %v1551_v9, 4  ;;  %v1068_v7 = vrot.slane %v1066_v58, 5 }
  0x5f   : > { %714 = vmatmul.bf16.gmra.mxu2 %v638_v8  ;;  %v1540_v8 = vshll.u32 %v2433_v60, 16  ;;  %v1060_v27 = vshll.u32 %v2230_v14, 16  ;;  %v1568_v60 = vshll.u32 %v2437_v51, 16  ;;  %v2326_v51 = vld [vmem:[%s2752_s9 + $0x38] sm:$0xf] }
  0x60   : > { %v1557_v35 = vsel %vm2786_vm2, %v1552_v22, %v1556_v23  ;;  %v2445_v58 = vld [vmem:[%s2752_s9 + $0x3c] sm:$0x1] }
  0x61   : > { %1212 = vmatpush.bf16.msra.mxu1 %v2557_v5  ;;  %1728 = vmatpush.bf16.msra.mxu0 %v2589_v16  ;;  %v2390_v5 = vld [vmem:[%s2752_s9 + $0x60] sm:$0xf]  ;;  %v1542_v21 = vrot.slane %v1540_v8, 5  ;;  %v1062_v41 = vrot.slane %v1060_v27, 5  ;;  %v1660_v50 = vunpack.c.l.b16 %v1557_v35  ;;  %v1570_v9 = vrot.slane %v1568_v60, 5 }
  0x62   : > { %2631 = vmatpush.bf16.msra.mxu2 %v2589_v16  ;;  %v1036_v16 = vrot.slane %v1035_v4, 4  ;;  %v2391_v17 = vor.u32 %v2576_v6, %v2390_v5  ;;  %v1054_v5 = vrot.slane %v1052_v56, 5  ;;  %v2566_v56 = vld [vmem:[%s2752_s9 + $0x3c] sm:$0xf0] }
  0x63   : > { %v1543_v34 = vsel %vm2786_vm2, %v1538_v20, %v1542_v21  ;;  %v2444_v21 = vld [vmem:[%s2752_s9 + $0x38] sm:$0xf] }
  0x64   : > { %v1659_v49 = vunpack.c.l.b16 %v1543_v34  ;;  %v1618_v34 = vshll.u32 %v2444_v21, 16 }
  0x65   : > { %1213 = vmatpush.bf16.msra.mxu1 %v2556_v12  ;;  %1729 = vmatpush.bf16.msra.mxu0 %v2588_v18  ;;  %v1040_v12 = vrot.slane %v1038_v0, 5 }
  0x66   : > { %2632 = vmatpush.bf16.msra.mxu2 %v2588_v18  ;;  %v2436_v18 = vld [vmem:[%s2752_s9 + $0x18] sm:$0xf]  ;;  %v1667_v0 = vpack.c.b16 %v1660_v50, %v1659_v49 }
  0x67   : > { %v1559_v28 = vshrl.u32 %v2436_v18, 16  ;;  %v1041_v33 = vsel %vm2786_vm2, %v1036_v16, %v1040_v12  ;;  %v2232_v12 = vld [vmem:[%s2752_s9 + $0xb0] sm:$0xf] }
  0x68   : > { %v1144_v48 = vunpack.c.l.b16 %v1041_v33  ;;  %v2442_v16 = vld [vmem:[%s2752_s9 + $0x30] sm:$0xf]  ;;  %v1074_v20 = vshll.u32 %v2232_v12, 16  ;;  %v1615_v33 = vshrl.u32 %v2444_v21, 16 }
  0x69   : > { %1214 = vmatpush.bf16.msra.mxu1 %v2555_v15  ;;  %1730 = vmatpush.bf16.msra.mxu0 %v2587_v30  ;;  %v1022_v15 = vrot.slane %v1021_v3, 4  ;;  %v1561_v43 = vrot.slane %v1559_v28, 4  ;;  %v2577_v3 = vld [vmem:[%s2752_s9 + $0x74] sm:$0xf0] }
  0x6a   : > { %2633 = vmatpush.bf16.msra.mxu2 %v2587_v30  ;;  %v1573_v30 = vshrl.u32 %v2438_v19, 16  ;;  %v1071_v19 = vshrl.u32 %v2232_v12, 16  ;;  %v1076_v36 = vrot.slane %v1074_v20, 5 }
  0x6b   : > { %v1027_v32 = vsel %vm2786_vm2, %v1022_v15, %v1026_v11  ;;  %v2440_v15 = vld [vmem:[%s2752_s9 + $0x28] sm:$0xf] }
  0x6c   : > { %468 = vmatmul.bf16.gmra.mxu1 %v1995_v24  ;;  %979 = vmatmul.bf16.gmra.mxu0 %v2187_v25  ;;  %v1043_v24 = vshrl.u32 %v2228_v13, 16  ;;  %v1046_v25 = vshll.u32 %v2228_v13, 16  ;;  %v1575_v45 = vrot.slane %v1573_v30, 4  ;;  %v1143_v47 = vunpack.c.l.b16 %v1027_v32 }
  0x6d   : > { %v1587_v27 = vshrl.u32 %v2440_v15, 16  ;;  %v1590_v28 = vshll.u32 %v2440_v15, 16  ;;  %v1604_v30 = vshll.u32 %v2442_v16, 16  ;;  %v1073_v35 = vrot.slane %v1071_v19, 4 }
  0x6e   : > { %1485 = vmatmul.bf16.vlgmr.msrb.gmra.mxu3 %v2387_v29  ;;  %v1562_v29 = vshll.u32 %v2436_v18, 16  ;;  %v1045_v37 = vrot.slane %v1043_v24, 4  ;;  %v1048_v39 = vrot.slane %v1046_v25, 5  ;;  %v1579_v61 = vor.u32 %v1578_v46, %v1575_v45  ;;  %v2441_v46 = vld [vmem:[%s2752_s9 + $0x2c] sm:$0x1] }
  0x6f   : > { %1350 = vmatmul.bf16.vlgmr.msrb.gmra.mxu2 %v2315_v26  ;;  %v1057_v26 = vshrl.u32 %v2230_v14, 16  ;;  %v1151_v63 = vpack.c.b16 %v1144_v48, %v1143_v47  ;;  %v2234_v14 = vld [vmem:[%s2752_s9 + $0xb8] sm:$0xf]  ;;  %v1589_v47 = vrot.slane %v1587_v27, 4  ;;  %v1592_v48 = vrot.slane %v1590_v28, 5 }
  0x70   : > { %v1564_v44 = vrot.slane %v1562_v29, 5  ;;  %v1049_v55 = vor.u32 %v1048_v39, %v1045_v37  ;;  %v1580_v10 = vrot.slane %v1579_v61, 4  ;;  %v1085_v24 = vshrl.u32 %v2234_v14, 16  ;;  %v2238_v27 = vld [vmem:[%s2752_s9 + $0xc8] sm:$0xf] }
  0x71   : > { %v1059_v40 = vrot.slane %v1057_v26, 4  ;;  %v1088_v25 = vshll.u32 %v2234_v14, 16  ;;  %v2446_v26 = vld [vmem:[%s2752_s9 + $0x40] sm:$0xf]  ;;  %v1601_v29 = vshrl.u32 %v2442_v16, 16  ;;  %v1606_v50 = vrot.slane %v1604_v30, 5 }
  0x72   : > { %v1565_v59 = vor.u32 %v1564_v44, %v1561_v43  ;;  %v1050_v4 = vrot.slane %v1049_v55, 4  ;;  %v1629_v37 = vshrl.u32 %v2446_v26, 16  ;;  %v1632_v39 = vshll.u32 %v2446_v26, 16  ;;  %v2235_v43 = vld [vmem:[%s2752_s9 + $0xbc] sm:$0x1] }
  0x73   : > { %v1063_v57 = vor.u32 %v1062_v41, %v1059_v40  ;;  %v1087_v44 = vrot.slane %v1085_v24, 4  ;;  %v1090_v45 = vrot.slane %v1088_v25, 5  ;;  %v1603_v49 = vrot.slane %v1601_v29, 4  ;;  %v2236_v24 = vld [vmem:[%s2752_s9 + $0xc0] sm:$0xf] }
  0x74   : > { %v1566_v8 = vrot.slane %v1565_v59, 4  ;;  %v1631_v59 = vrot.slane %v1629_v37, 4  ;;  %v1634_v60 = vrot.slane %v1632_v39, 5  ;;  %v1080_v61 = vshll.u32 %v2233_v42, 16 }
  0x75   : > { %v1064_v6 = vrot.slane %v1063_v57, 4  ;;  %v1077_v57 = vor.u32 %v1076_v36, %v1073_v35  ;;  %v1113_v35 = vshrl.u32 %v2238_v27, 16  ;;  %v1116_v36 = vshll.u32 %v2238_v27, 16 }
  0x76   : > { %v1571_v22 = vsel %vm2786_vm2, %v1566_v8, %v1570_v9  ;;  %v2578_v8 = vld [vmem:[%s2752_s9 + $0x84] sm:$0xf0]  ;;  %v1635_v12 = vor.u32 %v1634_v60, %v1631_v59  ;;  %v1082_v14 = vrot.slane %v1080_v61, 5 }
  0x77   : > { %v1069_v18 = vsel %vm2786_vm2, %v1064_v6, %v1068_v7  ;;  %v1661_v40 = vunpack.c.l.b16 %v1571_v22  ;;  %v2327_v6 = vor.u32 %v2566_v56, %v2326_v51  ;;  %v2398_v7 = vld [vmem:[%s2752_s9 + $0x80] sm:$0xf] }
  0x78   : > { %v1146_v32 = vunpack.c.l.b16 %v1069_v18  ;;  %v2399_v18 = vor.u32 %v2578_v8, %v2398_v7  ;;  %v1636_v25 = vrot.slane %v1635_v12, 4 }
  0x7c   : > { %473 = vmatmul.bf16.gmra.mxu1 %v1999_v62  ;;  %984 = vmatmul.bf16.gmra.mxu0 %v2191_v1  ;;  %v1582_v62 = vshll.u32 %v2439_v52, 16  ;;  %v2323_v1 = vor.u32 %v2565_v54, %v2322_v53  ;;  %v2443_v52 = vld [vmem:[%s2752_s9 + $0x34] sm:$0x1]  ;;  %v1617_v53 = vrot.slane %v1615_v33, 4  ;;  %v1620_v54 = vrot.slane %v1618_v34, 5 }
  0x7d   : > { %v1102_v34 = vshll.u32 %v2236_v24, 16 }
  0x7e   : > { %1490 = vmatmul.bf16.gmra.mxu3 %v2391_v17  ;;  %v1584_v11 = vrot.slane %v1582_v62, 5  ;;  %v1055_v17 = vsel %vm2786_vm2, %v1050_v4, %v1054_v5  ;;  %v1091_v62 = vor.u32 %v1090_v45, %v1087_v44  ;;  %v1607_v4 = vor.u32 %v1606_v50, %v1603_v49  ;;  %v2239_v50 = vld [vmem:[%s2752_s9 + $0xcc] sm:$0x1] }
  0x7f   : > { %1355 = vmatmul.bf16.gmra.mxu2 %v2319_v2  ;;  %v2394_v2 = vld [vmem:[%s2752_s9 + $0x70] sm:$0xf]  ;;  %v1145_v31 = vunpack.c.l.b16 %v1055_v17  ;;  %v1610_v5 = vshll.u32 %v2443_v52, 16  ;;  %v1621_v9 = vor.u32 %v1620_v54, %v1617_v53  ;;  %v1118_v49 = vrot.slane %v1116_v36, 5 }
  0x80   : > { %v2395_v13 = vor.u32 %v2577_v3, %v2394_v2  ;;  %v1585_v23 = vsel %vm2786_vm2, %v1580_v10, %v1584_v11  ;;  %v1593_v3 = vor.u32 %v1592_v48, %v1589_v47  ;;  %v1624_v10 = vshll.u32 %v2445_v58, 16 }
  0x81   : > { %v1662_v41 = vunpack.c.l.b16 %v1585_v23  ;;  %v1152_v55 = vpack.c.b16 %v1146_v32, %v1145_v31  ;;  %v1078_v11 = vrot.slane %v1077_v57, 4  ;;  %v1092_v15 = vrot.slane %v1091_v62, 4 }
  0x82   : > { %v1594_v19 = vrot.slane %v1593_v3, 4  ;;  %v1608_v20 = vrot.slane %v1607_v4, 4  ;;  %v1612_v21 = vrot.slane %v1610_v5, 5  ;;  %v1622_v22 = vrot.slane %v1621_v9, 4 }
  0x83   : > { %v1668_v2 = vpack.c.b16 %v1662_v41, %v1661_v40  ;;  %v1626_v23 = vrot.slane %v1624_v10, 5  ;;  %v1083_v28 = vsel %vm2786_vm2, %v1078_v11, %v1082_v14  ;;  %v1099_v32 = vshrl.u32 %v2236_v24, 16 }
  0x84   : > { %v1613_v31 = vsel %vm2786_vm2, %v1608_v20, %v1612_v21  ;;  %v1147_v39 = vunpack.c.l.b16 %v1083_v28  ;;  %v1104_v47 = vrot.slane %v1102_v34, 5  ;;  %v1115_v48 = vrot.slane %v1113_v35, 4 }
  0x85   : > { %v1627_v33 = vsel %vm2786_vm2, %v1622_v22, %v1626_v23  ;;  %v1664_v42 = vunpack.c.l.b16 %v1613_v31  ;;  %v1101_v44 = vrot.slane %v1099_v32, 4  ;;  %v1122_v59 = vshll.u32 %v2239_v50, 16 }
  0x86   : > { %v1119_v58 = vor.u32 %v1118_v49, %v1115_v48 }
  0x87   : > { %v1105_v57 = vor.u32 %v1104_v47, %v1101_v44 }
  0x88   : > { %v1120_v62 = vrot.slane %v1119_v58, 4 }
  0x89   : > { %v1106_v60 = vrot.slane %v1105_v57, 4 }
  0x8c   : > { %1215 = vmatmul.bf16.vlgmr.msra.gmra.mxu1 %v1151_v63  ;;  %1731 = vmatmul.bf16.vlgmr.msra.gmra.mxu0 %v1667_v0  ;;  %v1094_v63 = vshll.u32 %v2235_v43, 16  ;;  %v1596_v0 = vshll.u32 %v2441_v46, 16  ;;  %v1665_v43 = vunpack.c.l.b16 %v1627_v33  ;;  %v2237_v46 = vld [vmem:[%s2752_s9 + $0xc4] sm:$0x1] }
  0x8d   : > { %v1108_v53 = vshll.u32 %v2237_v46, 16 }
  0x8e   : > { %1495 = vmatmul.bf16.gmra.mxu3 %v2395_v13  ;;  %v1096_v16 = vrot.slane %v1094_v63, 5  ;;  %v1598_v17 = vrot.slane %v1596_v0, 5  ;;  %v1124_v63 = vrot.slane %v1122_v59, 5 }
  0x8f   : > { %1360 = vmatmul.bf16.gmra.mxu2 %v2323_v1  ;;  %v2447_v1 = vld [vmem:[%s2752_s9 + $0x44] sm:$0x1]  ;;  %v1110_v61 = vrot.slane %v1108_v53, 5 }
  0x90   : > { %v1638_v13 = vshll.u32 %v2447_v1, 16  ;;  %v1097_v29 = vsel %vm2786_vm2, %v1092_v15, %v1096_v16  ;;  %v1599_v30 = vsel %vm2786_vm2, %v1594_v19, %v1598_v17  ;;  %v1125_v4 = vsel %vm2786_vm2, %v1120_v62, %v1124_v63 }
  0x91   : > { %v1148_v40 = vunpack.c.l.b16 %v1097_v29  ;;  %v1663_v41 = vunpack.c.l.b16 %v1599_v30  ;;  %v1111_v3 = vsel %vm2786_vm2, %v1106_v60, %v1110_v61  ;;  %v1150_v7 = vunpack.c.l.b16 %v1125_v4 }
  0x92   : > { %v1640_v26 = vrot.slane %v1638_v13, 5 }
  0x93   : > { %v1153_v51 = vpack.c.b16 %v1148_v40, %v1147_v39  ;;  %v1669_v52 = vpack.c.b16 %v1664_v42, %v1663_v41 }
  0x94   : > { %v1641_v37 = vsel %vm2786_vm2, %v1636_v25, %v1640_v26 }
  0x95   : > { %v1666_v45 = vunpack.c.l.b16 %v1641_v37 }
  0x97   : > { %v1670_v56 = vpack.c.b16 %v1666_v45, %v1665_v43 }
  0x9c   : > { %1220 = vmatmul.bf16.gmra.mxu1 %v1152_v55  ;;  %1736 = vmatmul.bf16.gmra.mxu0 %v1668_v2 }
  0x9e   : > { %1500 = vmatmul.bf16.gmra.mxu3 %v2399_v18 }
  0x9f   : > { %1365 = vmatmul.bf16.gmra.mxu2 %v2327_v6  ;;  %v1149_v6 = vunpack.c.l.b16 %v1111_v3 }
  0xa1   : > { %v1154_v8 = vpack.c.b16 %v1150_v7, %v1149_v6 }
  0xa9   : > { %v368_v54 = vpop.f32.mrf.mxu1  ;;  %v358_v55 = vpop.f32.mrf.mxu0 }
  0xac   : > { %1225 = vmatmul.bf16.gmra.mxu1 %v1153_v51  ;;  %1741 = vmatmul.bf16.gmra.mxu0 %v1669_v52 }
  0xaf   : > { %1746 = vmatmul.bf16.vlgmr.msra.gmra.mxu2 %v1670_v56 }
  0xb1   : > { %v370_v1 = vpop.f32.mrf.mxu1  ;;  %v360_v2 = vpop.f32.mrf.mxu0 }
  0xb2   : > { %v700_v0 = vpop.f32.mrf.mxu2  ;;  %v835_v5 = vpop.f32.mrf.mxu3 }
  0xb9   : > { %v373_v10 = vpop.f32.mrf.mxu1  ;;  %v363_v11 = vpop.f32.mrf.mxu0 }
  0xba   : > { %v702_v9 = vpop.f32.mrf.mxu2  ;;  %v3094_v12 = vpop.f32.mrf.mxu3 }
  0xbc   : > { %1230 = vmatmul.bf16.gmra.mxu1 %v1154_v8 }
  0xc1   : > { %v375_v14 = vpop.f32.mrf.mxu1  ;;  %v365_v15 = vpop.f32.mrf.mxu0 }
  0xc2   : > { %v705_v13 = vpop.f32.mrf.mxu2  ;;  %v840_v16 = vpop.f32.mrf.mxu3 }
  0xc9   : > { %v459_v18 = vpop.f32.mrf.mxu1  ;;  %v970_v19 = vpop.f32.mrf.mxu0 }
  0xca   : > { %v707_v17 = vpop.f32.mrf.mxu2  ;;  %v460_v20 = vadd.f32 %v459_v18, %v358_v55  ;;  %v3096_v21 = vpop.f32.mrf.mxu3 }
  0xcc   : > { %v720_v38 = vadd.f32 %v700_v0, %v460_v20 }
  0xce   : > { %v855_v22 = vadd.f32 %v835_v5, %v720_v38 }
  0xd0   : > { %v990_v23 = vadd.f32 %v970_v19, %v855_v22 }
  0xd1   : > { %v461_v25 = vpop.f32.mrf.mxu1  ;;  %v972_v26 = vpop.f32.mrf.mxu0 }
  0xd2   : > { %v710_v24 = vpop.f32.mrf.mxu2  ;;  %v462_v27 = vadd.f32 %v461_v25, %v360_v2  ;;  %v845_v29 = vpop.f32.mrf.mxu3 }
  0xd4   : > { %v721_v28 = vadd.f32 %v702_v9, %v462_v27 }
  0xd9   : > { %v464_v31 = vpop.f32.mrf.mxu1  ;;  %v975_v32 = vpop.f32.mrf.mxu0 }
  0xda   : > { %v712_v30 = vpop.f32.mrf.mxu2  ;;  %v465_v33 = vadd.f32 %v464_v31, %v363_v11  ;;  %v3098_v39 = vpop.f32.mrf.mxu3 }
  0xdc   : > { %v722_v34 = vadd.f32 %v705_v13, %v465_v33 }
  0xde   : > { %v857_v35 = vadd.f32 %v840_v16, %v722_v34 }
  0xe0   : > { %v992_v36 = vadd.f32 %v975_v32, %v857_v35 }
  0xe1   : > { %v466_v40 = vpop.f32.mrf.mxu1  ;;  %v3100_v41 = vpop.f32.mrf.mxu0 }
  0xe2   : > { %v715_v37 = vpop.f32.mrf.mxu2  ;;  %v467_v42 = vadd.f32 %v466_v40, %v365_v15  ;;  %v850_v48 = vpop.f32.mrf.mxu3 }
  0xe4   : > { %v723_v43 = vadd.f32 %v707_v17, %v467_v42 }
  0xe6   : > { %v858_v31 = vadd.f32 %v3096_v21, %v723_v43 }
  0xe8   : > { %v993_v42 = vadd.f32 %v3100_v41, %v858_v31 }
  0xe9   : > { %v469_v45 = vpop.f32.mrf.mxu1  ;;  %v980_v46 = vpop.f32.mrf.mxu0 }
  0xea   : > { %v717_v44 = vpop.f32.mrf.mxu2  ;;  %v470_v47 = vadd.f32 %v469_v45, %v368_v54  ;;  %v3108_v58 = vpop.f32.mrf.mxu3 }
  0xec   : > { %v724_v49 = vadd.f32 %v710_v24, %v470_v47 }
  0xee   : > { %v859_v50 = vadd.f32 %v845_v29, %v724_v49 }
  0xf0   : > { %v3102_v51 = vadd.f32 %v980_v46, %v859_v50 }
  0xf1   : > { %v471_v53 = vpop.f32.mrf.mxu1  ;;  %v3104_v55 = vpop.f32.mrf.mxu0 }
  0xf2   : > { %v1351_v52 = vpop.f32.mrf.mxu2  ;;  %v472_v56 = vadd.f32 %v471_v53, %v370_v1  ;;  %v1486_v0 = vpop.f32.mrf.mxu3 }
  0xf4   : > { %v3106_v57 = vadd.f32 %v712_v30, %v472_v56 }
  0xf9   : > { %v474_v60 = vpop.f32.mrf.mxu1  ;;  %v985_v61 = vpop.f32.mrf.mxu0 }
  0xfa   : > { %v1353_v59 = vpop.f32.mrf.mxu2  ;;  %v475_v62 = vadd.f32 %v474_v60, %v373_v10  ;;  %v1488_v7 = vpop.f32.mrf.mxu3  ;;  %v856_v10 = vadd.f32 %v3094_v12, %v721_v28  ;;  %v860_v60 = vadd.f32 %v3098_v39, %v3106_v57 }
  0xfc   : > { %v726_v63 = vadd.f32 %v715_v37, %v475_v62  ;;  %v991_v16 = vadd.f32 %v972_v26, %v856_v10 }
  0xfe   : > { %v861_v54 = vadd.f32 %v850_v48, %v726_v63 }
 0x100   : > { %v3110_v2 = vadd.f32 %v985_v61, %v861_v54 }
 0x101   : > { %v476_v4 = vpop.f32.mrf.mxu1  ;;  %v3112_v5 = vpop.f32.mrf.mxu0 }
 0x102   : > { %v1356_v3 = vpop.f32.mrf.mxu2  ;;  %v477_v6 = vadd.f32 %v476_v4, %v375_v14  ;;  %v1491_v38 = vpop.f32.mrf.mxu3  ;;  %v3121_v14 = vld [vmem:[%s3162_s2] ss:$0 sm:$0xff] }
 0x104   : > { %v3114_v1 = vadd.f32 %v717_v44, %v477_v6 }
 0x109   : > { %v1216_v8 = vpop.f32.mrf.mxu1  ;;  %v1732_v9 = vpop.f32.mrf.mxu0 }
 0x10a   : > { %v1236_v11 = vadd.f32 %v1216_v8, %v990_v23  ;;  %v1358_v13 = vpop.f32.mrf.mxu2  ;;  %v1493_v35 = vpop.f32.mrf.mxu3 }
 0x10c   : > { %v1371_v15 = vadd.f32 %v1351_v52, %v1236_v11 }
 0x10e   : > { %v1506_v17 = vadd.f32 %v1486_v0, %v1371_v15  ;;  %v995_v0 = vadd.f32 %v3104_v55, %v860_v60 }
 0x110   : > { %v1752_v22 = vadd.f32 %v1732_v9, %v1506_v17  ;;  %v862_v17 = vadd.f32 %v3108_v58, %v3114_v1 }
 0x111   : > { %v1218_v18 = vpop.f32.mrf.mxu1  ;;  %v1734_v19 = vpop.f32.mrf.mxu0 }
 0x112   : > { %v1237_v20 = vadd.f32 %v1218_v18, %v991_v16  ;;  %v1361_v25 = vpop.f32.mrf.mxu2  ;;  %v1764_v12 = vadd.f32 %v3121_v14, %v1752_v22  ;;  %v1496_v48 = vpop.f32.mrf.mxu3 }
 0x114   : > { %v1372_v24 = vadd.f32 %v1353_v59, %v1237_v20  ;;  %v1772_v32 = vmax.f32 %v1764_v12, 0.0 }
 0x116   : > { %v1507_v23 = vadd.f32 %v1488_v7, %v1372_v24  ;;  %v997_v24 = vadd.f32 %v3112_v5, %v862_v17 }
 0x118   : > { %v1753_v27 = vadd.f32 %v1734_v19, %v1507_v23 }
 0x119   : > { %v1221_v26 = vpop.f32.mrf.mxu1  ;;  %v1737_v28 = vpop.f32.mrf.mxu0 }
 0x11a   : > { %v1765_v29 = vadd.f32 %v3121_v14, %v1753_v27  ;;  %v1238_v30 = vadd.f32 %v1221_v26, %v992_v36  ;;  %v1363_v40 = vpop.f32.mrf.mxu2  ;;  %v1498_v4 = vpop.f32.mrf.mxu3 }
 0x11c   : > { %v1773_v33 = vmax.f32 %v1765_v29, 0.0  ;;  %v1373_v34 = vadd.f32 %v1356_v3, %v1238_v30 }
 0x11e   : > { %v2598_v37 = vpack.c.bf16 %v1773_v33, %v1772_v32  ;;  %v1508_v44 = vadd.f32 %v1491_v38, %v1373_v34 }
 0x120   : > { %2599 = vst [vmem:[%s3130_s10] sm:$0xff] %v2598_v37   ;;  %v1754_v21 = vadd.f32 %v1737_v28, %v1508_v44 }
 0x121   : > { %v1223_v45 = vpop.f32.mrf.mxu1  ;;  %v1739_v36 = vpop.f32.mrf.mxu0 }
 0x122   : > { %v1239_v46 = vadd.f32 %v1223_v45, %v993_v42  ;;  %v1766_v49 = vadd.f32 %v3121_v14, %v1754_v21  ;;  %v1366_v52 = vpop.f32.mrf.mxu2  ;;  %v1501_v55 = vpop.f32.mrf.mxu3 }
 0x124   : > { %v1374_v43 = vadd.f32 %v1358_v13, %v1239_v46  ;;  %v1774_v61 = vmax.f32 %v1766_v49, 0.0 }
 0x126   : > { %v1509_v47 = vadd.f32 %v1493_v35, %v1374_v43 }
 0x128   : > { %v1755_v50 = vadd.f32 %v1739_v36, %v1509_v47 }
 0x129   : > { %v1226_v53 = vpop.f32.mrf.mxu1  ;;  %v1742_v41 = vpop.f32.mrf.mxu0 }
 0x12a   : > { %v1767_v56 = vadd.f32 %v3121_v14, %v1755_v50  ;;  %v1240_v59 = vadd.f32 %v1226_v53, %v3102_v51  ;;  %v1368_v8 = vpop.f32.mrf.mxu2  ;;  %v1503_v28 = vpop.f32.mrf.mxu3 }
 0x12c   : > { %v1775_v62 = vmax.f32 %v1767_v56, 0.0  ;;  %v1375_v63 = vadd.f32 %v1361_v25, %v1240_v59 }
 0x12e   : > { %v2603_v54 = vpack.c.bf16 %v1775_v62, %v1774_v61  ;;  %v1510_v3 = vadd.f32 %v1496_v48, %v1375_v63 }
 0x130   : > { %2615 = vst [vmem:[%s3130_s10 + $0x8] sm:$0xff] %v2603_v54   ;;  %v1756_v9 = vadd.f32 %v1742_v41, %v1510_v3 }
 0x131   : > { %v1228_v6 = vpop.f32.mrf.mxu1  ;;  %v1744_v51 = vpop.f32.mrf.mxu0 }
 0x132   : > { %v1241_v7 = vadd.f32 %v1228_v6, %v995_v0  ;;  %v1768_v10 = vadd.f32 %v3121_v14, %v1756_v9  ;;  %v1747_v38 = vpop.f32.mrf.mxu2 }
 0x134   : > { %v1376_v11 = vadd.f32 %v1363_v40, %v1241_v7  ;;  %v1776_v18 = vmax.f32 %v1768_v10, 0.0 }
 0x136   : > { %v1511_v13 = vadd.f32 %v1498_v4, %v1376_v11 }
 0x138   : > { %v1757_v39 = vadd.f32 %v1744_v51, %v1511_v13 }
 0x139   : > { %v1231_v57 = vpop.f32.mrf.mxu1 }
 0x13a   : > { %v1769_v15 = vadd.f32 %v3121_v14, %v1757_v39  ;;  %v1242_v16 = vadd.f32 %v1231_v57, %v3110_v2  ;;  %v1749_v29 = vpop.f32.mrf.mxu2 }
 0x13c   : > { %v1777_v19 = vmax.f32 %v1769_v15, 0.0  ;;  %v1377_v20 = vadd.f32 %v1366_v52, %v1242_v16 }
 0x13e   : > { %v2608_v22 = vpack.c.bf16 %v1777_v19, %v1776_v18  ;;  %v1512_v25 = vadd.f32 %v1501_v55, %v1377_v20 }
 0x140   : > { %2616 = vst [vmem:[%s3130_s10 + $0x10] sm:$0xff] %v2608_v22   ;;  %v1758_v27 = vadd.f32 %v1747_v38, %v1512_v25 }
 0x141   : > { %v1233_v23 = vpop.f32.mrf.mxu1 }
 0x142   : > { %v1243_v12 = vadd.f32 %v1233_v23, %v997_v24  ;;  %v1770_v30 = vadd.f32 %v3121_v14, %v1758_v27 }
 0x144   : > { %v1378_v26 = vadd.f32 %v1368_v8, %v1243_v12  ;;  %v1778_v31 = vmax.f32 %v1770_v30, 0.0 }
 0x146   : > { %v1513_v2 = vadd.f32 %v1503_v28, %v1378_v26 }
 0x148   : > { %v1759_v58 = vadd.f32 %v1749_v29, %v1513_v2 }
 0x14a   : > { %v1771_v1 = vadd.f32 %v3121_v14, %v1759_v58 }
 0x14c   : > { %v1779_v32 = vmax.f32 %v1771_v1, 0.0 }
 0x14e   : > { %v2613_v33 = vpack.c.bf16 %v1779_v32, %v1778_v31 }
 0x150   : > { %2617 = vst [vmem:[%s3130_s10 + $0x18] sm:$0xff] %v2613_v33  }
 0x151 PF: > { %s13_s14 = sadd.s32 1, %s2682_s14   ;;  %s3166_s12 = smov %s2678_s13 }
 0x152   : > { %p10_p6 = scmp.ge.s32.totalorder %s13_s14, 4   ;;  %s3167_s13 = smov %s3169_s15 }
 0x154   :  { %12 = sbr.rel (!%p10_p6) target bundleno = 2 (0x2), region = 81 }

// kernel: basic_block_forward.5
= control target key start
LH: loop header
LB: loop body
LE: loop exit
PB: predicated region body
PF: predicated region fallthrough
CT: control target
= control target key end

     0   :  { %s2862_s15 = smov 0   ;;  %s2864_s16 = smov 0   ;;  %s3519_s0 = inlined_call_operand.vmem [shape: bf16[2,10,10,128], index: 0, kind: input, shape index: {}]   ;;  %s3520_s1 = inlined_call_operand.vmem [shape: bf16[9,128,128], index: 1, kind: input, shape index: {}]   ;;  %s3521_s2 = inlined_call_operand.vmem [shape: f32[1,128], index: 2, kind: input, shape index: {}]   ;;  %s3522_s3 = inlined_call_operand.vmem [shape: bf16[2,8,8,128], index: 3, kind: input, shape index: {}]   ;;  %s3523_s4 = inlined_call_operand.vmem [shape: f32[2,8,8,128], index: 4, kind: output, shape index: {}]  }
   0x1   :  { %s2866_s17 = smov 0  }
   0x2 LB: > { %s23_s18 = sadd.s32 1, %s2831_s16  ;;  %p2106_p0 = scmp.ge.s32.totalorder %s2835_s17, 1  ;;  %s2835_s17 = sphi %s2866_s17, %s14_s17   ;;  %s2831_s16 = sphi %s2864_s16, %s3529_s16   ;;  %s2827_s15 = sphi %s2862_s15, %s3528_s15  }
   0x3   : > { %p24_p1 = scmp.ge.s32.totalorder %s23_s18, 2  ;;  %p208_p2 = scmp.lt.s32.totalorder %s2835_s17, 3 }
   0x5   : > { %s3531_s18 = smov (%p24_p1, %s23_s18), 0  ;;  %p209_p3 = pnand %p2106_p0, %p208_p2 }
   0x6   : > { %p252_p4 = scmp.lt.s32.totalorder (!%p209_p3), %s2827_s15, 1 }
   0x7   : > { %212 = sbr.rel (%p209_p3) target bundleno = 337 (0x151), region = 36 }
   0xc   : > { %v2687_v0 = vld [vmem:[%s3520_s1 + $0x78] sm:$0xff]  ;;  %v2686_v2 = vld [vmem:[%s3520_s1 + $0x70] sm:$0xff]  ;;  %s3533_s15 = smov (!%p252_p4, %s2827_s15), 1  ;;  %v2685_v6 = vld [vmem:[%s3520_s1 + $0x68] sm:$0xff]  ;;  %vm312_vm0 = vsmask.f32 3328 }
   0xd   : > { %v2695_v1 = vld [vmem:[%s3520_s1 + $0xb8] sm:$0xff]  ;;  %2771 = vmatpush.bf16.msra.mxu1 %v2687_v0  ;;  %508 = vmatpush.bf16.msra.mxu0 %v2687_v0  ;;  %v2694_v3 = vld [vmem:[%s3520_s1 + $0xb0] sm:$0xff]  ;;  %s2787_s29 = smul.u32 80, %s3533_s15  ;;  %v2693_v7 = vld [vmem:[%s3520_s1 + $0xa8] sm:$0xff]  ;;  %vm313_vm1 = vsmask.f32 7440 }
   0xe   : > { %778 = vmatpush.bf16.msra.mxu2 %v2695_v1  ;;  %v2707_v4 = vld [vmem:[%s3520_s1 + $0xf8] sm:$0xff]  ;;  %v2706_v5 = vld [vmem:[%s3520_s1 + $0xf0] sm:$0xff]  ;;  %v2684_v11 = vld [vmem:[%s3520_s1 + $0x60] sm:$0xff]  ;;  %vm662_vm2 = vcmask 1042432   ;;  %vm663_vm3 = vcmask 1046532   ;;  %s2667_s24 = sshll.u32 %s3533_s15, 6 }
   0xf   : > { %913 = vmatpush.bf16.msra.mxu3 %v2707_v4  ;;  %s2910_s12 = scalar_lea.vmem %s3519_s0, %s2787_s29  ;;  %v2692_v16 = vld [vmem:[%s3520_s1 + $0xa0] sm:$0xff]  ;;  %v2705_v17 = vld [vmem:[%s3520_s1 + $0xe8] sm:$0xff]  ;;  %v2683_v29 = vld [vmem:[%s3520_s1 + $0x58] sm:$0xff]  ;;  %s3476_s27 = scalar_lea.vmem %s3523_s4, %s2667_s24 }
  0x10   : > { %v284_v8 = vld [vmem:[%s2910_s12 + $0x20] sm:$0xf]  ;;  %v285_v9 = vld [vmem:[%s2910_s12 + $0x28] sm:$0xf]  ;;  %v2915_v10 = vld [vmem:[%s2910_s12 + $0x24] sm:$0x1] }
  0x11   : > { %2772 = vmatpush.bf16.msra.mxu1 %v2686_v2  ;;  %509 = vmatpush.bf16.msra.mxu0 %v2686_v2  ;;  %v2921_v12 = vld [vmem:[%s2910_s12 + $0x2c] sm:$0x1]  ;;  %v372_v13 = vshrl.u32 %v284_v8, 16  ;;  %v375_v14 = vshll.u32 %v284_v8, 16  ;;  %v386_v15 = vshrl.u32 %v285_v9, 16  ;;  %v389_v18 = vshll.u32 %v285_v9, 16  ;;  %vm2948_vm4 = vmor %vm312_vm0, %vm313_vm1 }
  0x12   : > { %779 = vmatpush.bf16.msra.mxu2 %v2694_v3  ;;  %v280_v19 = vld [vmem:[%s2910_s12] sm:$0xf]  ;;  %v381_v22 = vshll.u32 %v2915_v10, 16  ;;  %v281_v24 = vld [vmem:[%s2910_s12 + $0x8] sm:$0xf]  ;;  %v395_v26 = vshll.u32 %v2921_v12, 16  ;;  %vm2957_vm5 = vmor %vm662_vm2, %vm663_vm3 }
  0x13   : > { %914 = vmatpush.bf16.msra.mxu3 %v2706_v5  ;;  %v374_v20 = vrot.slane %v372_v13, 4  ;;  %v377_v21 = vrot.slane %v375_v14, 5  ;;  %v388_v23 = vrot.slane %v386_v15, 4  ;;  %v391_v25 = vrot.slane %v389_v18, 5  ;;  %v304_v27 = vld [vmem:[%s2910_s12 + $0x4] sm:$0x1] }
  0x14   : > { %v305_v28 = vld [vmem:[%s2910_s12 + $0xc] sm:$0x1]  ;;  %v316_v31 = vshrl.u32 %v280_v19, 16  ;;  %v319_v32 = vshll.u32 %v280_v19, 16  ;;  %v2704_v34 = vld [vmem:[%s3520_s1 + $0xe0] sm:$0xff]  ;;  %v325_v35 = vshll.u32 %v304_v27, 16 }
  0x15   : > { %2773 = vmatpush.bf16.msra.mxu1 %v2685_v6  ;;  %510 = vmatpush.bf16.msra.mxu0 %v2685_v6  ;;  %v378_v30 = vor.u32 %v377_v21, %v374_v20  ;;  %v392_v33 = vor.u32 %v391_v25, %v388_v23  ;;  %v330_v36 = vshrl.u32 %v281_v24, 16  ;;  %v333_v37 = vshll.u32 %v281_v24, 16  ;;  %v638_v38 = vld [vmem:[%s2910_s12] sm:$0xe]  ;;  %v639_v43 = vld [vmem:[%s2910_s12 + $0x8] sm:$0xe] }
  0x16   : > { %780 = vmatpush.bf16.msra.mxu2 %v2693_v7  ;;  %v383_v39 = vrot.slane %v381_v22, 5  ;;  %v318_v40 = vrot.slane %v316_v31, 4  ;;  %v321_v41 = vrot.slane %v319_v32, 5  ;;  %v339_v42 = vshll.u32 %v305_v28, 16  ;;  %v2691_v44 = vld [vmem:[%s3520_s1 + $0x98] sm:$0xff]  ;;  %v2682_v60 = vld [vmem:[%s3520_s1 + $0x50] sm:$0xff] }
  0x17   : > { %915 = vmatpush.bf16.msra.mxu3 %v2705_v17  ;;  %v379_v45 = vrot.slane %v378_v30, 4  ;;  %v397_v46 = vrot.slane %v395_v26, 5  ;;  %v332_v47 = vrot.slane %v330_v36, 4  ;;  %v335_v48 = vrot.slane %v333_v37, 5  ;;  %v2703_v56 = vld [vmem:[%s3520_s1 + $0xd8] sm:$0xff]  ;;  %v2690_v0 = vld [vmem:[%s3520_s1 + $0x90] sm:$0xff] }
  0x18   : > { %v393_v50 = vrot.slane %v392_v33, 4  ;;  %v322_v51 = vor.u32 %v321_v41, %v318_v40  ;;  %v2208_v52 = vrot.slane %v638_v38, 9  ;;  %v667_v53 = vrot.slane %v304_v27, 5  ;;  %v286_v59 = vld [vmem:[%s2910_s12 + $0x30] sm:$0xf]  ;;  %v2681_v14 = vld [vmem:[%s3520_s1 + $0x48] sm:$0xff] }
  0x19   : > { %2774 = vmatpush.bf16.msra.mxu1 %v2684_v11  ;;  %511 = vmatpush.bf16.msra.mxu0 %v2684_v11  ;;  %v327_v54 = vrot.slane %v325_v35, 5  ;;  %v336_v55 = vor.u32 %v335_v48, %v332_v47  ;;  %v2209_v58 = vrot.slane %v639_v43, 9  ;;  %v341_v62 = vrot.slane %v339_v42, 5  ;;  %v287_v3 = vld [vmem:[%s2910_s12 + $0x38] sm:$0xf]  ;;  %v2702_v11 = vld [vmem:[%s3520_s1 + $0xd0] sm:$0xff] }
  0x1a   : > { %781 = vmatpush.bf16.msra.mxu2 %v2692_v16  ;;  %v323_v61 = vrot.slane %v322_v51, 4  ;;  %v671_v63 = vrot.slane %v305_v28, 5  ;;  %v384_v1 = vsel %vm2948_vm4, %v379_v45, %v383_v39  ;;  %v398_v4 = vsel %vm2948_vm4, %v393_v50, %v397_v46  ;;  %v282_v7 = vld [vmem:[%s2910_s12 + $0x10] sm:$0xf]  ;;  %v2689_v19 = vld [vmem:[%s3520_s1 + $0x88] sm:$0xff]  ;;  %v2680_v24 = vld [vmem:[%s3520_s1 + $0x40] sm:$0xff] }
  0x1b   : > { %916 = vmatpush.bf16.msra.mxu3 %v2704_v34  ;;  %v337_v2 = vrot.slane %v336_v55, 4  ;;  %v668_v5 = vsel %vm2957_vm5, %v2208_v52, %v667_v53  ;;  %v400_v6 = vshrl.u32 %v286_v59, 16  ;;  %v403_v13 = vshll.u32 %v286_v59, 16  ;;  %v283_v22 = vld [vmem:[%s2910_s12 + $0x18] sm:$0xf]  ;;  %v2701_v31 = vld [vmem:[%s3520_s1 + $0xc8] sm:$0xff] }
  0x1c   : > { %v328_v8 = vsel %vm2948_vm4, %v323_v61, %v327_v54  ;;  %v672_v9 = vsel %vm2957_vm5, %v2209_v58, %v671_v63  ;;  %v2986_v15 = vunpack.c.l.b16 %v384_v1  ;;  %v414_v17 = vshrl.u32 %v287_v3, 16  ;;  %v3004_v32 = vld [vmem:[%s2910_s12 + $0x34] sm:$0x1]  ;;  %v3007_v36 = vld [vmem:[%s2910_s12 + $0x3c] sm:$0x1]  ;;  %v2688_v42 = vld [vmem:[%s3520_s1 + $0x80] sm:$0xff] }
  0x1d   : > { %2775 = vmatpush.bf16.msra.mxu1 %v2683_v29  ;;  %512 = vmatpush.bf16.msra.mxu0 %v2683_v29  ;;  %v342_v16 = vsel %vm2948_vm4, %v337_v2, %v341_v62  ;;  %v449_v18 = vunpack.c.l.b16 %v398_v4  ;;  %v714_v20 = vunpack.c.l.b16 %v668_v5  ;;  %v417_v21 = vshll.u32 %v287_v3, 16  ;;  %v2679_v29 = vld [vmem:[%s3520_s1 + $0x38] sm:$0xff]  ;;  %v3014_v43 = vld [vmem:[%s2910_s12 + $0x14] sm:$0x1]  ;;  %v2700_v58 = vld [vmem:[%s3520_s1 + $0xc0] sm:$0xff] }
  0x1e   : > { %782 = vmatpush.bf16.msra.mxu2 %v2691_v44  ;;  %v344_v23 = vshrl.u32 %v282_v7, 16  ;;  %v444_v25 = vunpack.c.l.b16 %v328_v8  ;;  %v715_v26 = vunpack.c.l.b16 %v672_v9  ;;  %v402_v27 = vrot.slane %v400_v6, 4  ;;  %v3017_v44 = vld [vmem:[%s2910_s12 + $0x1c] sm:$0x1]  ;;  %v2678_v52 = vld [vmem:[%s3520_s1 + $0x30] sm:$0xff] }
  0x1f   : > { %917 = vmatpush.bf16.msra.mxu3 %v2703_v56  ;;  %v347_v28 = vshll.u32 %v282_v7, 16  ;;  %v445_v30 = vunpack.c.l.b16 %v342_v16  ;;  %v405_v33 = vrot.slane %v403_v13, 5  ;;  %v416_v34 = vrot.slane %v414_v17, 4  ;;  %v2715_v45 = vld [vmem:[%s3520_s1 + $0x138] sm:$0xff]  ;;  %v2290_v63 = vld [vmem:[%s2910_s12 + $0x8] sm:$0xf] }
  0x20   : > { %v419_v35 = vrot.slane %v417_v21, 5  ;;  %v346_v37 = vrot.slane %v344_v23, 4  ;;  %v358_v39 = vshrl.u32 %v283_v22, 16  ;;  %v361_v40 = vshll.u32 %v283_v22, 16  ;;  %v2735_v48 = vld [vmem:[%s3520_s1 + $0x1b8] sm:$0xff]  ;;  %v2714_v1 = vld [vmem:[%s3520_s1 + $0x130] sm:$0xff] }
  0x21   : > { %2776 = vmatpush.bf16.msra.mxu1 %v2682_v60  ;;  %513 = vmatpush.bf16.msra.mxu0 %v2682_v60  ;;  %v349_v38 = vrot.slane %v347_v28, 5  ;;  %v454_v41 = vpack.c.b16 %v449_v18, %v2986_v15  ;;  %v722_v46 = vpack.c.b16 %v715_v26, %v714_v20  ;;  %v409_v47 = vshll.u32 %v3004_v32, 16  ;;  %v2743_v2 = vld [vmem:[%s3520_s1 + $0x1f8] sm:$0xff]  ;;  %v640_v4 = vld [vmem:[%s2910_s12 + $0x10] sm:$0xe]  ;;  %v2733_v26 = vld [vmem:[%s3520_s1 + $0x1a8] sm:$0xff] }
  0x22   : > { %783 = vmatpush.bf16.msra.mxu2 %v2690_v0  ;;  %v360_v50 = vrot.slane %v358_v39, 4  ;;  %v363_v51 = vrot.slane %v361_v40, 5  ;;  %v452_v53 = vpack.c.b16 %v445_v30, %v444_v25  ;;  %v406_v54 = vor.u32 %v405_v33, %v402_v27  ;;  %v2696_v0 = vld [vmem:[%s2910_s12 + $0xc] sm:$0xf0]  ;;  %v641_v5 = vld [vmem:[%s2910_s12 + $0x18] sm:$0xe] }
  0x23   : > { %918 = vmatpush.bf16.msra.mxu3 %v2702_v11  ;;  %v420_v55 = vor.u32 %v419_v35, %v416_v34  ;;  %v423_v56 = vshll.u32 %v3007_v36, 16  ;;  %v350_v59 = vor.u32 %v349_v38, %v346_v37  ;;  %v353_v60 = vshll.u32 %v3014_v43, 16  ;;  %v2734_v6 = vld [vmem:[%s3520_s1 + $0x1b0] sm:$0xff]  ;;  %v2336_v13 = vld [vmem:[%s2910_s12 + $0x8] sm:$0xf]  ;;  %v2676_v37 = vld [vmem:[%s3520_s1 + $0x20] sm:$0xff] }
  0x24   : > { %v364_v61 = vor.u32 %v363_v51, %v360_v50  ;;  %v367_v62 = vshll.u32 %v3017_v44, 16  ;;  %v411_v3 = vrot.slane %v409_v47, 5  ;;  %v407_v7 = vrot.slane %v406_v54, 4  ;;  %v2338_v18 = vld [vmem:[%s2910_s12 + $0x10] sm:$0xf]  ;;  %v2713_v25 = vld [vmem:[%s3520_s1 + $0x128] sm:$0xff] }
  0x25   : > { %2777 = vmatpush.bf16.msra.mxu1 %v2681_v14  ;;  %514 = vmatpush.bf16.msra.mxu0 %v2681_v14  ;;  %v421_v8 = vrot.slane %v420_v55, 4  ;;  %v425_v9 = vrot.slane %v423_v56, 5  ;;  %v2291_v11 = vor.u32 %v2696_v0, %v2290_v63  ;;  %v351_v14 = vrot.slane %v350_v59, 4  ;;  %v2741_v40 = vld [vmem:[%s3520_s1 + $0x1e8] sm:$0xff]  ;;  %v2675_v55 = vld [vmem:[%s3520_s1 + $0x18] sm:$0xff] }
  0x26   : > { %784 = vmatpush.bf16.msra.mxu2 %v2689_v19  ;;  %v355_v15 = vrot.slane %v353_v60, 5  ;;  %v365_v16 = vrot.slane %v364_v61, 4  ;;  %v369_v17 = vrot.slane %v367_v62, 5  ;;  %v2677_v19 = vld [vmem:[%s3520_s1 + $0x28] sm:$0xff]  ;;  %v2210_v20 = vrot.slane %v640_v4, 9 }
  0x27   : > { %919 = vmatpush.bf16.msra.mxu3 %v2701_v31  ;;  %v675_v21 = vrot.slane %v3014_v43, 5  ;;  %v2211_v22 = vrot.slane %v641_v5, 9  ;;  %v679_v23 = vrot.slane %v3017_v44, 5  ;;  %v412_v27 = vsel %vm2948_vm4, %v407_v7, %v411_v3  ;;  %v2712_v43 = vld [vmem:[%s3520_s1 + $0x120] sm:$0xff]  ;;  %v3089_v47 = vld [vmem:[%s2910_s12 + $0xc] sm:$0x1] }
  0x28   : > { %v426_v28 = vsel %vm2948_vm4, %v421_v8, %v425_v9  ;;  %v970_v30 = vshll.u32 %v2336_v13, 16  ;;  %v356_v31 = vsel %vm2948_vm4, %v351_v14, %v355_v15  ;;  %v370_v33 = vsel %vm2948_vm4, %v365_v16, %v369_v17  ;;  %v2732_v44 = vld [vmem:[%s3520_s1 + $0x1a0] sm:$0xff]  ;;  %v3095_v56 = vld [vmem:[%s2910_s12 + $0x14] sm:$0x1]  ;;  %v2294_v62 = vld [vmem:[%s2910_s12 + $0x18] sm:$0xf] }
  0x29   : > { %2778 = vmatpush.bf16.msra.mxu1 %v2680_v24  ;;  %515 = vmatpush.bf16.msra.mxu0 %v2680_v24  ;;  %v2742_v24 = vld [vmem:[%s3520_s1 + $0x1f0] sm:$0xff]  ;;  %v981_v34 = vshrl.u32 %v2338_v18, 16  ;;  %v984_v35 = vshll.u32 %v2338_v18, 16  ;;  %v676_v38 = vsel %vm2957_vm5, %v2210_v20, %v675_v21  ;;  %v680_v39 = vsel %vm2957_vm5, %v2211_v22, %v679_v23  ;;  %v2697_v63 = vld [vmem:[%s2910_s12 + $0x1c] sm:$0xf0]  ;;  %v2731_v17 = vld [vmem:[%s3520_s1 + $0x198] sm:$0xff] }
  0x2a   : > { %785 = vmatpush.bf16.msra.mxu2 %v2688_v42  ;;  %v451_v42 = vunpack.c.l.b16 %v426_v28  ;;  %v972_v50 = vrot.slane %v970_v30, 5  ;;  %v716_v51 = vunpack.c.l.b16 %v676_v38  ;;  %v976_v59 = vshll.u32 %v3089_v47, 16  ;;  %v643_v5 = vld [vmem:[%s2910_s12 + $0x28] sm:$0xe]  ;;  %v2710_v7 = vld [vmem:[%s3520_s1 + $0x110] sm:$0xff]  ;;  %v2740_v21 = vld [vmem:[%s3520_s1 + $0x1e0] sm:$0xff] }
  0x2b   : > { %920 = vmatpush.bf16.msra.mxu3 %v2700_v58  ;;  %v986_v54 = vrot.slane %v984_v35, 5  ;;  %v2711_v58 = vld [vmem:[%s3520_s1 + $0x118] sm:$0xff]  ;;  %v990_v4 = vshll.u32 %v3095_v56, 16  ;;  %v2295_v8 = vor.u32 %v2697_v63, %v2294_v62  ;;  %v683_v14 = vrot.slane %v2915_v10, 5  ;;  %v2673_v10 = vld [vmem:[%s3520_s1 + $0x8] sm:$0xff]  ;;  %v2730_v23 = vld [vmem:[%s3520_s1 + $0x190] sm:$0xff] }
  0x2c   : > { %526 = vmatmul.bf16.vlgmr.msra.gmra.mxu1 %v454_v41  ;;  %516 = vmatmul.bf16.vlgmr.msra.gmra.mxu0 %v452_v53  ;;  %v450_v41 = vunpack.c.l.b16 %v412_v27  ;;  %v983_v53 = vrot.slane %v981_v34, 4  ;;  %v978_v9 = vrot.slane %v976_v59, 5  ;;  %v2213_v15 = vrot.slane %v643_v5, 9  ;;  %v2340_v20 = vld [vmem:[%s2910_s12 + $0x18] sm:$0xf]  ;;  %v2672_v34 = vld [vmem:[%s3520_s1] sm:$0xff] }
  0x2d   : > { %609 = vmatpush.bf16.msrb.mxu1 %v2679_v29  ;;  %1159 = vmatpush.bf16.msrb.mxu0 %v2715_v45  ;;  %v967_v29 = vshrl.u32 %v2336_v13, 16  ;;  %v446_v45 = vunpack.c.l.b16 %v356_v31  ;;  %v687_v16 = vrot.slane %v2921_v12, 5  ;;  %v2342_v22 = vld [vmem:[%s2910_s12 + $0x20] sm:$0xf]  ;;  %v2709_v12 = vld [vmem:[%s3520_s1 + $0x108] sm:$0xff]  ;;  %v995_v28 = vshrl.u32 %v2340_v20, 16 }
  0x2e   : > { %1468 = vmatpush.bf16.msrb.mxu2 %v2735_v48  ;;  %921 = vmatmul.bf16.vlgmr.msra.gmra.mxu3 %v2291_v11  ;;  %v455_v60 = vpack.c.b16 %v451_v42, %v450_v41  ;;  %v987_v3 = vor.u32 %v986_v54, %v983_v53  ;;  %v998_v30 = vshll.u32 %v2340_v20, 16  ;;  %v1009_v31 = vshrl.u32 %v2342_v22, 16  ;;  %v2162_v35 = vld [vmem:[%s2910_s12] sm:$0xf]  ;;  %v2722_v53 = vld [vmem:[%s3520_s1 + $0x170] sm:$0xff] }
  0x2f   : > { %786 = vmatmul.bf16.vlgmr.msra.gmra.mxu2 %v722_v46  ;;  %1714 = vmatpush.bf16.msrb.mxu3 %v2743_v2  ;;  %v447_v46 = vunpack.c.l.b16 %v370_v33  ;;  %v969_v48 = vrot.slane %v967_v29, 4  ;;  %v688_v27 = vsel %vm2957_vm5, %v2213_v15, %v687_v16  ;;  %v1012_v33 = vshll.u32 %v2342_v22, 16  ;;  %v2708_v38 = vld [vmem:[%s3520_s1 + $0x100] sm:$0xff]  ;;  %v2698_v62 = vld [vmem:[%s2910_s12 + $0x2c] sm:$0xf0] }
  0x30   : > { %v988_v18 = vrot.slane %v987_v3, 4  ;;  %v2344_v3 = vld [vmem:[%s2910_s12 + $0x28] sm:$0xf]  ;;  %v645_v5 = vld [vmem:[%s2910_s12 + $0x38] sm:$0xe]  ;;  %v691_v20 = vrot.slane %v3004_v32, 5 }
  0x31   : > { %610 = vmatpush.bf16.msrb.mxu1 %v2678_v52  ;;  %1160 = vmatpush.bf16.msrb.mxu0 %v2714_v1  ;;  %v717_v52 = vunpack.c.l.b16 %v680_v39  ;;  %v453_v61 = vpack.c.b16 %v447_v46, %v446_v45  ;;  %v973_v0 = vor.u32 %v972_v50, %v969_v48  ;;  %v642_v1 = vld [vmem:[%s2910_s12 + $0x20] sm:$0xe]  ;;  %v2668_v39 = vld [vmem:[%s2910_s12 + $0x4] sm:$0xf0]  ;;  %v3159_v45 = vld [vmem:[%s3520_s1 + $0x238] sm:$0xff]  ;;  %v997_v48 = vrot.slane %v995_v28, 4 }
  0x32   : > { %1469 = vmatpush.bf16.msrb.mxu2 %v2734_v6  ;;  %v2674_v6 = vld [vmem:[%s3520_s1 + $0x10] sm:$0xff]  ;;  %v2212_v11 = vrot.slane %v642_v1, 9  ;;  %v3162_v46 = vld [vmem:[%s2910_s12 + $0x24] sm:$0x1]  ;;  %v1000_v50 = vrot.slane %v998_v30, 5  ;;  %v2163_v54 = vor.u32 %v2668_v39, %v2162_v35  ;;  %v1023_v15 = vshrl.u32 %v2344_v3, 16 }
  0x33   : > { %1715 = vmatpush.bf16.msrb.mxu3 %v2742_v24  ;;  %v723_v2 = vpack.c.b16 %v717_v52, %v716_v51  ;;  %v974_v13 = vrot.slane %v973_v0, 4  ;;  %v2739_v24 = vld [vmem:[%s3520_s1 + $0x1d8] sm:$0xff]  ;;  %v1011_v51 = vrot.slane %v1009_v31, 4  ;;  %v1014_v52 = vrot.slane %v1012_v33, 5  ;;  %v3175_v1 = vld [vmem:[%s3520_s1 + $0x230] sm:$0xff]  ;;  %v2728_v22 = vld [vmem:[%s3520_s1 + $0x180] sm:$0xff] }
  0x34   : > { %v1018_v59 = vshll.u32 %v3162_v46, 16  ;;  %v1001_v63 = vor.u32 %v1000_v50, %v997_v48  ;;  %v1026_v16 = vshll.u32 %v2344_v3, 16  ;;  %v2737_v32 = vld [vmem:[%s3520_s1 + $0x1c8] sm:$0xff]  ;;  %v3215_v28 = vld [vmem:[%s3520_s1 + $0x220] sm:$0xff]  ;;  %v2719_v31 = vld [vmem:[%s3520_s1 + $0x158] sm:$0xff] }
  0x35   : > { %611 = vmatpush.bf16.msrb.mxu1 %v2677_v19  ;;  %1161 = vmatpush.bf16.msrb.mxu0 %v2713_v25  ;;  %v992_v19 = vrot.slane %v990_v4, 5  ;;  %v979_v25 = vsel %vm2948_vm4, %v974_v13, %v978_v9  ;;  %v1015_v0 = vor.u32 %v1014_v52, %v1011_v51  ;;  %v644_v4 = vld [vmem:[%s2910_s12 + $0x30] sm:$0xe]  ;;  %v3225_v33 = vld [vmem:[%s2910_s12 + $0x2c] sm:$0x1] }
  0x36   : > { %1470 = vmatpush.bf16.msrb.mxu2 %v2733_v26  ;;  %v684_v26 = vsel %vm2957_vm5, %v2212_v11, %v683_v14  ;;  %v1020_v9 = vrot.slane %v1018_v59, 5  ;;  %v2346_v11 = vld [vmem:[%s2910_s12 + $0x30] sm:$0xf]  ;;  %v1002_v13 = vrot.slane %v1001_v63, 4  ;;  %v3228_v39 = vld [vmem:[%s2910_s12 + $0x34] sm:$0x1] }
  0x37   : > { %1716 = vmatpush.bf16.msrb.mxu3 %v2741_v40  ;;  %v993_v29 = vsel %vm2948_vm4, %v988_v18, %v992_v19  ;;  %v1095_v40 = vunpack.c.l.b16 %v979_v25  ;;  %v718_v42 = vunpack.c.l.b16 %v684_v26  ;;  %v1016_v14 = vrot.slane %v1015_v0, 4  ;;  %v3194_v18 = vld [vmem:[%s3520_s1 + $0x228] sm:$0xff]  ;;  %v2538_v51 = vld [vmem:[%s2910_s12 + $0x18] sm:$0xf]  ;;  %v2699_v63 = vld [vmem:[%s2910_s12 + $0x3c] sm:$0xf0] }
  0x38   : > { %v1096_v41 = vunpack.c.l.b16 %v993_v29  ;;  %v2214_v19 = vrot.slane %v644_v4, 9  ;;  %v1025_v26 = vrot.slane %v1023_v15, 4  ;;  %v1032_v52 = vshll.u32 %v3225_v33, 16  ;;  %v2348_v0 = vld [vmem:[%s2910_s12 + $0x38] sm:$0xf] }
  0x39   : > { %612 = vmatpush.bf16.msrb.mxu1 %v2676_v37  ;;  %1162 = vmatpush.bf16.msrb.mxu0 %v2712_v43  ;;  %v2723_v37 = vld [vmem:[%s3520_s1 + $0x178] sm:$0xff]  ;;  %v719_v43 = vunpack.c.l.b16 %v688_v27  ;;  %v1021_v25 = vsel %vm2948_vm4, %v1016_v14, %v1020_v9  ;;  %v1028_v27 = vrot.slane %v1026_v16, 5  ;;  %v1046_v59 = vshll.u32 %v3228_v39, 16  ;;  %v2350_v16 = vld [vmem:[%s2910_s12 + $0x40] sm:$0xf] }
  0x3a   : > { %1471 = vmatpush.bf16.msrb.mxu2 %v2732_v44  ;;  %v3154_v44 = vld [vmem:[%s2910_s12 + $0x1c] sm:$0x1]  ;;  %v692_v29 = vsel %vm2957_vm5, %v2214_v19, %v691_v20  ;;  %v2736_v19 = vld [vmem:[%s3520_s1 + $0x1c0] sm:$0xff]  ;;  %v1054_v20 = vshll.u32 %v2348_v0, 16 }
  0x3b   : > { %1717 = vmatpush.bf16.msrb.mxu3 %v2740_v21  ;;  %v2215_v21 = vrot.slane %v645_v5, 9  ;;  %v1029_v50 = vor.u32 %v1028_v27, %v1025_v26  ;;  %v3246_v5 = vld [vmem:[%s2910_s12 + $0x14] sm:$0x1]  ;;  %v1048_v15 = vrot.slane %v1046_v59, 5 }
  0x3c   : > { %531 = vmatmul.bf16.gmra.mxu1 %v455_v60  ;;  %521 = vmatmul.bf16.gmra.mxu0 %v453_v61  ;;  %v724_v60 = vpack.c.b16 %v719_v43, %v718_v42  ;;  %v2298_v61 = vld [vmem:[%s2910_s12 + $0x28] sm:$0xf]  ;;  %v2669_v42 = vld [vmem:[%s2910_s12 + $0x14] sm:$0xf0]  ;;  %v720_v43 = vunpack.c.l.b16 %v692_v29  ;;  %v3268_v27 = vld [vmem:[%s3520_s1 + $0x210] sm:$0xff] }
  0x3d   : > { %613 = vmatpush.bf16.msrb.mxu1 %v2675_v55  ;;  %1163 = vmatpush.bf16.msrb.mxu0 %v2711_v58  ;;  %v1103_v55 = vpack.c.b16 %v1096_v41, %v1095_v40  ;;  %v1004_v58 = vshll.u32 %v3154_v44, 16  ;;  %v2536_v40 = vld [vmem:[%s2910_s12 + $0x10] sm:$0xf]  ;;  %v1030_v4 = vrot.slane %v1029_v50, 4  ;;  %v2400_v29 = vld [vmem:[%s2910_s12 + $0x8] sm:$0xe] }
  0x3e   : > { %1472 = vmatpush.bf16.msrb.mxu2 %v2731_v17  ;;  %926 = vmatmul.bf16.gmra.mxu3 %v2295_v8  ;;  %v2738_v17 = vld [vmem:[%s3520_s1 + $0x1d0] sm:$0xff] }
  0x3f   : > { %791 = vmatmul.bf16.gmra.mxu2 %v723_v2  ;;  %1718 = vmatpush.bf16.msrb.mxu3 %v2739_v24  ;;  %v2721_v2 = vld [vmem:[%s3520_s1 + $0x168] sm:$0xff]  ;;  %v1006_v8 = vrot.slane %v1004_v58, 5  ;;  %v1040_v24 = vshll.u32 %v2346_v11, 16  ;;  %v2166_v41 = vld [vmem:[%s2910_s12 + $0x10] sm:$0xf] }
  0x41   : > { %614 = vmatpush.bf16.msrb.mxu1 %v2674_v6  ;;  %1164 = vmatpush.bf16.msrb.mxu0 %v2710_v7  ;;  %v2729_v6 = vld [vmem:[%s3520_s1 + $0x188] sm:$0xff]  ;;  %v2299_v7 = vor.u32 %v2698_v62, %v2298_v61  ;;  %v1042_v35 = vrot.slane %v1040_v24, 5  ;;  %v2167_v61 = vor.u32 %v2669_v42, %v2166_v41  ;;  %v3281_v42 = vld [vmem:[%s2910_s12 + $0x3c] sm:$0x1] }
  0x42   : > { %1473 = vmatpush.bf16.msrb.mxu2 %v2730_v23  ;;  %v1037_v23 = vshrl.u32 %v2346_v11, 16 }
  0x43   : > { %1719 = vmatpush.bf16.msrb.mxu3 %v2738_v17  ;;  %v1051_v17 = vshrl.u32 %v2348_v0, 16 }
  0x45   : > { %615 = vmatpush.bf16.msrb.mxu1 %v2673_v10  ;;  %1165 = vmatpush.bf16.msrb.mxu0 %v2709_v12  ;;  %v695_v10 = vrot.slane %v3007_v36, 5  ;;  %v2720_v12 = vld [vmem:[%s3520_s1 + $0x160] sm:$0xff]  ;;  %v1007_v36 = vsel %vm2948_vm4, %v1002_v13, %v1006_v8 }
  0x46   : > { %1474 = vmatpush.bf16.msrb.mxu2 %v2729_v6  ;;  %v1034_v6 = vrot.slane %v1032_v52, 5 }
  0x47   : > { %v696_v30 = vsel %vm2957_vm5, %v2215_v21, %v695_v10  ;;  %1720 = vmatpush.bf16.msrb.mxu3 %v2737_v32  ;;  %v1531_v10 = vshll.u32 %v3246_v5, 16  ;;  %v1226_v32 = vrot.slane %v3095_v56, 5  ;;  %v1053_v56 = vrot.slane %v1051_v17, 4 }
  0x48   : > { %v721_v48 = vunpack.c.l.b16 %v696_v30 }
  0x49   : > { %616 = vmatpush.bf16.msrb.mxu1 %v2672_v34  ;;  %1166 = vmatpush.bf16.msrb.mxu0 %v2708_v38  ;;  %v1039_v34 = vrot.slane %v1037_v23, 4  ;;  %v1098_v38 = vunpack.c.l.b16 %v1021_v25  ;;  %v1222_v23 = vrot.slane %v3089_v47, 5  ;;  %v1068_v25 = vshll.u32 %v2350_v16, 16 }
  0x4a   : > { %1475 = vmatpush.bf16.msrb.mxu2 %v2728_v22  ;;  %v725_v3 = vpack.c.b16 %v721_v48, %v720_v43  ;;  %v1035_v47 = vsel %vm2948_vm4, %v1030_v4, %v1034_v6  ;;  %v2490_v4 = vld [vmem:[%s2910_s12 + $0x10] sm:$0xf] }
  0x4b   : > { %v1043_v58 = vor.u32 %v1042_v35, %v1039_v34  ;;  %1721 = vmatpush.bf16.msrb.mxu3 %v2736_v19  ;;  %v2401_v34 = vld [vmem:[%s2910_s12 + $0x10] sm:$0xe]  ;;  %v2408_v35 = vrot.slane %v2400_v29, 9  ;;  %v1070_v52 = vrot.slane %v1068_v25, 5 }
  0x4c   : > { %617 = vmatmul.bf16.vlgmr.msrb.gmra.mxu1 %v2163_v54  ;;  %1167 = vmatmul.bf16.vlgmr.msrb.gmra.mxu0 %v1103_v55  ;;  %v1525_v54 = vshll.u32 %v2536_v40, 16  ;;  %v1536_v55 = vshrl.u32 %v2538_v51, 16  ;;  %v2409_v41 = vrot.slane %v2401_v34, 9  ;;  %v2744_v34 = vld [vmem:[%s3520_s1 + $0x200] sm:$0xff] }
  0x4d   : > { %1333 = vmatpush.bf16.msra.mxu1 %v2723_v37  ;;  %1888 = vmatpush.bf16.msra.mxu0 %v3159_v45  ;;  %v1097_v37 = vunpack.c.l.b16 %v1007_v36  ;;  %v1044_v14 = vrot.slane %v1043_v58, 4  ;;  %v1065_v36 = vshrl.u32 %v2350_v16, 16  ;;  %v1223_v50 = vsel %vm2957_vm5, %v2408_v35, %v1222_v23  ;;  %v3313_v23 = vld [vmem:[%s2910_s12 + $0x2c] sm:$0x1] }
  0x4e   : > { %931 = vmatmul.bf16.gmra.mxu3 %v2299_v7  ;;  %2779 = vmatpush.bf16.msra.mxu2 %v3159_v45  ;;  %v2302_v45 = vld [vmem:[%s2910_s12 + $0x38] sm:$0xf]  ;;  %v3249_v7 = vld [vmem:[%s2910_s12 + $0x1c] sm:$0x1]  ;;  %v1527_v9 = vrot.slane %v1525_v54, 5  ;;  %v1538_v11 = vrot.slane %v1536_v55, 4  ;;  %v1269_v54 = vunpack.c.l.b16 %v1223_v50  ;;  %v1099_v58 = vunpack.c.l.b16 %v1035_v47 }
  0x4f   : > { %796 = vmatmul.bf16.gmra.mxu2 %v724_v60  ;;  %v2718_v60 = vld [vmem:[%s3520_s1 + $0x150] sm:$0xff]  ;;  %v1104_v62 = vpack.c.b16 %v1098_v38, %v1097_v37  ;;  %v2303_v13 = vor.u32 %v2699_v63, %v2302_v45  ;;  %v1545_v24 = vshll.u32 %v3249_v7, 16  ;;  %v1049_v30 = vsel %vm2948_vm4, %v1044_v14, %v1048_v15  ;;  %v2170_v55 = vld [vmem:[%s2910_s12 + $0x20] sm:$0xf]  ;;  %v2670_v45 = vld [vmem:[%s2910_s12 + $0x24] sm:$0xf0] }
  0x50   : > { %v1056_v37 = vrot.slane %v1054_v20, 5  ;;  %v1100_v59 = vunpack.c.l.b16 %v1049_v30  ;;  %v1060_v63 = vshll.u32 %v3281_v42, 16  ;;  %v2171_v17 = vor.u32 %v2670_v45, %v2170_v55  ;;  %v2174_v55 = vld [vmem:[%s2910_s12 + $0x30] sm:$0xf] }
  0x51   : > { %1334 = vmatpush.bf16.msra.mxu1 %v2722_v53  ;;  %1889 = vmatpush.bf16.msra.mxu0 %v3175_v1  ;;  %v1522_v53 = vshrl.u32 %v2536_v40, 16  ;;  %v1533_v40 = vrot.slane %v1531_v10, 5  ;;  %v1547_v48 = vrot.slane %v1545_v24, 5 }
  0x52   : > { %2780 = vmatpush.bf16.msra.mxu2 %v3175_v1  ;;  %v2717_v1 = vld [vmem:[%s3520_s1 + $0x148] sm:$0xff] }
  0x53   : > { %v1524_v8 = vrot.slane %v1522_v53, 4  ;;  %v1227_v53 = vsel %vm2957_vm5, %v2409_v41, %v1226_v32 }
  0x55   : > { %1335 = vmatpush.bf16.msra.mxu1 %v2721_v2  ;;  %1890 = vmatpush.bf16.msra.mxu0 %v3194_v18  ;;  %v1539_v2 = vshll.u32 %v2538_v51, 16  ;;  %v1528_v21 = vor.u32 %v1527_v9, %v1524_v8  ;;  %v1067_v51 = vrot.slane %v1065_v36, 4 }
  0x56   : > { %2781 = vmatpush.bf16.msra.mxu2 %v3194_v18  ;;  %v2745_v18 = vld [vmem:[%s3520_s1 + $0x208] sm:$0xff] }
  0x57   : > { %v1541_v22 = vrot.slane %v1539_v2, 5  ;;  %v1529_v38 = vrot.slane %v1528_v21, 4  ;;  %v2540_v2 = vld [vmem:[%s2910_s12 + $0x20] sm:$0xf] }
  0x58   : > { %v1550_v9 = vshrl.u32 %v2540_v2, 16 }
  0x59   : > { %1336 = vmatpush.bf16.msra.mxu1 %v2720_v12  ;;  %1891 = vmatpush.bf16.msra.mxu0 %v3215_v28  ;;  %v2747_v12 = vld [vmem:[%s3520_s1 + $0x218] sm:$0xff]  ;;  %v1542_v26 = vor.u32 %v1541_v22, %v1538_v11  ;;  %v1534_v0 = vsel %vm2948_vm4, %v1529_v38, %v1533_v40  ;;  %v1553_v11 = vshll.u32 %v2540_v2, 16  ;;  %v3310_v22 = vld [vmem:[%s2910_s12 + $0x24] sm:$0x1]  ;;  %v2403_v38 = vld [vmem:[%s2910_s12 + $0x20] sm:$0xe] }
  0x5a   : > { %2782 = vmatpush.bf16.msra.mxu2 %v3215_v28  ;;  %v1071_v28 = vor.u32 %v1070_v52, %v1067_v51  ;;  %v1552_v19 = vrot.slane %v1550_v9, 4  ;;  %v1650_v21 = vunpack.c.l.b16 %v1534_v0  ;;  %v1230_v52 = vrot.slane %v3154_v44, 5 }
  0x5b   : > { %v1543_v43 = vrot.slane %v1542_v26, 4  ;;  %v1555_v20 = vrot.slane %v1553_v11, 5  ;;  %v1062_v26 = vrot.slane %v1060_v63, 5  ;;  %v2600_v63 = vld [vmem:[%s2910_s12 + $0x10] sm:$0xe] }
  0x5c   : > { %622 = vmatmul.bf16.gmra.mxu1 %v2167_v61  ;;  %1172 = vmatmul.bf16.gmra.mxu0 %v1104_v62  ;;  %v1270_v61 = vunpack.c.l.b16 %v1227_v53  ;;  %v1057_v62 = vor.u32 %v1056_v37, %v1053_v56  ;;  %v1072_v29 = vrot.slane %v1071_v28, 4  ;;  %v1559_v56 = vshll.u32 %v3310_v22, 16  ;;  %v2402_v37 = vld [vmem:[%s2910_s12 + $0x18] sm:$0xe] }
  0x5d   : > { %1337 = vmatpush.bf16.msra.mxu1 %v2719_v31  ;;  %1892 = vmatpush.bf16.msra.mxu0 %v2747_v12  ;;  %v2716_v31 = vld [vmem:[%s3520_s1 + $0x140] sm:$0xff]  ;;  %v1548_v6 = vsel %vm2948_vm4, %v1543_v43, %v1547_v48  ;;  %v1556_v30 = vor.u32 %v1555_v20, %v1552_v19  ;;  %v2410_v50 = vrot.slane %v2402_v37, 9  ;;  %v2411_v53 = vrot.slane %v2403_v38, 9 }
  0x5e   : > { %936 = vmatmul.bf16.gmra.mxu3 %v2303_v13  ;;  %v3305_v8 = vpack.c.b16 %v1270_v61, %v1269_v54  ;;  %v2724_v13 = vld [vmem:[%s2910_s12 + $0x14] sm:$0xf0]  ;;  %2783 = vmatpush.bf16.msra.mxu2 %v2747_v12  ;;  %v1651_v10 = vunpack.c.l.b16 %v1548_v6  ;;  %v1058_v25 = vrot.slane %v1057_v62, 4  ;;  %v1573_v12 = vshll.u32 %v3313_v23, 16 }
  0x5f   : > { %801 = vmatmul.bf16.gmra.mxu2 %v725_v3  ;;  %v2542_v3 = vld [vmem:[%s2910_s12 + $0x28] sm:$0xf]  ;;  %v2491_v36 = vor.u32 %v2724_v13, %v2490_v4  ;;  %v1561_v43 = vrot.slane %v1559_v56, 5  ;;  %v1234_v54 = vrot.slane %v3162_v46, 5  ;;  %v1777_v62 = vrot.slane %v3246_v5, 5 }
  0x60   : > { %v1564_v15 = vshrl.u32 %v2542_v3, 16  ;;  %v1567_v16 = vshll.u32 %v2542_v3, 16  ;;  %v1063_v40 = vsel %vm2948_vm4, %v1058_v25, %v1062_v26  ;;  %v1575_v48 = vrot.slane %v1573_v12, 5  ;;  %v2601_v3 = vld [vmem:[%s2910_s12 + $0x18] sm:$0xe] }
  0x61   : > { %1338 = vmatpush.bf16.msra.mxu1 %v2718_v60  ;;  %1893 = vmatpush.bf16.msra.mxu0 %v3268_v27  ;;  %v3294_v60 = vld [vmem:[%s2910_s12 + $0x44] sm:$0x1]  ;;  %v1101_v45 = vunpack.c.l.b16 %v1063_v40  ;;  %v1235_v61 = vsel %vm2957_vm5, %v2411_v53, %v1234_v54  ;;  %v2544_v4 = vld [vmem:[%s2910_s12 + $0x30] sm:$0xf]  ;;  %v2546_v6 = vld [vmem:[%s2910_s12 + $0x38] sm:$0xf] }
  0x62   : > { %v1074_v14 = vshll.u32 %v3294_v60, 16  ;;  %v1566_v24 = vrot.slane %v1564_v15, 4  ;;  %v1569_v32 = vrot.slane %v1567_v16, 5  ;;  %2784 = vmatpush.bf16.msra.mxu2 %v3268_v27  ;;  %v1557_v27 = vrot.slane %v1556_v30, 4  ;;  %v2494_v16 = vld [vmem:[%s2910_s12 + $0x20] sm:$0xf] }
  0x63   : > { %v1272_v0 = vunpack.c.l.b16 %v1235_v61  ;;  %v1578_v11 = vshrl.u32 %v2544_v4, 16  ;;  %v1581_v13 = vshll.u32 %v2544_v4, 16  ;;  %v1592_v5 = vshrl.u32 %v2546_v6, 16  ;;  %v2404_v53 = vld [vmem:[%s2910_s12 + $0x28] sm:$0xe] }
  0x64   : > { %v1076_v47 = vrot.slane %v1074_v14, 5  ;;  %v1570_v35 = vor.u32 %v1569_v32, %v1566_v24  ;;  %v1562_v46 = vsel %vm2948_vm4, %v1557_v27, %v1561_v43  ;;  %v1781_v15 = vrot.slane %v3249_v7, 5  ;;  %v2405_v54 = vld [vmem:[%s2910_s12 + $0x30] sm:$0xe]  ;;  %v2602_v4 = vld [vmem:[%s2910_s12 + $0x20] sm:$0xe] }
  0x65   : > { %1339 = vmatpush.bf16.msra.mxu1 %v2717_v1  ;;  %1894 = vmatpush.bf16.msra.mxu0 %v2745_v18  ;;  %v1105_v1 = vpack.c.b16 %v1100_v59, %v1099_v58  ;;  %v1231_v59 = vsel %vm2957_vm5, %v2410_v50, %v1230_v52  ;;  %v1652_v19 = vunpack.c.l.b16 %v1562_v46  ;;  %v1580_v24 = vrot.slane %v1578_v11, 4  ;;  %v2498_v50 = vld [vmem:[%s2910_s12 + $0x30] sm:$0xf]  ;;  %v2603_v11 = vld [vmem:[%s2910_s12 + $0x28] sm:$0xe] }
  0x66   : > { %v1077_v41 = vsel %vm2948_vm4, %v1072_v29, %v1076_v47  ;;  %2785 = vmatpush.bf16.msra.mxu2 %v2745_v18  ;;  %v1571_v51 = vrot.slane %v1570_v35, 4  ;;  %v2671_v18 = vld [vmem:[%s2910_s12 + $0x34] sm:$0xf0]  ;;  %v1271_v44 = vunpack.c.l.b16 %v1231_v59  ;;  %v1583_v32 = vrot.slane %v1581_v13, 5  ;;  %v3350_v29 = vld [vmem:[%s2910_s12 + $0x34] sm:$0x1] }
  0x67   : > { %v1102_v58 = vunpack.c.l.b16 %v1077_v41  ;;  %v2175_v28 = vor.u32 %v2671_v18, %v2174_v55  ;;  %v3353_v47 = vld [vmem:[%s2910_s12 + $0x3c] sm:$0x1]  ;;  %v2548_v55 = vld [vmem:[%s2910_s12 + $0x40] sm:$0xf]  ;;  %v2413_v59 = vrot.slane %v2405_v54, 9  ;;  %v1242_v61 = vrot.slane %v3228_v39, 5 }
  0x68   : > { %v1576_v2 = vsel %vm2948_vm4, %v1571_v51, %v1575_v48  ;;  %v3344_v9 = vpack.c.b16 %v1272_v0, %v1271_v44  ;;  %v1584_v12 = vor.u32 %v1583_v32, %v1580_v24  ;;  %v1601_v35 = vshll.u32 %v3353_v47, 16  ;;  %v2550_v18 = vld [vmem:[%s2910_s12 + $0x48] sm:$0xf] }
  0x69   : > { %1340 = vmatpush.bf16.msra.mxu1 %v2716_v31  ;;  %v1658_v31 = vpack.c.b16 %v1651_v10, %v1650_v21  ;;  %1895 = vmatpush.bf16.msra.mxu0 %v2744_v34  ;;  %v1106_v14 = vpack.c.b16 %v1102_v58, %v1101_v45  ;;  %v1653_v20 = vunpack.c.l.b16 %v1576_v2  ;;  %v2608_v21 = vrot.slane %v2600_v63, 9 }
  0x6a   : > { %2786 = vmatpush.bf16.msra.mxu2 %v2744_v34  ;;  %v2609_v10 = vrot.slane %v2601_v3, 9  ;;  %v1585_v40 = vrot.slane %v1584_v12, 4  ;;  %v1603_v43 = vrot.slane %v1601_v35, 5  ;;  %v2412_v45 = vrot.slane %v2404_v53, 9 }
  0x6b   : > { %v1659_v30 = vpack.c.b16 %v1653_v20, %v1652_v19  ;;  %v1778_v7 = vsel %vm2957_vm5, %v2608_v21, %v1777_v62  ;;  %v1238_v58 = vrot.slane %v3225_v33, 5  ;;  %v2726_v62 = vld [vmem:[%s2910_s12 + $0x34] sm:$0xf0]  ;;  %v1606_v63 = vshrl.u32 %v2548_v55, 16 }
  0x6c   : > { %627 = vmatmul.bf16.gmra.mxu1 %v2171_v17  ;;  %1177 = vmatmul.bf16.gmra.mxu0 %v1105_v1  ;;  %v2725_v17 = vld [vmem:[%s2910_s12 + $0x24] sm:$0xf0]  ;;  %v1595_v1 = vshll.u32 %v2546_v6, 16  ;;  %v1782_v56 = vsel %vm2957_vm5, %v2609_v10, %v1781_v15  ;;  %v1824_v37 = vunpack.c.l.b16 %v1778_v7  ;;  %v1609_v44 = vshll.u32 %v2548_v55, 16  ;;  %v3380_v15 = vld [vmem:[%s2910_s12 + $0x44] sm:$0x1] }
  0x6d   : > { %v2495_v26 = vor.u32 %v2725_v17, %v2494_v16  ;;  %v1825_v38 = vunpack.c.l.b16 %v1782_v56  ;;  %v1620_v0 = vshrl.u32 %v2550_v18, 16  ;;  %v1623_v46 = vshll.u32 %v2550_v18, 16  ;;  %v3383_v16 = vld [vmem:[%s2910_s12 + $0x4c] sm:$0x1] }
  0x6e   : > { %1722 = vmatmul.bf16.vlgmr.msrb.gmra.mxu3 %v1658_v31  ;;  %v1597_v25 = vrot.slane %v1595_v1, 5  ;;  %v1587_v31 = vshll.u32 %v3350_v29, 16  ;;  %v1239_v6 = vsel %vm2957_vm5, %v2412_v45, %v1238_v58  ;;  %v1243_v33 = vsel %vm2957_vm5, %v2413_v59, %v1242_v61  ;;  %v2605_v61 = vld [vmem:[%s2910_s12 + $0x38] sm:$0xe] }
  0x6f   : > { %1476 = vmatmul.bf16.vlgmr.msrb.gmra.mxu2 %v2491_v36  ;;  %v1594_v36 = vrot.slane %v1592_v5, 4  ;;  %v1832_v48 = vpack.c.b16 %v1825_v38, %v1824_v37  ;;  %v1273_v13 = vunpack.c.l.b16 %v1239_v6  ;;  %v1274_v39 = vunpack.c.l.b16 %v1243_v33  ;;  %v2406_v38 = vld [vmem:[%s2910_s12 + $0x38] sm:$0xe] }
  0x70   : > { %v1589_v41 = vrot.slane %v1587_v31, 5  ;;  %v1608_v5 = vrot.slane %v1606_v63, 4  ;;  %v1622_v17 = vrot.slane %v1620_v0, 4  ;;  %v1625_v1 = vrot.slane %v1623_v46, 5  ;;  %v2607_v63 = vld [vmem:[%s2910_s12 + $0x48] sm:$0xe] }
  0x71   : > { %v1598_v34 = vor.u32 %v1597_v25, %v1594_v36  ;;  %v2610_v19 = vrot.slane %v2602_v4, 9  ;;  %v3385_v20 = vpack.c.b16 %v1274_v39, %v1273_v13  ;;  %v1785_v10 = vrot.slane %v3310_v22, 5 }
  0x72   : > { %v1590_v51 = vsel %vm2948_vm4, %v1585_v40, %v1589_v41  ;;  %v2611_v24 = vrot.slane %v2603_v11, 9  ;;  %v1789_v32 = vrot.slane %v3313_v23, 5  ;;  %v1615_v25 = vshll.u32 %v3380_v15, 16  ;;  %v2407_v40 = vld [vmem:[%s2910_s12 + $0x40] sm:$0xe] }
  0x73   : > { %v1599_v27 = vrot.slane %v1598_v34, 4  ;;  %v1654_v2 = vunpack.c.l.b16 %v1590_v51  ;;  %v1786_v7 = vsel %vm2957_vm5, %v2610_v19, %v1785_v10  ;;  %v2414_v41 = vrot.slane %v2406_v38, 9  ;;  %v2727_v51 = vld [vmem:[%s2910_s12 + $0x44] sm:$0xf0] }
  0x74   : > { %v1790_v22 = vsel %vm2957_vm5, %v2611_v24, %v1789_v32  ;;  %v1617_v23 = vrot.slane %v1615_v25, 5  ;;  %v1826_v31 = vunpack.c.l.b16 %v1786_v7  ;;  %v1793_v0 = vrot.slane %v3350_v29, 5 }
  0x75   : > { %v1604_v52 = vsel %vm2948_vm4, %v1599_v27, %v1603_v43  ;;  %v1827_v34 = vunpack.c.l.b16 %v1790_v22  ;;  %v1246_v27 = vrot.slane %v3281_v42, 5  ;;  %v2415_v43 = vrot.slane %v2407_v40, 9  ;;  %v2604_v42 = vld [vmem:[%s2910_s12 + $0x30] sm:$0xe] }
  0x76   : > { %v1655_v3 = vunpack.c.l.b16 %v1604_v52  ;;  %v2613_v46 = vrot.slane %v2605_v61, 9  ;;  %v1805_v4 = vrot.slane %v3383_v16, 5  ;;  %v2615_v33 = vrot.slane %v2607_v63, 9 }
  0x77   : > { %v1833_v52 = vpack.c.b16 %v1827_v34, %v1826_v31  ;;  %v1247_v53 = vsel %vm2957_vm5, %v2414_v41, %v1246_v27 }
  0x78   : > { %v1660_v21 = vpack.c.b16 %v1655_v3, %v1654_v2  ;;  %v1275_v45 = vunpack.c.l.b16 %v1247_v53  ;;  %v1797_v2 = vrot.slane %v3353_v47, 5  ;;  %v1801_v3 = vrot.slane %v3380_v15, 5 }
  0x79   : > { %v1806_v29 = vsel %vm2957_vm5, %v2615_v33, %v1805_v4 }
  0x7c   : > { %632 = vmatmul.bf16.gmra.mxu1 %v2175_v28  ;;  %1182 = vmatmul.bf16.gmra.mxu0 %v1106_v14  ;;  %v1611_v28 = vrot.slane %v1609_v44, 5  ;;  %v2499_v14 = vor.u32 %v2726_v62, %v2498_v50  ;;  %v2502_v50 = vld [vmem:[%s2910_s12 + $0x40] sm:$0xf]  ;;  %v2612_v44 = vrot.slane %v2604_v42, 9 }
  0x7d   : > { %v2503_v59 = vor.u32 %v2727_v51, %v2502_v50  ;;  %v2606_v62 = vld [vmem:[%s2910_s12 + $0x40] sm:$0xe]  ;;  %s2666_s12 = sshll.u32 %s3533_s15, 5 }
  0x7e   : > { %1727 = vmatmul.bf16.gmra.mxu3 %v1659_v30  ;;  %v1612_v36 = vor.u32 %v1611_v28, %v1608_v5  ;;  %v1629_v30 = vshll.u32 %v3383_v16, 16  ;;  %v2614_v6 = vrot.slane %v2606_v62, 9  ;;  %v1794_v11 = vsel %vm2957_vm5, %v2612_v44, %v1793_v0  ;;  %s3462_s21 = scalar_lea.vmem %s3522_s3, %s2666_s12 }
  0x7f   : > { %1481 = vmatmul.bf16.gmra.mxu2 %v2495_v26  ;;  %v1626_v26 = vor.u32 %v1625_v1, %v1622_v17  ;;  %v1828_v47 = vunpack.c.l.b16 %v1794_v11  ;;  %v1831_v28 = vunpack.c.l.b16 %v1806_v29 }
  0x80   : > { %v1631_v12 = vrot.slane %v1629_v30, 5  ;;  %v1802_v13 = vsel %vm2957_vm5, %v2614_v6, %v1801_v3 }
  0x81   : > { %v1627_v56 = vrot.slane %v1626_v26, 4  ;;  %v1830_v5 = vunpack.c.l.b16 %v1802_v13 }
  0x83   : > { %v1632_v37 = vsel %vm2948_vm4, %v1627_v56, %v1631_v12  ;;  %v1835_v17 = vpack.c.b16 %v1831_v28, %v1830_v5 }
  0x84   : > { %v1657_v55 = vunpack.c.l.b16 %v1632_v37 }
  0x8c   : > { %1341 = vmatmul.bf16.vlgmr.msra.gmra.mxu1 %v3305_v8  ;;  %1896 = vmatmul.bf16.vlgmr.msra.gmra.mxu0 %v1832_v48  ;;  %v1613_v8 = vrot.slane %v1612_v36, 4  ;;  %v1250_v48 = vrot.slane %v3294_v60, 5 }
  0x8e   : > { %1732 = vmatmul.bf16.gmra.mxu3 %v1660_v21  ;;  %v1618_v35 = vsel %vm2948_vm4, %v1613_v8, %v1617_v23  ;;  %v1251_v49 = vsel %vm2957_vm5, %v2415_v43, %v1250_v48 }
  0x8f   : > { %1486 = vmatmul.bf16.gmra.mxu2 %v2499_v14  ;;  %v1656_v54 = vunpack.c.l.b16 %v1618_v35  ;;  %v1276_v58 = vunpack.c.l.b16 %v1251_v49 }
  0x91   : > { %v1280_v18 = vpack.c.b16 %v1276_v58, %v1275_v45  ;;  %v1661_v60 = vpack.c.b16 %v1657_v55, %v1656_v54 }
  0x9c   : > { %1346 = vmatmul.bf16.gmra.mxu1 %v3344_v9  ;;  %1901 = vmatmul.bf16.gmra.mxu0 %v1833_v52  ;;  %v1798_v9 = vsel %vm2957_vm5, %v2613_v46, %v1797_v2 }
  0x9d   : > { %v1829_v39 = vunpack.c.l.b16 %v1798_v9 }
  0x9e   : > { %1737 = vmatmul.bf16.gmra.mxu3 %v1661_v60 }
  0x9f   : > { %1491 = vmatmul.bf16.gmra.mxu2 %v2503_v59  ;;  %v1834_v14 = vpack.c.b16 %v1829_v39, %v1828_v47 }
  0xa9   : > { %v527_v15 = vpop.f32.mrf.mxu1  ;;  %v517_v16 = vpop.f32.mrf.mxu0 }
  0xac   : > { %1351 = vmatmul.bf16.gmra.mxu1 %v3385_v20  ;;  %1906 = vmatmul.bf16.gmra.mxu0 %v1834_v14 }
  0xaf   : > { %1911 = vmatmul.bf16.vlgmr.msra.gmra.mxu2 %v1835_v17 }
  0xb1   : > { %v529_v19 = vpop.f32.mrf.mxu1  ;;  %v519_v21 = vpop.f32.mrf.mxu0 }
  0xb2   : > { %v787_v1 = vpop.f32.mrf.mxu2  ;;  %v922_v10 = vpop.f32.mrf.mxu3 }
  0xb9   : > { %v532_v32 = vpop.f32.mrf.mxu1  ;;  %v522_v57 = vpop.f32.mrf.mxu0 }
  0xba   : > { %v789_v24 = vpop.f32.mrf.mxu2  ;;  %v924_v36 = vpop.f32.mrf.mxu3 }
  0xbc   : > { %1356 = vmatmul.bf16.gmra.mxu1 %v1280_v18 }
  0xc1   : > { %v534_v26 = vpop.f32.mrf.mxu1  ;;  %v524_v30 = vpop.f32.mrf.mxu0 }
  0xc2   : > { %v792_v25 = vpop.f32.mrf.mxu2  ;;  %v3428_v7 = vpop.f32.mrf.mxu3 }
  0xc9   : > { %v618_v8 = vpop.f32.mrf.mxu1  ;;  %v1168_v23 = vpop.f32.mrf.mxu0 }
  0xca   : > { %v794_v22 = vpop.f32.mrf.mxu2  ;;  %v619_v20 = vadd.f32 %v618_v8, %v517_v16  ;;  %v3430_v12 = vpop.f32.mrf.mxu3 }
  0xcc   : > { %v807_v56 = vadd.f32 %v787_v1, %v619_v20 }
  0xce   : > { %v942_v39 = vadd.f32 %v922_v10, %v807_v56 }
  0xd0   : > { %v1188_v28 = vadd.f32 %v1168_v23, %v942_v39 }
  0xd1   : > { %v620_v34 = vpop.f32.mrf.mxu1  ;;  %v1170_v35 = vpop.f32.mrf.mxu0 }
  0xd2   : > { %v797_v31 = vpop.f32.mrf.mxu2  ;;  %v621_v37 = vadd.f32 %v620_v34, %v519_v21  ;;  %v3432_v40 = vpop.f32.mrf.mxu3 }
  0xd4   : > { %v808_v38 = vadd.f32 %v789_v24, %v621_v37  ;;  %v2753_v24 = vld [vmem:[%s3462_s21] sm:$0xff]  }
  0xd9   : > { %v623_v27 = vpop.f32.mrf.mxu1  ;;  %v1173_v43 = vpop.f32.mrf.mxu0 }
  0xda   : > { %v799_v41 = vpop.f32.mrf.mxu2  ;;  %v624_v48 = vadd.f32 %v623_v27, %v522_v57  ;;  %v3434_v52 = vpop.f32.mrf.mxu3  ;;  %v2755_v27 = vunpack.c.h.bf16 %v2753_v24 }
  0xdc   : > { %v809_v50 = vadd.f32 %v792_v25, %v624_v48 }
  0xe1   : > { %v625_v53 = vpop.f32.mrf.mxu1  ;;  %v3436_v49 = vpop.f32.mrf.mxu0 }
  0xe2   : > { %v802_v51 = vpop.f32.mrf.mxu2  ;;  %v626_v54 = vadd.f32 %v625_v53, %v524_v30  ;;  %v3440_v61 = vpop.f32.mrf.mxu3 }
  0xe4   : > { %v810_v55 = vadd.f32 %v794_v22, %v626_v54 }
  0xe6   : > { %v945_v53 = vadd.f32 %v3430_v12, %v810_v55 }
  0xe9   : > { %v628_v58 = vpop.f32.mrf.mxu1  ;;  %v3438_v59 = vpop.f32.mrf.mxu0 }
  0xea   : > { %v804_v45 = vpop.f32.mrf.mxu2  ;;  %v629_v42 = vadd.f32 %v628_v58, %v527_v15  ;;  %v3448_v46 = vpop.f32.mrf.mxu3 }
  0xec   : > { %v3442_v18 = vadd.f32 %v797_v31, %v629_v42  ;;  %v2768_v42 = vld [vmem:[%s3462_s21 + $0x8] sm:$0xff]  }
  0xee   : > { %v946_v12 = vadd.f32 %v3432_v40, %v3442_v18 }
  0xf1   : > { %v630_v63 = vpop.f32.mrf.mxu1  ;;  %v3444_v60 = vpop.f32.mrf.mxu0 }
  0xf2   : > { %v1477_v62 = vpop.f32.mrf.mxu2  ;;  %v631_v44 = vadd.f32 %v630_v63, %v529_v19  ;;  %v1723_v11 = vpop.f32.mrf.mxu3  ;;  %v943_v19 = vadd.f32 %v924_v36, %v808_v38  ;;  %v944_v36 = vadd.f32 %v3428_v7, %v809_v50 }
  0xf4   : > { %v3446_v0 = vadd.f32 %v799_v41, %v631_v44  ;;  %v1189_v57 = vadd.f32 %v1170_v35, %v943_v19  ;;  %v1190_v38 = vadd.f32 %v1173_v43, %v944_v36  ;;  %v1191_v43 = vadd.f32 %v3436_v49, %v945_v53 }
  0xf6   : > { %v947_v40 = vadd.f32 %v3434_v52, %v3446_v0 }
  0xf9   : > { %v633_v3 = vpop.f32.mrf.mxu1  ;;  %v3450_v4 = vpop.f32.mrf.mxu0 }
  0xfa   : > { %v1479_v2 = vpop.f32.mrf.mxu2  ;;  %v634_v6 = vadd.f32 %v633_v3, %v532_v32  ;;  %v1725_v14 = vpop.f32.mrf.mxu3  ;;  %v3468_v32 = vld [vmem:[%s3521_s2] ss:$0 sm:$0xff]  ;;  %v2758_v3 = vunpack.c.l.bf16 %v2768_v42 }
  0xfc   : > { %v3452_v33 = vadd.f32 %v802_v51, %v634_v6 }
  0xfe   : > { %v948_v52 = vadd.f32 %v3440_v61, %v3452_v33 }
 0x101   : > { %v635_v13 = vpop.f32.mrf.mxu1  ;;  %v3454_v29 = vpop.f32.mrf.mxu0 }
 0x102   : > { %v1482_v9 = vpop.f32.mrf.mxu2  ;;  %v636_v47 = vadd.f32 %v635_v13, %v534_v26  ;;  %v2754_v26 = vunpack.c.l.bf16 %v2753_v24  ;;  %v1728_v20 = vpop.f32.mrf.mxu3 }
 0x104   : > { %v3456_v5 = vadd.f32 %v804_v45, %v636_v47 }
 0x106   : > { %v949_v61 = vadd.f32 %v3448_v46, %v3456_v5 }
 0x109   : > { %v1342_v15 = vpop.f32.mrf.mxu1  ;;  %v1897_v16 = vpop.f32.mrf.mxu0 }
 0x10a   : > { %v1362_v17 = vadd.f32 %v1342_v15, %v1188_v28  ;;  %v1484_v1 = vpop.f32.mrf.mxu2  ;;  %v1730_v58 = vpop.f32.mrf.mxu3  ;;  %v1192_v15 = vadd.f32 %v3438_v59, %v946_v12  ;;  %v1193_v59 = vadd.f32 %v3444_v60, %v947_v40  ;;  %v1194_v60 = vadd.f32 %v3450_v4, %v948_v52 }
 0x10b   : > { %v1195_v4 = vadd.f32 %v3454_v29, %v949_v61 }
 0x10c   : > { %v1497_v21 = vadd.f32 %v1477_v62, %v1362_v17 }
 0x10e   : > { %v1743_v10 = vadd.f32 %v1723_v11, %v1497_v21 }
 0x110   : > { %v1917_v25 = vadd.f32 %v1897_v16, %v1743_v10  ;;  %v2759_v16 = vunpack.c.h.bf16 %v2768_v42 }
 0x111   : > { %v1344_v30 = vpop.f32.mrf.mxu1  ;;  %v1899_v22 = vpop.f32.mrf.mxu0 }
 0x112   : > { %v1929_v8 = vadd.f32 %v3468_v32, %v1917_v25  ;;  %v1363_v23 = vadd.f32 %v1344_v30, %v1189_v57  ;;  %v1487_v34 = vpop.f32.mrf.mxu2  ;;  %v2769_v57 = vld [vmem:[%s3462_s21 + $0x10] sm:$0xff]  }
 0x114   : > { %v1953_v56 = vadd.f32 %v2754_v26, %v1929_v8  ;;  %v1498_v31 = vadd.f32 %v1479_v2, %v1363_v23 }
 0x116   : > { %v1961_v35 = vmax.f32 %v1953_v56, 0.0  ;;  %v1744_v37 = vadd.f32 %v1725_v14, %v1498_v31  ;;  %v1733_v14 = vpop.f32.mrf.mxu3 }
 0x118   : > { %1969 = vst [vmem:[%s3476_s27] sm:$0xff] %v1961_v35  ;;  %v1918_v41 = vadd.f32 %v1899_v22, %v1744_v37  ;;  %v2762_v22 = vunpack.c.l.bf16 %v2769_v57 }
 0x119   : > { %v1347_v48 = vpop.f32.mrf.mxu1  ;;  %v1902_v51 = vpop.f32.mrf.mxu0 }
 0x11a   : > { %v1930_v7 = vadd.f32 %v3468_v32, %v1918_v41  ;;  %v1364_v50 = vadd.f32 %v1347_v48, %v1190_v38  ;;  %v1489_v44 = vpop.f32.mrf.mxu2  ;;  %v2763_v41 = vunpack.c.h.bf16 %v2769_v57 }
 0x11c   : > { %v1954_v54 = vadd.f32 %v2755_v27, %v1930_v7  ;;  %v1499_v45 = vadd.f32 %v1482_v9, %v1364_v50 }
 0x11e   : > { %v1962_v62 = vmax.f32 %v1954_v54, 0.0  ;;  %v1745_v63 = vadd.f32 %v1728_v20, %v1499_v45  ;;  %v1735_v8 = vpop.f32.mrf.mxu3  ;;  %v2770_v54 = vld [vmem:[%s3462_s21 + $0x18] sm:$0xff]  }
 0x120   : > { %1970 = vst [vmem:[%s3476_s27 + $0x8] sm:$0xff] %v1962_v62  ;;  %v1919_v2 = vadd.f32 %v1902_v51, %v1745_v63  ;;  %v2766_v62 = vunpack.c.l.bf16 %v2770_v54 }
 0x121   : > { %v1349_v6 = vpop.f32.mrf.mxu1  ;;  %v1904_v11 = vpop.f32.mrf.mxu0 }
 0x122   : > { %v1931_v13 = vadd.f32 %v3468_v32, %v1919_v2  ;;  %v1365_v47 = vadd.f32 %v1349_v6, %v1191_v43  ;;  %v1492_v17 = vpop.f32.mrf.mxu2 }
 0x124   : > { %v1955_v55 = vadd.f32 %v2758_v3, %v1931_v13  ;;  %v1500_v9 = vadd.f32 %v1484_v1, %v1365_v47  ;;  %v2767_v47 = vunpack.c.h.bf16 %v2770_v54 }
 0x126   : > { %v1963_v39 = vmax.f32 %v1955_v55, 0.0  ;;  %v1746_v28 = vadd.f32 %v1730_v58, %v1500_v9  ;;  %v1738_v7 = vpop.f32.mrf.mxu3 }
 0x128   : > { %1971 = vst [vmem:[%s3476_s27 + $0x10] sm:$0xff] %v1963_v39  ;;  %v1920_v49 = vadd.f32 %v1904_v11, %v1746_v28 }
 0x129   : > { %v1352_v19 = vpop.f32.mrf.mxu1  ;;  %v1907_v10 = vpop.f32.mrf.mxu0 }
 0x12a   : > { %v1932_v21 = vadd.f32 %v3468_v32, %v1920_v49  ;;  %v1366_v24 = vadd.f32 %v1352_v19, %v1192_v15  ;;  %v1494_v56 = vpop.f32.mrf.mxu2 }
 0x12c   : > { %v1956_v18 = vadd.f32 %v2759_v16, %v1932_v21  ;;  %v1501_v1 = vadd.f32 %v1487_v34, %v1366_v24 }
 0x12e   : > { %v1964_v25 = vmax.f32 %v1956_v18, 0.0  ;;  %v1747_v26 = vadd.f32 %v1733_v14, %v1501_v1  ;;  %v1740_v46 = vpop.f32.mrf.mxu3 }
 0x130   : > { %1972 = vst [vmem:[%s3476_s27 + $0x18] sm:$0xff] %v1964_v25  ;;  %v1921_v30 = vadd.f32 %v1907_v10, %v1747_v26 }
 0x131   : > { %v1354_v23 = vpop.f32.mrf.mxu1  ;;  %v1909_v34 = vpop.f32.mrf.mxu0 }
 0x132   : > { %v1933_v20 = vadd.f32 %v3468_v32, %v1921_v30  ;;  %v1367_v36 = vadd.f32 %v1354_v23, %v1193_v59  ;;  %v1912_v53 = vpop.f32.mrf.mxu2 }
 0x134   : > { %v1957_v0 = vadd.f32 %v2762_v22, %v1933_v20  ;;  %v1502_v31 = vadd.f32 %v1489_v44, %v1367_v36 }
 0x136   : > { %v1965_v35 = vmax.f32 %v1957_v0, 0.0  ;;  %v1748_v37 = vadd.f32 %v1735_v8, %v1502_v31 }
 0x138   : > { %1973 = vst [vmem:[%s3476_s27 + $0x20] sm:$0xff] %v1965_v35  ;;  %v1922_v38 = vadd.f32 %v1909_v34, %v1748_v37 }
 0x139   : > { %v1357_v27 = vpop.f32.mrf.mxu1 }
 0x13a   : > { %v1934_v48 = vadd.f32 %v3468_v32, %v1922_v38  ;;  %v1368_v51 = vadd.f32 %v1357_v27, %v1194_v60  ;;  %v1914_v11 = vpop.f32.mrf.mxu2 }
 0x13c   : > { %v1958_v33 = vadd.f32 %v2763_v41, %v1934_v48  ;;  %v1503_v50 = vadd.f32 %v1492_v17, %v1368_v51 }
 0x13e   : > { %v1966_v45 = vmax.f32 %v1958_v33, 0.0  ;;  %v1749_v58 = vadd.f32 %v1738_v7, %v1503_v50 }
 0x140   : > { %1974 = vst [vmem:[%s3476_s27 + $0x28] sm:$0xff] %v1966_v45  ;;  %v1923_v42 = vadd.f32 %v1912_v53, %v1749_v58 }
 0x141   : > { %v1359_v63 = vpop.f32.mrf.mxu1 }
 0x142   : > { %v1935_v44 = vadd.f32 %v3468_v32, %v1923_v42  ;;  %v1369_v43 = vadd.f32 %v1359_v63, %v1195_v4 }
 0x144   : > { %v1959_v2 = vadd.f32 %v2766_v62, %v1935_v44  ;;  %v1504_v3 = vadd.f32 %v1494_v56, %v1369_v43 }
 0x146   : > { %v1967_v5 = vmax.f32 %v1959_v2, 0.0  ;;  %v1750_v6 = vadd.f32 %v1740_v46, %v1504_v3 }
 0x148   : > { %1975 = vst [vmem:[%s3476_s27 + $0x30] sm:$0xff] %v1967_v5  ;;  %v1924_v13 = vadd.f32 %v1914_v11, %v1750_v6 }
 0x14a   : > { %v1936_v12 = vadd.f32 %v3468_v32, %v1924_v13 }
 0x14c   : > { %v1960_v29 = vadd.f32 %v2767_v47, %v1936_v12 }
 0x14e   : > { %v1968_v55 = vmax.f32 %v1960_v29, 0.0 }
 0x150   : > { %1976 = vst [vmem:[%s3476_s27 + $0x38] sm:$0xff] %v1968_v55 }
 0x151 PF: > { %s14_s17 = sadd.s32 1, %s2835_s17   ;;  %s3528_s15 = smov %s2831_s16 }
 0x152   : > { %p11_p5 = scmp.ge.s32.totalorder %s14_s17, 4   ;;  %s3529_s16 = smov %s3531_s18 }
 0x154   :  { %13 = sbr.rel (!%p11_p5) target bundleno = 2 (0x2), region = 85 }

</bundles_post_ra>
